<compile_context>
chip_gen: v7x
topology: tpu7x:2x2x1
jax: 0.10.0
libtpu: 0.0.40
codegen_flags: <defaults>
</compile_context>

<pallas_src>
import functools

import jax
import jax.numpy as jnp
from jax import lax
from jax.experimental import pallas as pl
from jax.experimental.pallas import tpu as pltpu


# ---------------------------------------------------------------------------
# Kernel 1: LayerNorm(D) + exact GELU + input projection (both directions).
#   weights (D, 6H) = [f_r | f_z | f_n | b_r | b_z | b_n]  (bf16, resident)
#   output stored in bf16 (halves writeback + kernel-2 input DMA).
# ---------------------------------------------------------------------------
def _ln_gelu_proj_kernel(x_ref, gamma_ref, beta_ref, w_ref, b_ref, o_ref):
    x = x_ref[...]                                          # (TM1, D) f32
    mean = jnp.mean(x, axis=-1, keepdims=True)
    var = jnp.mean(jnp.square(x - mean), axis=-1, keepdims=True)
    xn = (x - mean) * lax.rsqrt(var + 1e-5)                 # torch LayerNorm eps
    y = xn * gamma_ref[0] + beta_ref[0]
    g = 0.5 * y * (1.0 + lax.erf(y * 0.7071067811865476))   # exact (erf) GELU
    proj = jnp.dot(g.astype(jnp.bfloat16), w_ref[...],      # (TM1, 6H), f32 acc
                   preferred_element_type=jnp.float32)
    o_ref[...] = (proj + b_ref[...]).astype(o_ref.dtype)    # bf16 store


# ---------------------------------------------------------------------------
# Kernel 2: bidirectional GRU recurrence, both directions interleaved per step.
# grid = (nT,) time blocks; forward reads block i, backward reads block nT-1-i.
# ---------------------------------------------------------------------------
def _bigru_kernel(gx_f_ref, gx_b_ref, wh_ref, bhn_ref, of_ref, ob_ref, h_ref,
                  *, t_valid, masked):
    i = pl.program_id(0)
    nT = pl.num_programs(0)
    TT, _, threeH = gx_f_ref.shape                          # static ints
    H = threeH // 3

    @pl.when(i == 0)
    def _():
        h_ref[...] = jnp.zeros_like(h_ref)

    # Hoisted resident weights / n-gate hidden biases.
    wh_f = wh_ref[0]                                        # (H, 3H) bf16
    wh_b = wh_ref[1]
    bhn_f = bhn_ref[0]                                      # (1, H) f32
    bhn_b = bhn_ref[1]

    def gru_gates(gx, gh, bhn, h):
        # gx already contains b_ih (all gates) + b_hh (r, z); bhn stays inside tanh.
        r = jax.nn.sigmoid(gx[:, :H] + gh[:, :H])
        z = jax.nn.sigmoid(gx[:, H:2 * H] + gh[:, H:2 * H])
        n = jnp.tanh(gx[:, 2 * H:] + r * (gh[:, 2 * H:] + bhn))
        return (1.0 - z) * n + z * h                        # f32 carry / gates

    def step(s, carry):
        hf, hb = carry                                      # (Bp, H) f32 each
        sb = TT - 1 - s                                     # backward local row
        gx_f = gx_f_ref[s].astype(jnp.float32)              # (Bp, 3H)
        gx_b = gx_b_ref[sb].astype(jnp.float32)
        gh_f = jnp.dot(hf.astype(jnp.bfloat16), wh_f,
                       preferred_element_type=jnp.float32)
        gh_b = jnp.dot(hb.astype(jnp.bfloat16), wh_b,
                       preferred_element_type=jnp.float32)
        hf_new = gru_gates(gx_f, gh_f, bhn_f, hf)
        hb_new = gru_gates(gx_b, gh_b, bhn_b, hb)
        if masked:
            # Padded (t >= t_valid) timesteps sit at the *start* of the backward
            # chain; keep h_b pinned to its zero init across them.
            t_b = (nT - 1 - i) * TT + sb
            hb_new = jnp.where(t_b < t_valid, hb_new, hb)
        of_ref[s] = hf_new                                  # dense (Bp, H) stores
        ob_ref[sb] = hb_new
        return hf_new, hb_new

    # Partial unroll: static sub-steps over a dynamic base (keeps LLO visibility
    # without full-unroll vreg spills at TT up to 32).
    unroll = max(u for u in (8, 4, 2, 1) if TT % u == 0)

    def block(u, carry):
        base = u * unroll
        for k in range(unroll):
            carry = step(base + k, carry)
        return carry

    hf, hb = lax.fori_loop(0, TT // unroll, block, (h_ref[0], h_ref[1]))
    h_ref[0] = hf
    h_ref[1] = hb


# ---------------------------------------------------------------------------
# Tiling helpers
# ---------------------------------------------------------------------------
def _largest_divisor(total, cap, quantum):
    """Largest divisor of `total` that is <= cap and a multiple of `quantum`."""
    c = min(cap, total)
    c -= c % quantum
    while c >= quantum:
        if total % c == 0:
            return c
        c -= quantum
    return None


def _choose_time_tile(T, Bp, H, cap=32, vmem_budget=20 * 1024 * 1024):
    """Timesteps per recurrence grid step (VMEM-budgeted); pads T if needed."""
    # per timestep: gx (2 dirs, double-buffered, bf16) + out (2 dirs, dbl, f32)
    per_t = Bp * (2 * 2 * 3 * H * 2 + 2 * 2 * H * 4)
    cap = max(1, min(cap, vmem_budget // max(per_t, 1), T))
    # prefer an exact divisor >= cap // 2 (no time padding)
    for c in range(cap, max(cap // 2, 1) - 1, -1):
        if T % c == 0:
            return c, T
    Tp = ((T + cap - 1) // cap) * cap
    return cap, Tp


# ---------------------------------------------------------------------------
# Wrapper
# ---------------------------------------------------------------------------
def bigru_forward(x_btd, params):
    B, T, D = x_btd.shape
    H = params["w_hh_f"].shape[0] // 3

    # ---- fused weight layouts (one-time, cheap under jit) ----
    w_in = jnp.concatenate(
        [params["w_ih_f"].T, params["w_ih_b"].T], axis=1).astype(jnp.bfloat16)

    def _fold_bias(b_ih, b_hh):
        # b_ih (all gates) + b_hh (r, z); b_hh_n stays inside tanh's r*(.) term.
        return jnp.concatenate([b_ih[:2 * H] + b_hh[:2 * H], b_ih[2 * H:]], 0)

    b_in = jnp.concatenate(
        [_fold_bias(params["b_ih_f"], params["b_hh_f"]),
         _fold_bias(params["b_ih_b"], params["b_hh_b"])],
        axis=0).reshape(1, 6 * H).astype(jnp.float32)

    w_h = jnp.stack([params["w_hh_f"].T, params["w_hh_b"].T],
                    axis=0).astype(jnp.bfloat16)                  # (2, H, 3H)
    b_hn = jnp.stack([params["b_hh_f"][2 * H:], params["b_hh_b"][2 * H:]],
                     axis=0).reshape(2, 1, H).astype(jnp.float32)
    gamma = params["gamma"].reshape(1, D).astype(jnp.float32)
    beta = params["beta"].reshape(1, D).astype(jnp.float32)

    # ---- layout: pad batch to x8 sublanes, time-major, pad time to TT ----
    Bp = ((B + 7) // 8) * 8
    TT, Tp = _choose_time_tile(T, Bp, H)
    nT = Tp // TT

    x = x_btd.astype(jnp.float32)
    if Bp != B:
        x = jnp.pad(x, ((0, Bp - B), (0, 0), (0, 0)))
    x_tm = jnp.transpose(x, (1, 0, 2))                            # (T, Bp, D)
    if Tp != T:
        x_tm = jnp.pad(x_tm, ((0, Tp - T), (0, 0), (0, 0)))

    M = Tp * Bp

    # ---- Kernel 1 row tile: large (MXU fill), decoupled from TT, VMEM-budgeted.
    per_row = 2 * (D * 4 + 6 * H * 2)            # dbl-buffered f32 in + bf16 out
    row_cap = max(8, min(1024, (24 * 1024 * 1024) // max(per_row, 1)))
    TM1 = (_largest_divisor(M, row_cap, 16)
           or _largest_divisor(M, row_cap, 8))

    # ---- Kernel 1: LN + GELU + input projection (one big matmul) ----
    gx = pl.pallas_call(
        _ln_gelu_proj_kernel,
        grid=(M // TM1,),
        in_specs=[
            pl.BlockSpec((TM1, D), lambda i: (i, 0)),
            pl.BlockSpec((1, D), lambda i: (0, 0)),
            pl.BlockSpec((1, D), lambda i: (0, 0)),
            pl.BlockSpec((D, 6 * H), lambda i: (0, 0)),   # resident bf16 weights
            pl.BlockSpec((1, 6 * H), lambda i: (0, 0)),
        ],
        out_specs=pl.BlockSpec((TM1, 6 * H), lambda i: (i, 0)),
        out_shape=jax.ShapeDtypeStruct((M, 6 * H), jnp.bfloat16),
        compiler_params=pltpu.CompilerParams(
            dimension_semantics=("parallel",),
            vmem_limit_bytes=32 * 1024 * 1024),
    )(x_tm.reshape(M, D), gamma, beta, w_in, b_in)
    gx = gx.reshape(Tp, Bp, 6 * H)

    # ---- Kernel 2: interleaved bidirectional recurrence ----
    kernel2 = functools.partial(_bigru_kernel, t_valid=T, masked=(Tp != T))
    out_f, out_b = pl.pallas_call(
        kernel2,
        grid=(nT,),
        in_specs=[
            # same gx array passed twice: forward half (lane block 0) in time
            # order, backward half (lane block 1) in reversed block order.
            pl.BlockSpec((TT, Bp, 3 * H), lambda i: (i, 0, 0)),
            pl.BlockSpec((TT, Bp, 3 * H), lambda i: (nT - 1 - i, 0, 1)),
            pl.BlockSpec((2, H, 3 * H), lambda i: (0, 0, 0)),   # resident Wh
            pl.BlockSpec((2, 1, H), lambda i: (0, 0, 0)),       # b_hh (n gate)
        ],
        out_specs=(
            pl.BlockSpec((TT, Bp, H), lambda i: (i, 0, 0)),
            pl.BlockSpec((TT, Bp, H), lambda i: (nT - 1 - i, 0, 0)),
        ),
        out_shape=(
            jax.ShapeDtypeStruct((Tp, Bp, H), jnp.float32),
            jax.ShapeDtypeStruct((Tp, Bp, H), jnp.float32),
        ),
        scratch_shapes=[pltpu.VMEM((2, Bp, H), jnp.float32)],   # per-direction h
        compiler_params=pltpu.CompilerParams(
            dimension_semantics=("arbitrary",),
            vmem_limit_bytes=32 * 1024 * 1024),
    )(gx, gx, w_h, b_hn)

    out = jnp.concatenate([out_f, out_b], axis=-1)                # (Tp, Bp, 2H)
    out = jnp.transpose(out, (1, 0, 2))[:B, :T]                   # (B, T, 2H)
    # TODO(synk): training-mode dropout omitted; nn.Dropout is identity in eval.
    return out


# ---------------------------------------------------------------------------
# Deterministic parameter init in PyTorch layout (nn.GRU: U(-1/sqrt(H), 1/sqrt(H));
# gate order [r; z; n] along the 3H axis; LayerNorm gamma=1, beta=0).
# ---------------------------------------------------------------------------
def init_params(key, D, H):
    k = 1.0 / float(H) ** 0.5
    keys = jax.random.split(key, 8)

    def u(kk, shape):
        return jax.random.uniform(kk, shape, jnp.float32, -k, k)

    return dict(
        gamma=jnp.ones((D,), jnp.float32),
        beta=jnp.zeros((D,), jnp.float32),
        w_ih_f=u(keys[0], (3 * H, D)),
        w_hh_f=u(keys[1], (3 * H, H)),
        b_ih_f=u(keys[2], (3 * H,)),
        b_hh_f=u(keys[3], (3 * H,)),
        w_ih_b=u(keys[4], (3 * H, D)),
        w_hh_b=u(keys[5], (3 * H, H)),
        b_ih_b=u(keys[6], (3 * H,)),
        b_hh_b=u(keys[7], (3 * H,)),
    )


if __name__ == "__main__":
    B, T, D, H = 2, 8, 128, 128      # batch, seq, rnn_dim, hidden_size
    key = jax.random.PRNGKey(0)
    kx, kp = jax.random.split(key)
    x = jax.random.normal(kx, (B, T, D), jnp.float32)
    params = init_params(kp, D, H)

    out = jax.jit(bigru_forward)(x, params)
    jax.block_until_ready(out)
    assert out.shape == (B, T, 2 * H), out.shape
    assert out.dtype == jnp.float32
    assert bool(jnp.all(jnp.isfinite(out)))
    print("KERNEL_OK")
</pallas_src>

<mosaic_0001>
module attributes {stable_mosaic.version = 11 : i64} {
  func.func @_ln_gelu_proj_kernel(%arg0: i32, %arg1: memref<64x128xf32, #tpu.memory_space<vmem>>, %arg2: memref<1x128xf32, #tpu.memory_space<vmem>>, %arg3: memref<1x128xf32, #tpu.memory_space<vmem>>, %arg4: memref<128x768xbf16, #tpu.memory_space<vmem>>, %arg5: memref<1x768xf32, #tpu.memory_space<vmem>>, %arg6: memref<64x768xbf16, #tpu.memory_space<vmem>>) attributes {dimension_semantics = [#tpu.dimension_semantics<parallel>], iteration_bounds = array<i64: 1>, scalar_prefetch = 0 : i64, scratch_operands = 0 : i64, tpu.core_type = #tpu.core_type<tc>, window_params = [{transform_indices = @transform_0, window_bounds = array<i64: 64, 128>}, {pipeline_mode = #tpu.pipeline_mode<synchronous>, transform_indices = @transform_1, window_bounds = array<i64: 1, 128>}, {pipeline_mode = #tpu.pipeline_mode<synchronous>, transform_indices = @transform_2, window_bounds = array<i64: 1, 128>}, {pipeline_mode = #tpu.pipeline_mode<synchronous>, transform_indices = @transform_3, window_bounds = array<i64: 128, 768>}, {pipeline_mode = #tpu.pipeline_mode<synchronous>, transform_indices = @transform_4, window_bounds = array<i64: 1, 768>}, {transform_indices = @transform_5, window_bounds = array<i64: 64, 768>}]} {
    %c0 = arith.constant 0 : index
    %c0_0 = arith.constant 0 : index
    %0 = vector.load %arg1[%c0, %c0_0] : memref<64x128xf32, #tpu.memory_space<vmem>>, vector<64x128xf32>
    %cst = arith.constant dense<0.000000e+00> : vector<64xf32>
    %1 = vector.multi_reduction <add>, %0, %cst [1] : vector<64x128xf32> to vector<64xf32>
    %2 = vector.shape_cast %1 : vector<64xf32> to vector<64x1xf32>
    %cst_1 = arith.constant 1.280000e+02 : f32
    %3 = vector.broadcast %cst_1 : f32 to vector<64x1xf32>
    %4 = arith.divf %2, %3 : vector<64x1xf32>
    %5 = vector.broadcast %4 : vector<64x1xf32> to vector<64x128xf32>
    %6 = arith.subf %0, %5 : vector<64x128xf32>
    %7 = arith.mulf %6, %6 : vector<64x128xf32>
    %cst_2 = arith.constant dense<0.000000e+00> : vector<64xf32>
    %8 = vector.multi_reduction <add>, %7, %cst_2 [1] : vector<64x128xf32> to vector<64xf32>
    %9 = vector.shape_cast %8 : vector<64xf32> to vector<64x1xf32>
    %cst_3 = arith.constant 1.280000e+02 : f32
    %10 = vector.broadcast %cst_3 : f32 to vector<64x1xf32>
    %11 = arith.divf %9, %10 : vector<64x1xf32>
    %12 = vector.broadcast %4 : vector<64x1xf32> to vector<64x128xf32>
    %13 = arith.subf %0, %12 : vector<64x128xf32>
    %cst_4 = arith.constant 9.99999974E-6 : f32
    %14 = vector.broadcast %cst_4 : f32 to vector<64x1xf32>
    %15 = arith.addf %11, %14 : vector<64x1xf32>
    %16 = math.rsqrt %15 : vector<64x1xf32>
    %17 = vector.broadcast %16 : vector<64x1xf32> to vector<64x128xf32>
    %18 = arith.mulf %13, %17 : vector<64x128xf32>
    %c0_5 = arith.constant 0 : index
    %c0_6 = arith.constant 0 : index
    %19 = vector.load %arg2[%c0_5, %c0_6] : memref<1x128xf32, #tpu.memory_space<vmem>>, vector<1x128xf32>
    %20 = vector.shape_cast %19 : vector<1x128xf32> to vector<128xf32>
    %21 = vector.shape_cast %20 : vector<128xf32> to vector<1x128xf32>
    %22 = vector.broadcast %21 : vector<1x128xf32> to vector<64x128xf32>
    %23 = arith.mulf %18, %22 : vector<64x128xf32>
    %c0_7 = arith.constant 0 : index
    %c0_8 = arith.constant 0 : index
    %24 = vector.load %arg3[%c0_7, %c0_8] : memref<1x128xf32, #tpu.memory_space<vmem>>, vector<1x128xf32>
    %25 = vector.shape_cast %24 : vector<1x128xf32> to vector<128xf32>
    %26 = vector.shape_cast %25 : vector<128xf32> to vector<1x128xf32>
    %27 = vector.broadcast %26 : vector<1x128xf32> to vector<64x128xf32>
    %28 = arith.addf %23, %27 : vector<64x128xf32>
    %cst_9 = arith.constant 5.000000e-01 : f32
    %29 = vector.broadcast %cst_9 : f32 to vector<64x128xf32>
    %30 = arith.mulf %29, %28 : vector<64x128xf32>
    %cst_10 = arith.constant 0.707106769 : f32
    %31 = vector.broadcast %cst_10 : f32 to vector<64x128xf32>
    %32 = arith.mulf %28, %31 : vector<64x128xf32>
    %33 = math.erf %32 : vector<64x128xf32>
    %cst_11 = arith.constant 1.000000e+00 : f32
    %34 = vector.broadcast %cst_11 : f32 to vector<64x128xf32>
    %35 = arith.addf %34, %33 : vector<64x128xf32>
    %36 = arith.mulf %30, %35 : vector<64x128xf32>
    %37 = arith.truncf %36 : vector<64x128xf32> to vector<64x128xbf16>
    %c0_12 = arith.constant 0 : index
    %c0_13 = arith.constant 0 : index
    %38 = vector.load %arg4[%c0_12, %c0_13] : memref<128x768xbf16, #tpu.memory_space<vmem>>, vector<128x768xbf16>
    %cst_14 = arith.constant dense<0.000000e+00> : vector<64x768xf32>
    %39 = tpu.matmul %37, %38, %cst_14 {dimension_numbers = #tpu.dot_dimension_numbers<[1], [0], [0], [1], [0, 0, 1, 1], [], []>} : vector<64x128xbf16>, vector<128x768xbf16>, vector<64x768xf32> -> vector<64x768xf32>
    %c0_15 = arith.constant 0 : index
    %c0_16 = arith.constant 0 : index
    %40 = vector.load %arg5[%c0_15, %c0_16] : memref<1x768xf32, #tpu.memory_space<vmem>>, vector<1x768xf32>
    %41 = vector.broadcast %40 : vector<1x768xf32> to vector<64x768xf32>
    %42 = arith.addf %39, %41 : vector<64x768xf32>
    %43 = arith.truncf %42 : vector<64x768xf32> to vector<64x768xbf16>
    %c0_17 = arith.constant 0 : index
    %c0_18 = arith.constant 0 : index
    %44 = vector.load %arg6[%c0_17, %c0_18] : memref<64x768xbf16, #tpu.memory_space<vmem>>, vector<64x768xbf16>
    tpu.vector_store %arg6[%c0_17, %c0_18], %43 {strides = array<i32>} : memref<64x768xbf16, #tpu.memory_space<vmem>>, vector<64x768xbf16>,
    return
  }
  func.func @transform_0(%arg0: i32) -> (i32, i32) {
    %c0_i32 = arith.constant 0 : i32
    %c0_i32_0 = arith.constant 0 : i32
    return %arg0, %c0_i32 : i32, i32
  }
  func.func @transform_1(%arg0: i32) -> (i32, i32) {
    %c0_i32 = arith.constant 0 : i32
    %c0_i32_0 = arith.constant 0 : i32
    %c0_i32_1 = arith.constant 0 : i32
    return %c0_i32, %c0_i32_0 : i32, i32
  }
  func.func @transform_2(%arg0: i32) -> (i32, i32) {
    %c0_i32 = arith.constant 0 : i32
    %c0_i32_0 = arith.constant 0 : i32
    %c0_i32_1 = arith.constant 0 : i32
    return %c0_i32, %c0_i32_0 : i32, i32
  }
  func.func @transform_3(%arg0: i32) -> (i32, i32) {
    %c0_i32 = arith.constant 0 : i32
    %c0_i32_0 = arith.constant 0 : i32
    %c0_i32_1 = arith.constant 0 : i32
    return %c0_i32, %c0_i32_0 : i32, i32
  }
  func.func @transform_4(%arg0: i32) -> (i32, i32) {
    %c0_i32 = arith.constant 0 : i32
    %c0_i32_0 = arith.constant 0 : i32
    %c0_i32_1 = arith.constant 0 : i32
    return %c0_i32, %c0_i32_0 : i32, i32
  }
  func.func @transform_5(%arg0: i32) -> (i32, i32) {
    %c0_i32 = arith.constant 0 : i32
    %c0_i32_0 = arith.constant 0 : i32
    return %arg0, %c0_i32 : i32, i32
  }
}

module attributes {stable_mosaic.version = 11 : i64} {
  func.func @_bigru_kernel(%arg0: i32, %arg1: memref<8x8x384xbf16, #tpu.memory_space<vmem>>, %arg2: memref<8x8x384xbf16, #tpu.memory_space<vmem>>, %arg3: memref<2x128x384xbf16, #tpu.memory_space<vmem>>, %arg4: memref<2x1x128xf32, #tpu.memory_space<vmem>>, %arg5: memref<8x8x128xf32, #tpu.memory_space<vmem>>, %arg6: memref<8x8x128xf32, #tpu.memory_space<vmem>>, %arg7: memref<2x8x128xf32, #tpu.memory_space<vmem>>) attributes {dimension_semantics = [#tpu.dimension_semantics<arbitrary>], iteration_bounds = array<i64: 1>, scalar_prefetch = 0 : i64, scratch_operands = 1 : i64, tpu.core_type = #tpu.core_type<tc>, window_params = [{transform_indices = @transform_0, window_bounds = array<i64: 8, 8, 384>}, {transform_indices = @transform_1, window_bounds = array<i64: 8, 8, 384>}, {pipeline_mode = #tpu.pipeline_mode<synchronous>, transform_indices = @transform_2, window_bounds = array<i64: 2, 128, 384>}, {pipeline_mode = #tpu.pipeline_mode<synchronous>, transform_indices = @transform_3, window_bounds = array<i64: 2, 1, 128>}, {transform_indices = @transform_4, window_bounds = array<i64: 8, 8, 128>}, {transform_indices = @transform_5, window_bounds = array<i64: 8, 8, 128>}]} {
    %c0_i32 = arith.constant 0 : i32
    %0 = arith.cmpi eq, %arg0, %c0_i32 : i32
    %1 = arith.extui %0 : i1 to i32
    %c0_i32_0 = arith.constant 0 : i32
    %2 = arith.cmpi ne, %1, %c0_i32_0 : i32
    scf.if %2 {
      %cst_161 = arith.constant 0.000000e+00 : f32
      %646 = vector.broadcast %cst_161 : f32 to vector<2x8x128xf32>
      %c0_162 = arith.constant 0 : index
      %c0_163 = arith.constant 0 : index
      %c0_164 = arith.constant 0 : index
      %647 = vector.load %arg7[%c0_162, %c0_163, %c0_164] : memref<2x8x128xf32, #tpu.memory_space<vmem>>, vector<2x8x128xf32>
      tpu.vector_store %arg7[%c0_162, %c0_163, %c0_164], %646 {strides = array<i32>} : memref<2x8x128xf32, #tpu.memory_space<vmem>>, vector<2x8x128xf32>,
    } else {
    }
    %c0 = arith.constant 0 : index
    %c0_1 = arith.constant 0 : index
    %c0_2 = arith.constant 0 : index
    %3 = vector.load %arg3[%c0, %c0_1, %c0_2] : memref<2x128x384xbf16, #tpu.memory_space<vmem>>, vector<1x128x384xbf16>
    %4 = vector.shape_cast %3 : vector<1x128x384xbf16> to vector<128x384xbf16>
    %c1 = arith.constant 1 : index
    %c0_3 = arith.constant 0 : index
    %c0_4 = arith.constant 0 : index
    %5 = vector.load %arg3[%c1, %c0_3, %c0_4] : memref<2x128x384xbf16, #tpu.memory_space<vmem>>, vector<1x128x384xbf16>
    %6 = vector.shape_cast %5 : vector<1x128x384xbf16> to vector<128x384xbf16>
    %c0_5 = arith.constant 0 : index
    %c0_6 = arith.constant 0 : index
    %c0_7 = arith.constant 0 : index
    %7 = vector.load %arg4[%c0_5, %c0_6, %c0_7] : memref<2x1x128xf32, #tpu.memory_space<vmem>>, vector<1x1x128xf32>
    %8 = vector.shape_cast %7 : vector<1x1x128xf32> to vector<1x128xf32>
    %c1_8 = arith.constant 1 : index
    %c0_9 = arith.constant 0 : index
    %c0_10 = arith.constant 0 : index
    %9 = vector.load %arg4[%c1_8, %c0_9, %c0_10] : memref<2x1x128xf32, #tpu.memory_space<vmem>>, vector<1x1x128xf32>
    %10 = vector.shape_cast %9 : vector<1x1x128xf32> to vector<1x128xf32>
    %c0_11 = arith.constant 0 : index
    %c0_12 = arith.constant 0 : index
    %c0_13 = arith.constant 0 : index
    %11 = vector.load %arg7[%c0_11, %c0_12, %c0_13] : memref<2x8x128xf32, #tpu.memory_space<vmem>>, vector<1x8x128xf32>
    %12 = vector.shape_cast %11 : vector<1x8x128xf32> to vector<8x128xf32>
    %c1_14 = arith.constant 1 : index
    %c0_15 = arith.constant 0 : index
    %c0_16 = arith.constant 0 : index
    %13 = vector.load %arg7[%c1_14, %c0_15, %c0_16] : memref<2x8x128xf32, #tpu.memory_space<vmem>>, vector<1x8x128xf32>
    %14 = vector.shape_cast %13 : vector<1x8x128xf32> to vector<8x128xf32>
    %c0_i32_17 = arith.constant 0 : i32
    %c8_i32 = arith.constant 8 : i32
    %15 = arith.muli %c0_i32_17, %c8_i32 : i32
    %c0_i32_18 = arith.constant 0 : i32
    %16 = arith.addi %15, %c0_i32_18 : i32
    %c7_i32 = arith.constant 7 : i32
    %17 = arith.subi %c7_i32, %16 : i32
    %18 = arith.index_cast %16 : i32 to index
    %c0_19 = arith.constant 0 : index
    %c0_20 = arith.constant 0 : index
    %19 = vector.load %arg1[%18, %c0_19, %c0_20] : memref<8x8x384xbf16, #tpu.memory_space<vmem>>, vector<1x8x384xbf16>
    %20 = vector.shape_cast %19 : vector<1x8x384xbf16> to vector<8x384xbf16>
    %21 = arith.extf %20 : vector<8x384xbf16> to vector<8x384xf32>
    %22 = arith.index_cast %17 : i32 to index
    %c0_21 = arith.constant 0 : index
    %c0_22 = arith.constant 0 : index
    %23 = vector.load %arg2[%22, %c0_21, %c0_22] : memref<8x8x384xbf16, #tpu.memory_space<vmem>>, vector<1x8x384xbf16>
    %24 = vector.shape_cast %23 : vector<1x8x384xbf16> to vector<8x384xbf16>
    %25 = arith.extf %24 : vector<8x384xbf16> to vector<8x384xf32>
    %26 = arith.truncf %12 : vector<8x128xf32> to vector<8x128xbf16>
    %cst = arith.constant dense<0.000000e+00> : vector<8x384xf32>
    %27 = tpu.matmul %26, %4, %cst {dimension_numbers = #tpu.dot_dimension_numbers<[1], [0], [0], [1], [0, 0, 1, 1], [], []>} : vector<8x128xbf16>, vector<128x384xbf16>, vector<8x384xf32> -> vector<8x384xf32>
    %28 = arith.truncf %14 : vector<8x128xf32> to vector<8x128xbf16>
    %cst_23 = arith.constant dense<0.000000e+00> : vector<8x384xf32>
    %29 = tpu.matmul %28, %6, %cst_23 {dimension_numbers = #tpu.dot_dimension_numbers<[1], [0], [0], [1], [0, 0, 1, 1], [], []>} : vector<8x128xbf16>, vector<128x384xbf16>, vector<8x384xf32> -> vector<8x384xf32>
    %30 = vector.extract_strided_slice %21 {offsets = [0, 0], sizes = [8, 128], strides = [1, 1]} : vector<8x384xf32> to vector<8x128xf32>
    %31 = vector.extract_strided_slice %27 {offsets = [0, 0], sizes = [8, 128], strides = [1, 1]} : vector<8x384xf32> to vector<8x128xf32>
    %32 = arith.addf %30, %31 : vector<8x128xf32>
    %33 = arith.negf %32 : vector<8x128xf32>
    %34 = math.exp %33 : vector<8x128xf32>
    %cst_24 = arith.constant 1.000000e+00 : f32
    %35 = vector.broadcast %cst_24 : f32 to vector<8x128xf32>
    %36 = arith.addf %35, %34 : vector<8x128xf32>
    %37 = arith.divf %35, %36 : vector<8x128xf32>
    %38 = vector.extract_strided_slice %21 {offsets = [0, 128], sizes = [8, 128], strides = [1, 1]} : vector<8x384xf32> to vector<8x128xf32>
    %39 = vector.extract_strided_slice %27 {offsets = [0, 128], sizes = [8, 128], strides = [1, 1]} : vector<8x384xf32> to vector<8x128xf32>
    %40 = arith.addf %38, %39 : vector<8x128xf32>
    %41 = arith.negf %40 : vector<8x128xf32>
    %42 = math.exp %41 : vector<8x128xf32>
    %cst_25 = arith.constant 1.000000e+00 : f32
    %43 = vector.broadcast %cst_25 : f32 to vector<8x128xf32>
    %44 = arith.addf %43, %42 : vector<8x128xf32>
    %45 = arith.divf %43, %44 : vector<8x128xf32>
    %46 = vector.extract_strided_slice %21 {offsets = [0, 256], sizes = [8, 128], strides = [1, 1]} : vector<8x384xf32> to vector<8x128xf32>
    %47 = vector.extract_strided_slice %27 {offsets = [0, 256], sizes = [8, 128], strides = [1, 1]} : vector<8x384xf32> to vector<8x128xf32>
    %48 = vector.broadcast %8 : vector<1x128xf32> to vector<8x128xf32>
    %49 = arith.addf %47, %48 : vector<8x128xf32>
    %50 = arith.mulf %37, %49 : vector<8x128xf32>
    %51 = arith.addf %46, %50 : vector<8x128xf32>
    %52 = math.tanh %51 : vector<8x128xf32>
    %cst_26 = arith.constant 1.000000e+00 : f32
    %53 = vector.broadcast %cst_26 : f32 to vector<8x128xf32>
    %54 = arith.subf %53, %45 : vector<8x128xf32>
    %55 = arith.mulf %54, %52 : vector<8x128xf32>
    %56 = arith.mulf %45, %12 : vector<8x128xf32>
    %57 = arith.addf %55, %56 : vector<8x128xf32>
    %58 = vector.extract_strided_slice %25 {offsets = [0, 0], sizes = [8, 128], strides = [1, 1]} : vector<8x384xf32> to vector<8x128xf32>
    %59 = vector.extract_strided_slice %29 {offsets = [0, 0], sizes = [8, 128], strides = [1, 1]} : vector<8x384xf32> to vector<8x128xf32>
    %60 = arith.addf %58, %59 : vector<8x128xf32>
    %61 = arith.negf %60 : vector<8x128xf32>
    %62 = math.exp %61 : vector<8x128xf32>
    %cst_27 = arith.constant 1.000000e+00 : f32
    %63 = vector.broadcast %cst_27 : f32 to vector<8x128xf32>
    %64 = arith.addf %63, %62 : vector<8x128xf32>
    %65 = arith.divf %63, %64 : vector<8x128xf32>
    %66 = vector.extract_strided_slice %25 {offsets = [0, 128], sizes = [8, 128], strides = [1, 1]} : vector<8x384xf32> to vector<8x128xf32>
    %67 = vector.extract_strided_slice %29 {offsets = [0, 128], sizes = [8, 128], strides = [1, 1]} : vector<8x384xf32> to vector<8x128xf32>
    %68 = arith.addf %66, %67 : vector<8x128xf32>
    %69 = arith.negf %68 : vector<8x128xf32>
    %70 = math.exp %69 : vector<8x128xf32>
    %cst_28 = arith.constant 1.000000e+00 : f32
    %71 = vector.broadcast %cst_28 : f32 to vector<8x128xf32>
    %72 = arith.addf %71, %70 : vector<8x128xf32>
    %73 = arith.divf %71, %72 : vector<8x128xf32>
    %74 = vector.extract_strided_slice %25 {offsets = [0, 256], sizes = [8, 128], strides = [1, 1]} : vector<8x384xf32> to vector<8x128xf32>
    %75 = vector.extract_strided_slice %29 {offsets = [0, 256], sizes = [8, 128], strides = [1, 1]} : vector<8x384xf32> to vector<8x128xf32>
    %76 = vector.broadcast %10 : vector<1x128xf32> to vector<8x128xf32>
    %77 = arith.addf %75, %76 : vector<8x128xf32>
    %78 = arith.mulf %65, %77 : vector<8x128xf32>
    %79 = arith.addf %74, %78 : vector<8x128xf32>
    %80 = math.tanh %79 : vector<8x128xf32>
    %cst_29 = arith.constant 1.000000e+00 : f32
    %81 = vector.broadcast %cst_29 : f32 to vector<8x128xf32>
    %82 = arith.subf %81, %73 : vector<8x128xf32>
    %83 = arith.mulf %82, %80 : vector<8x128xf32>
    %84 = arith.mulf %73, %14 : vector<8x128xf32>
    %85 = arith.addf %83, %84 : vector<8x128xf32>
    %86 = arith.index_cast %16 : i32 to index
    %c0_30 = arith.constant 0 : index
    %c0_31 = arith.constant 0 : index
    %87 = vector.load %arg5[%86, %c0_30, %c0_31] : memref<8x8x128xf32, #tpu.memory_space<vmem>>, vector<1x8x128xf32>
    %88 = vector.shape_cast %87 : vector<1x8x128xf32> to vector<8x128xf32>
    %89 = vector.shape_cast %57 : vector<8x128xf32> to vector<1x8x128xf32>
    tpu.vector_store %arg5[%86, %c0_30, %c0_31], %89 {strides = array<i32>} : memref<8x8x128xf32, #tpu.memory_space<vmem>>, vector<1x8x128xf32>,
    %90 = arith.index_cast %17 : i32 to index
    %c0_32 = arith.constant 0 : index
    %c0_33 = arith.constant 0 : index
    %91 = vector.load %arg6[%90, %c0_32, %c0_33] : memref<8x8x128xf32, #tpu.memory_space<vmem>>, vector<1x8x128xf32>
    %92 = vector.shape_cast %91 : vector<1x8x128xf32> to vector<8x128xf32>
    %93 = vector.shape_cast %85 : vector<8x128xf32> to vector<1x8x128xf32>
    tpu.vector_store %arg6[%90, %c0_32, %c0_33], %93 {strides = array<i32>} : memref<8x8x128xf32, #tpu.memory_space<vmem>>, vector<1x8x128xf32>,
    %c1_i32 = arith.constant 1 : i32
    %94 = arith.addi %15, %c1_i32 : i32
    %c7_i32_34 = arith.constant 7 : i32
    %95 = arith.subi %c7_i32_34, %94 : i32
    %96 = arith.index_cast %94 : i32 to index
    %c0_35 = arith.constant 0 : index
    %c0_36 = arith.constant 0 : index
    %97 = vector.load %arg1[%96, %c0_35, %c0_36] : memref<8x8x384xbf16, #tpu.memory_space<vmem>>, vector<1x8x384xbf16>
    %98 = vector.shape_cast %97 : vector<1x8x384xbf16> to vector<8x384xbf16>
    %99 = arith.extf %98 : vector<8x384xbf16> to vector<8x384xf32>
    %100 = arith.index_cast %95 : i32 to index
    %c0_37 = arith.constant 0 : index
    %c0_38 = arith.constant 0 : index
    %101 = vector.load %arg2[%100, %c0_37, %c0_38] : memref<8x8x384xbf16, #tpu.memory_space<vmem>>, vector<1x8x384xbf16>
    %102 = vector.shape_cast %101 : vector<1x8x384xbf16> to vector<8x384xbf16>
    %103 = arith.extf %102 : vector<8x384xbf16> to vector<8x384xf32>
    %104 = arith.truncf %57 : vector<8x128xf32> to vector<8x128xbf16>
    %cst_39 = arith.constant dense<0.000000e+00> : vector<8x384xf32>
    %105 = tpu.matmul %104, %4, %cst_39 {dimension_numbers = #tpu.dot_dimension_numbers<[1], [0], [0], [1], [0, 0, 1, 1], [], []>} : vector<8x128xbf16>, vector<128x384xbf16>, vector<8x384xf32> -> vector<8x384xf32>
    %106 = arith.truncf %85 : vector<8x128xf32> to vector<8x128xbf16>
    %cst_40 = arith.constant dense<0.000000e+00> : vector<8x384xf32>
    %107 = tpu.matmul %106, %6, %cst_40 {dimension_numbers = #tpu.dot_dimension_numbers<[1], [0], [0], [1], [0, 0, 1, 1], [], []>} : vector<8x128xbf16>, vector<128x384xbf16>, vector<8x384xf32> -> vector<8x384xf32>
    %108 = vector.extract_strided_slice %99 {offsets = [0, 0], sizes = [8, 128], strides = [1, 1]} : vector<8x384xf32> to vector<8x128xf32>
    %109 = vector.extract_strided_slice %105 {offsets = [0, 0], sizes = [8, 128], strides = [1, 1]} : vector<8x384xf32> to vector<8x128xf32>
    %110 = arith.addf %108, %109 : vector<8x128xf32>
    %111 = arith.negf %110 : vector<8x128xf32>
    %112 = math.exp %111 : vector<8x128xf32>
    %cst_41 = arith.constant 1.000000e+00 : f32
    %113 = vector.broadcast %cst_41 : f32 to vector<8x128xf32>
    %114 = arith.addf %113, %112 : vector<8x128xf32>
    %115 = arith.divf %113, %114 : vector<8x128xf32>
    %116 = vector.extract_strided_slice %99 {offsets = [0, 128], sizes = [8, 128], strides = [1, 1]} : vector<8x384xf32> to vector<8x128xf32>
    %117 = vector.extract_strided_slice %105 {offsets = [0, 128], sizes = [8, 128], strides = [1, 1]} : vector<8x384xf32> to vector<8x128xf32>
    %118 = arith.addf %116, %117 : vector<8x128xf32>
    %119 = arith.negf %118 : vector<8x128xf32>
    %120 = math.exp %119 : vector<8x128xf32>
    %cst_42 = arith.constant 1.000000e+00 : f32
    %121 = vector.broadcast %cst_42 : f32 to vector<8x128xf32>
    %122 = arith.addf %121, %120 : vector<8x128xf32>
    %123 = arith.divf %121, %122 : vector<8x128xf32>
    %124 = vector.extract_strided_slice %99 {offsets = [0, 256], sizes = [8, 128], strides = [1, 1]} : vector<8x384xf32> to vector<8x128xf32>
    %125 = vector.extract_strided_slice %105 {offsets = [0, 256], sizes = [8, 128], strides = [1, 1]} : vector<8x384xf32> to vector<8x128xf32>
    %126 = vector.broadcast %8 : vector<1x128xf32> to vector<8x128xf32>
    %127 = arith.addf %125, %126 : vector<8x128xf32>
    %128 = arith.mulf %115, %127 : vector<8x128xf32>
    %129 = arith.addf %124, %128 : vector<8x128xf32>
    %130 = math.tanh %129 : vector<8x128xf32>
    %cst_43 = arith.constant 1.000000e+00 : f32
    %131 = vector.broadcast %cst_43 : f32 to vector<8x128xf32>
    %132 = arith.subf %131, %123 : vector<8x128xf32>
    %133 = arith.mulf %132, %130 : vector<8x128xf32>
    %134 = arith.mulf %123, %57 : vector<8x128xf32>
    %135 = arith.addf %133, %134 : vector<8x128xf32>
    %136 = vector.extract_strided_slice %103 {offsets = [0, 0], sizes = [8, 128], strides = [1, 1]} : vector<8x384xf32> to vector<8x128xf32>
    %137 = vector.extract_strided_slice %107 {offsets = [0, 0], sizes = [8, 128], strides = [1, 1]} : vector<8x384xf32> to vector<8x128xf32>
    %138 = arith.addf %136, %137 : vector<8x128xf32>
    %139 = arith.negf %138 : vector<8x128xf32>
    %140 = math.exp %139 : vector<8x128xf32>
    %cst_44 = arith.constant 1.000000e+00 : f32
    %141 = vector.broadcast %cst_44 : f32 to vector<8x128xf32>
    %142 = arith.addf %141, %140 : vector<8x128xf32>
    %143 = arith.divf %141, %142 : vector<8x128xf32>
    %144 = vector.extract_strided_slice %103 {offsets = [0, 128], sizes = [8, 128], strides = [1, 1]} : vector<8x384xf32> to vector<8x128xf32>
    %145 = vector.extract_strided_slice %107 {offsets = [0, 128], sizes = [8, 128], strides = [1, 1]} : vector<8x384xf32> to vector<8x128xf32>
    %146 = arith.addf %144, %145 : vector<8x128xf32>
    %147 = arith.negf %146 : vector<8x128xf32>
    %148 = math.exp %147 : vector<8x128xf32>
    %cst_45 = arith.constant 1.000000e+00 : f32
    %149 = vector.broadcast %cst_45 : f32 to vector<8x128xf32>
    %150 = arith.addf %149, %148 : vector<8x128xf32>
    %151 = arith.divf %149, %150 : vector<8x128xf32>
    %152 = vector.extract_strided_slice %103 {offsets = [0, 256], sizes = [8, 128], strides = [1, 1]} : vector<8x384xf32> to vector<8x128xf32>
    %153 = vector.extract_strided_slice %107 {offsets = [0, 256], sizes = [8, 128], strides = [1, 1]} : vector<8x384xf32> to vector<8x128xf32>
    %154 = vector.broadcast %10 : vector<1x128xf32> to vector<8x128xf32>
    %155 = arith.addf %153, %154 : vector<8x128xf32>
    %156 = arith.mulf %143, %155 : vector<8x128xf32>
    %157 = arith.addf %152, %156 : vector<8x128xf32>
    %158 = math.tanh %157 : vector<8x128xf32>
    %cst_46 = arith.constant 1.000000e+00 : f32
    %159 = vector.broadcast %cst_46 : f32 to vector<8x128xf32>
    %160 = arith.subf %159, %151 : vector<8x128xf32>
    %161 = arith.mulf %160, %158 : vector<8x128xf32>
    %162 = arith.mulf %151, %85 : vector<8x128xf32>
    %163 = arith.addf %161, %162 : vector<8x128xf32>
    %164 = arith.index_cast %94 : i32 to index
    %c0_47 = arith.constant 0 : index
    %c0_48 = arith.constant 0 : index
    %165 = vector.load %arg5[%164, %c0_47, %c0_48] : memref<8x8x128xf32, #tpu.memory_space<vmem>>, vector<1x8x128xf32>
    %166 = vector.shape_cast %165 : vector<1x8x128xf32> to vector<8x128xf32>
    %167 = vector.shape_cast %135 : vector<8x128xf32> to vector<1x8x128xf32>
    tpu.vector_store %arg5[%164, %c0_47, %c0_48], %167 {strides = array<i32>} : memref<8x8x128xf32, #tpu.memory_space<vmem>>, vector<1x8x128xf32>,
    %168 = arith.index_cast %95 : i32 to index
    %c0_49 = arith.constant 0 : index
    %c0_50 = arith.constant 0 : index
    %169 = vector.load %arg6[%168, %c0_49, %c0_50] : memref<8x8x128xf32, #tpu.memory_space<vmem>>, vector<1x8x128xf32>
    %170 = vector.shape_cast %169 : vector<1x8x128xf32> to vector<8x128xf32>
    %171 = vector.shape_cast %163 : vector<8x128xf32> to vector<1x8x128xf32>
    tpu.vector_store %arg6[%168, %c0_49, %c0_50], %171 {strides = array<i32>} : memref<8x8x128xf32, #tpu.memory_space<vmem>>, vector<1x8x128xf32>,
    %c2_i32 = arith.constant 2 : i32
    %172 = arith.addi %15, %c2_i32 : i32
    %c7_i32_51 = arith.constant 7 : i32
    %173 = arith.subi %c7_i32_51, %172 : i32
    %174 = arith.index_cast %172 : i32 to index
    %c0_52 = arith.constant 0 : index
    %c0_53 = arith.constant 0 : index
    %175 = vector.load %arg1[%174, %c0_52, %c0_53] : memref<8x8x384xbf16, #tpu.memory_space<vmem>>, vector<1x8x384xbf16>
    %176 = vector.shape_cast %175 : vector<1x8x384xbf16> to vector<8x384xbf16>
    %177 = arith.extf %176 : vector<8x384xbf16> to vector<8x384xf32>
    %178 = arith.index_cast %173 : i32 to index
    %c0_54 = arith.constant 0 : index
    %c0_55 = arith.constant 0 : index
    %179 = vector.load %arg2[%178, %c0_54, %c0_55] : memref<8x8x384xbf16, #tpu.memory_space<vmem>>, vector<1x8x384xbf16>
    %180 = vector.shape_cast %179 : vector<1x8x384xbf16> to vector<8x384xbf16>
    %181 = arith.extf %180 : vector<8x384xbf16> to vector<8x384xf32>
    %182 = arith.truncf %135 : vector<8x128xf32> to vector<8x128xbf16>
    %cst_56 = arith.constant dense<0.000000e+00> : vector<8x384xf32>
    %183 = tpu.matmul %182, %4, %cst_56 {dimension_numbers = #tpu.dot_dimension_numbers<[1], [0], [0], [1], [0, 0, 1, 1], [], []>} : vector<8x128xbf16>, vector<128x384xbf16>, vector<8x384xf32> -> vector<8x384xf32>
    %184 = arith.truncf %163 : vector<8x128xf32> to vector<8x128xbf16>
    %cst_57 = arith.constant dense<0.000000e+00> : vector<8x384xf32>
    %185 = tpu.matmul %184, %6, %cst_57 {dimension_numbers = #tpu.dot_dimension_numbers<[1], [0], [0], [1], [0, 0, 1, 1], [], []>} : vector<8x128xbf16>, vector<128x384xbf16>, vector<8x384xf32> -> vector<8x384xf32>
    %186 = vector.extract_strided_slice %177 {offsets = [0, 0], sizes = [8, 128], strides = [1, 1]} : vector<8x384xf32> to vector<8x128xf32>
    %187 = vector.extract_strided_slice %183 {offsets = [0, 0], sizes = [8, 128], strides = [1, 1]} : vector<8x384xf32> to vector<8x128xf32>
    %188 = arith.addf %186, %187 : vector<8x128xf32>
    %189 = arith.negf %188 : vector<8x128xf32>
    %190 = math.exp %189 : vector<8x128xf32>
    %cst_58 = arith.constant 1.000000e+00 : f32
    %191 = vector.broadcast %cst_58 : f32 to vector<8x128xf32>
    %192 = arith.addf %191, %190 : vector<8x128xf32>
    %193 = arith.divf %191, %192 : vector<8x128xf32>
    %194 = vector.extract_strided_slice %177 {offsets = [0, 128], sizes = [8, 128], strides = [1, 1]} : vector<8x384xf32> to vector<8x128xf32>
    %195 = vector.extract_strided_slice %183 {offsets = [0, 128], sizes = [8, 128], strides = [1, 1]} : vector<8x384xf32> to vector<8x128xf32>
    %196 = arith.addf %194, %195 : vector<8x128xf32>
    %197 = arith.negf %196 : vector<8x128xf32>
    %198 = math.exp %197 : vector<8x128xf32>
    %cst_59 = arith.constant 1.000000e+00 : f32
    %199 = vector.broadcast %cst_59 : f32 to vector<8x128xf32>
    %200 = arith.addf %199, %198 : vector<8x128xf32>
    %201 = arith.divf %199, %200 : vector<8x128xf32>
    %202 = vector.extract_strided_slice %177 {offsets = [0, 256], sizes = [8, 128], strides = [1, 1]} : vector<8x384xf32> to vector<8x128xf32>
    %203 = vector.extract_strided_slice %183 {offsets = [0, 256], sizes = [8, 128], strides = [1, 1]} : vector<8x384xf32> to vector<8x128xf32>
    %204 = vector.broadcast %8 : vector<1x128xf32> to vector<8x128xf32>
    %205 = arith.addf %203, %204 : vector<8x128xf32>
    %206 = arith.mulf %193, %205 : vector<8x128xf32>
    %207 = arith.addf %202, %206 : vector<8x128xf32>
    %208 = math.tanh %207 : vector<8x128xf32>
    %cst_60 = arith.constant 1.000000e+00 : f32
    %209 = vector.broadcast %cst_60 : f32 to vector<8x128xf32>
    %210 = arith.subf %209, %201 : vector<8x128xf32>
    %211 = arith.mulf %210, %208 : vector<8x128xf32>
    %212 = arith.mulf %201, %135 : vector<8x128xf32>
    %213 = arith.addf %211, %212 : vector<8x128xf32>
    %214 = vector.extract_strided_slice %181 {offsets = [0, 0], sizes = [8, 128], strides = [1, 1]} : vector<8x384xf32> to vector<8x128xf32>
    %215 = vector.extract_strided_slice %185 {offsets = [0, 0], sizes = [8, 128], strides = [1, 1]} : vector<8x384xf32> to vector<8x128xf32>
    %216 = arith.addf %214, %215 : vector<8x128xf32>
    %217 = arith.negf %216 : vector<8x128xf32>
    %218 = math.exp %217 : vector<8x128xf32>
    %cst_61 = arith.constant 1.000000e+00 : f32
    %219 = vector.broadcast %cst_61 : f32 to vector<8x128xf32>
    %220 = arith.addf %219, %218 : vector<8x128xf32>
    %221 = arith.divf %219, %220 : vector<8x128xf32>
    %222 = vector.extract_strided_slice %181 {offsets = [0, 128], sizes = [8, 128], strides = [1, 1]} : vector<8x384xf32> to vector<8x128xf32>
    %223 = vector.extract_strided_slice %185 {offsets = [0, 128], sizes = [8, 128], strides = [1, 1]} : vector<8x384xf32> to vector<8x128xf32>
    %224 = arith.addf %222, %223 : vector<8x128xf32>
    %225 = arith.negf %224 : vector<8x128xf32>
    %226 = math.exp %225 : vector<8x128xf32>
    %cst_62 = arith.constant 1.000000e+00 : f32
    %227 = vector.broadcast %cst_62 : f32 to vector<8x128xf32>
    %228 = arith.addf %227, %226 : vector<8x128xf32>
    %229 = arith.divf %227, %228 : vector<8x128xf32>
    %230 = vector.extract_strided_slice %181 {offsets = [0, 256], sizes = [8, 128], strides = [1, 1]} : vector<8x384xf32> to vector<8x128xf32>
    %231 = vector.extract_strided_slice %185 {offsets = [0, 256], sizes = [8, 128], strides = [1, 1]} : vector<8x384xf32> to vector<8x128xf32>
    %232 = vector.broadcast %10 : vector<1x128xf32> to vector<8x128xf32>
    %233 = arith.addf %231, %232 : vector<8x128xf32>
    %234 = arith.mulf %221, %233 : vector<8x128xf32>
    %235 = arith.addf %230, %234 : vector<8x128xf32>
    %236 = math.tanh %235 : vector<8x128xf32>
    %cst_63 = arith.constant 1.000000e+00 : f32
    %237 = vector.broadcast %cst_63 : f32 to vector<8x128xf32>
    %238 = arith.subf %237, %229 : vector<8x128xf32>
    %239 = arith.mulf %238, %236 : vector<8x128xf32>
    %240 = arith.mulf %229, %163 : vector<8x128xf32>
    %241 = arith.addf %239, %240 : vector<8x128xf32>
    %242 = arith.index_cast %172 : i32 to index
    %c0_64 = arith.constant 0 : index
    %c0_65 = arith.constant 0 : index
    %243 = vector.load %arg5[%242, %c0_64, %c0_65] : memref<8x8x128xf32, #tpu.memory_space<vmem>>, vector<1x8x128xf32>
    %244 = vector.shape_cast %243 : vector<1x8x128xf32> to vector<8x128xf32>
    %245 = vector.shape_cast %213 : vector<8x128xf32> to vector<1x8x128xf32>
    tpu.vector_store %arg5[%242, %c0_64, %c0_65], %245 {strides = array<i32>} : memref<8x8x128xf32, #tpu.memory_space<vmem>>, vector<1x8x128xf32>,
    %246 = arith.index_cast %173 : i32 to index
    %c0_66 = arith.constant 0 : index
    %c0_67 = arith.constant 0 : index
    %247 = vector.load %arg6[%246, %c0_66, %c0_67] : memref<8x8x128xf32, #tpu.memory_space<vmem>>, vector<1x8x128xf32>
    %248 = vector.shape_cast %247 : vector<1x8x128xf32> to vector<8x128xf32>
    %249 = vector.shape_cast %241 : vector<8x128xf32> to vector<1x8x128xf32>
    tpu.vector_store %arg6[%246, %c0_66, %c0_67], %249 {strides = array<i32>} : memref<8x8x128xf32, #tpu.memory_space<vmem>>, vector<1x8x128xf32>,
    %c3_i32 = arith.constant 3 : i32
    %250 = arith.addi %15, %c3_i32 : i32
    %c7_i32_68 = arith.constant 7 : i32
    %251 = arith.subi %c7_i32_68, %250 : i32
    %252 = arith.index_cast %250 : i32 to index
    %c0_69 = arith.constant 0 : index
    %c0_70 = arith.constant 0 : index
    %253 = vector.load %arg1[%252, %c0_69, %c0_70] : memref<8x8x384xbf16, #tpu.memory_space<vmem>>, vector<1x8x384xbf16>
    %254 = vector.shape_cast %253 : vector<1x8x384xbf16> to vector<8x384xbf16>
    %255 = arith.extf %254 : vector<8x384xbf16> to vector<8x384xf32>
    %256 = arith.index_cast %251 : i32 to index
    %c0_71 = arith.constant 0 : index
    %c0_72 = arith.constant 0 : index
    %257 = vector.load %arg2[%256, %c0_71, %c0_72] : memref<8x8x384xbf16, #tpu.memory_space<vmem>>, vector<1x8x384xbf16>
    %258 = vector.shape_cast %257 : vector<1x8x384xbf16> to vector<8x384xbf16>
    %259 = arith.extf %258 : vector<8x384xbf16> to vector<8x384xf32>
    %260 = arith.truncf %213 : vector<8x128xf32> to vector<8x128xbf16>
    %cst_73 = arith.constant dense<0.000000e+00> : vector<8x384xf32>
    %261 = tpu.matmul %260, %4, %cst_73 {dimension_numbers = #tpu.dot_dimension_numbers<[1], [0], [0], [1], [0, 0, 1, 1], [], []>} : vector<8x128xbf16>, vector<128x384xbf16>, vector<8x384xf32> -> vector<8x384xf32>
    %262 = arith.truncf %241 : vector<8x128xf32> to vector<8x128xbf16>
    %cst_74 = arith.constant dense<0.000000e+00> : vector<8x384xf32>
    %263 = tpu.matmul %262, %6, %cst_74 {dimension_numbers = #tpu.dot_dimension_numbers<[1], [0], [0], [1], [0, 0, 1, 1], [], []>} : vector<8x128xbf16>, vector<128x384xbf16>, vector<8x384xf32> -> vector<8x384xf32>
    %264 = vector.extract_strided_slice %255 {offsets = [0, 0], sizes = [8, 128], strides = [1, 1]} : vector<8x384xf32> to vector<8x128xf32>
    %265 = vector.extract_strided_slice %261 {offsets = [0, 0], sizes = [8, 128], strides = [1, 1]} : vector<8x384xf32> to vector<8x128xf32>
    %266 = arith.addf %264, %265 : vector<8x128xf32>
    %267 = arith.negf %266 : vector<8x128xf32>
    %268 = math.exp %267 : vector<8x128xf32>
    %cst_75 = arith.constant 1.000000e+00 : f32
    %269 = vector.broadcast %cst_75 : f32 to vector<8x128xf32>
    %270 = arith.addf %269, %268 : vector<8x128xf32>
    %271 = arith.divf %269, %270 : vector<8x128xf32>
    %272 = vector.extract_strided_slice %255 {offsets = [0, 128], sizes = [8, 128], strides = [1, 1]} : vector<8x384xf32> to vector<8x128xf32>
    %273 = vector.extract_strided_slice %261 {offsets = [0, 128], sizes = [8, 128], strides = [1, 1]} : vector<8x384xf32> to vector<8x128xf32>
    %274 = arith.addf %272, %273 : vector<8x128xf32>
    %275 = arith.negf %274 : vector<8x128xf32>
    %276 = math.exp %275 : vector<8x128xf32>
    %cst_76 = arith.constant 1.000000e+00 : f32
    %277 = vector.broadcast %cst_76 : f32 to vector<8x128xf32>
    %278 = arith.addf %277, %276 : vector<8x128xf32>
    %279 = arith.divf %277, %278 : vector<8x128xf32>
    %280 = vector.extract_strided_slice %255 {offsets = [0, 256], sizes = [8, 128], strides = [1, 1]} : vector<8x384xf32> to vector<8x128xf32>
    %281 = vector.extract_strided_slice %261 {offsets = [0, 256], sizes = [8, 128], strides = [1, 1]} : vector<8x384xf32> to vector<8x128xf32>
    %282 = vector.broadcast %8 : vector<1x128xf32> to vector<8x128xf32>
    %283 = arith.addf %281, %282 : vector<8x128xf32>
    %284 = arith.mulf %271, %283 : vector<8x128xf32>
    %285 = arith.addf %280, %284 : vector<8x128xf32>
    %286 = math.tanh %285 : vector<8x128xf32>
    %cst_77 = arith.constant 1.000000e+00 : f32
    %287 = vector.broadcast %cst_77 : f32 to vector<8x128xf32>
    %288 = arith.subf %287, %279 : vector<8x128xf32>
    %289 = arith.mulf %288, %286 : vector<8x128xf32>
    %290 = arith.mulf %279, %213 : vector<8x128xf32>
    %291 = arith.addf %289, %290 : vector<8x128xf32>
    %292 = vector.extract_strided_slice %259 {offsets = [0, 0], sizes = [8, 128], strides = [1, 1]} : vector<8x384xf32> to vector<8x128xf32>
    %293 = vector.extract_strided_slice %263 {offsets = [0, 0], sizes = [8, 128], strides = [1, 1]} : vector<8x384xf32> to vector<8x128xf32>
    %294 = arith.addf %292, %293 : vector<8x128xf32>
    %295 = arith.negf %294 : vector<8x128xf32>
    %296 = math.exp %295 : vector<8x128xf32>
    %cst_78 = arith.constant 1.000000e+00 : f32
    %297 = vector.broadcast %cst_78 : f32 to vector<8x128xf32>
    %298 = arith.addf %297, %296 : vector<8x128xf32>
    %299 = arith.divf %297, %298 : vector<8x128xf32>
    %300 = vector.extract_strided_slice %259 {offsets = [0, 128], sizes = [8, 128], strides = [1, 1]} : vector<8x384xf32> to vector<8x128xf32>
    %301 = vector.extract_strided_slice %263 {offsets = [0, 128], sizes = [8, 128], strides = [1, 1]} : vector<8x384xf32> to vector<8x128xf32>
    %302 = arith.addf %300, %301 : vector<8x128xf32>
    %303 = arith.negf %302 : vector<8x128xf32>
    %304 = math.exp %303 : vector<8x128xf32>
    %cst_79 = arith.constant 1.000000e+00 : f32
    %305 = vector.broadcast %cst_79 : f32 to vector<8x128xf32>
    %306 = arith.addf %305, %304 : vector<8x128xf32>
    %307 = arith.divf %305, %306 : vector<8x128xf32>
    %308 = vector.extract_strided_slice %259 {offsets = [0, 256], sizes = [8, 128], strides = [1, 1]} : vector<8x384xf32> to vector<8x128xf32>
    %309 = vector.extract_strided_slice %263 {offsets = [0, 256], sizes = [8, 128], strides = [1, 1]} : vector<8x384xf32> to vector<8x128xf32>
    %310 = vector.broadcast %10 : vector<1x128xf32> to vector<8x128xf32>
    %311 = arith.addf %309, %310 : vector<8x128xf32>
    %312 = arith.mulf %299, %311 : vector<8x128xf32>
    %313 = arith.addf %308, %312 : vector<8x128xf32>
    %314 = math.tanh %313 : vector<8x128xf32>
    %cst_80 = arith.constant 1.000000e+00 : f32
    %315 = vector.broadcast %cst_80 : f32 to vector<8x128xf32>
    %316 = arith.subf %315, %307 : vector<8x128xf32>
    %317 = arith.mulf %316, %314 : vector<8x128xf32>
    %318 = arith.mulf %307, %241 : vector<8x128xf32>
    %319 = arith.addf %317, %318 : vector<8x128xf32>
    %320 = arith.index_cast %250 : i32 to index
    %c0_81 = arith.constant 0 : index
    %c0_82 = arith.constant 0 : index
    %321 = vector.load %arg5[%320, %c0_81, %c0_82] : memref<8x8x128xf32, #tpu.memory_space<vmem>>, vector<1x8x128xf32>
    %322 = vector.shape_cast %321 : vector<1x8x128xf32> to vector<8x128xf32>
    %323 = vector.shape_cast %291 : vector<8x128xf32> to vector<1x8x128xf32>
    tpu.vector_store %arg5[%320, %c0_81, %c0_82], %323 {strides = array<i32>} : memref<8x8x128xf32, #tpu.memory_space<vmem>>, vector<1x8x128xf32>,
    %324 = arith.index_cast %251 : i32 to index
    %c0_83 = arith.constant 0 : index
    %c0_84 = arith.constant 0 : index
    %325 = vector.load %arg6[%324, %c0_83, %c0_84] : memref<8x8x128xf32, #tpu.memory_space<vmem>>, vector<1x8x128xf32>
    %326 = vector.shape_cast %325 : vector<1x8x128xf32> to vector<8x128xf32>
    %327 = vector.shape_cast %319 : vector<8x128xf32> to vector<1x8x128xf32>
    tpu.vector_store %arg6[%324, %c0_83, %c0_84], %327 {strides = array<i32>} : memref<8x8x128xf32, #tpu.memory_space<vmem>>, vector<1x8x128xf32>,
    %c4_i32 = arith.constant 4 : i32
    %328 = arith.addi %15, %c4_i32 : i32
    %c7_i32_85 = arith.constant 7 : i32
    %329 = arith.subi %c7_i32_85, %328 : i32
    %330 = arith.index_cast %328 : i32 to index
    %c0_86 = arith.constant 0 : index
    %c0_87 = arith.constant 0 : index
    %331 = vector.load %arg1[%330, %c0_86, %c0_87] : memref<8x8x384xbf16, #tpu.memory_space<vmem>>, vector<1x8x384xbf16>
    %332 = vector.shape_cast %331 : vector<1x8x384xbf16> to vector<8x384xbf16>
    %333 = arith.extf %332 : vector<8x384xbf16> to vector<8x384xf32>
    %334 = arith.index_cast %329 : i32 to index
    %c0_88 = arith.constant 0 : index
    %c0_89 = arith.constant 0 : index
    %335 = vector.load %arg2[%334, %c0_88, %c0_89] : memref<8x8x384xbf16, #tpu.memory_space<vmem>>, vector<1x8x384xbf16>
    %336 = vector.shape_cast %335 : vector<1x8x384xbf16> to vector<8x384xbf16>
    %337 = arith.extf %336 : vector<8x384xbf16> to vector<8x384xf32>
    %338 = arith.truncf %291 : vector<8x128xf32> to vector<8x128xbf16>
    %cst_90 = arith.constant dense<0.000000e+00> : vector<8x384xf32>
    %339 = tpu.matmul %338, %4, %cst_90 {dimension_numbers = #tpu.dot_dimension_numbers<[1], [0], [0], [1], [0, 0, 1, 1], [], []>} : vector<8x128xbf16>, vector<128x384xbf16>, vector<8x384xf32> -> vector<8x384xf32>
    %340 = arith.truncf %319 : vector<8x128xf32> to vector<8x128xbf16>
    %cst_91 = arith.constant dense<0.000000e+00> : vector<8x384xf32>
    %341 = tpu.matmul %340, %6, %cst_91 {dimension_numbers = #tpu.dot_dimension_numbers<[1], [0], [0], [1], [0, 0, 1, 1], [], []>} : vector<8x128xbf16>, vector<128x384xbf16>, vector<8x384xf32> -> vector<8x384xf32>
    %342 = vector.extract_strided_slice %333 {offsets = [0, 0], sizes = [8, 128], strides = [1, 1]} : vector<8x384xf32> to vector<8x128xf32>
    %343 = vector.extract_strided_slice %339 {offsets = [0, 0], sizes = [8, 128], strides = [1, 1]} : vector<8x384xf32> to vector<8x128xf32>
    %344 = arith.addf %342, %343 : vector<8x128xf32>
    %345 = arith.negf %344 : vector<8x128xf32>
    %346 = math.exp %345 : vector<8x128xf32>
    %cst_92 = arith.constant 1.000000e+00 : f32
    %347 = vector.broadcast %cst_92 : f32 to vector<8x128xf32>
    %348 = arith.addf %347, %346 : vector<8x128xf32>
    %349 = arith.divf %347, %348 : vector<8x128xf32>
    %350 = vector.extract_strided_slice %333 {offsets = [0, 128], sizes = [8, 128], strides = [1, 1]} : vector<8x384xf32> to vector<8x128xf32>
    %351 = vector.extract_strided_slice %339 {offsets = [0, 128], sizes = [8, 128], strides = [1, 1]} : vector<8x384xf32> to vector<8x128xf32>
    %352 = arith.addf %350, %351 : vector<8x128xf32>
    %353 = arith.negf %352 : vector<8x128xf32>
    %354 = math.exp %353 : vector<8x128xf32>
    %cst_93 = arith.constant 1.000000e+00 : f32
    %355 = vector.broadcast %cst_93 : f32 to vector<8x128xf32>
    %356 = arith.addf %355, %354 : vector<8x128xf32>
    %357 = arith.divf %355, %356 : vector<8x128xf32>
    %358 = vector.extract_strided_slice %333 {offsets = [0, 256], sizes = [8, 128], strides = [1, 1]} : vector<8x384xf32> to vector<8x128xf32>
    %359 = vector.extract_strided_slice %339 {offsets = [0, 256], sizes = [8, 128], strides = [1, 1]} : vector<8x384xf32> to vector<8x128xf32>
    %360 = vector.broadcast %8 : vector<1x128xf32> to vector<8x128xf32>
    %361 = arith.addf %359, %360 : vector<8x128xf32>
    %362 = arith.mulf %349, %361 : vector<8x128xf32>
    %363 = arith.addf %358, %362 : vector<8x128xf32>
    %364 = math.tanh %363 : vector<8x128xf32>
    %cst_94 = arith.constant 1.000000e+00 : f32
    %365 = vector.broadcast %cst_94 : f32 to vector<8x128xf32>
    %366 = arith.subf %365, %357 : vector<8x128xf32>
    %367 = arith.mulf %366, %364 : vector<8x128xf32>
    %368 = arith.mulf %357, %291 : vector<8x128xf32>
    %369 = arith.addf %367, %368 : vector<8x128xf32>
    %370 = vector.extract_strided_slice %337 {offsets = [0, 0], sizes = [8, 128], strides = [1, 1]} : vector<8x384xf32> to vector<8x128xf32>
    %371 = vector.extract_strided_slice %341 {offsets = [0, 0], sizes = [8, 128], strides = [1, 1]} : vector<8x384xf32> to vector<8x128xf32>
    %372 = arith.addf %370, %371 : vector<8x128xf32>
    %373 = arith.negf %372 : vector<8x128xf32>
    %374 = math.exp %373 : vector<8x128xf32>
    %cst_95 = arith.constant 1.000000e+00 : f32
    %375 = vector.broadcast %cst_95 : f32 to vector<8x128xf32>
    %376 = arith.addf %375, %374 : vector<8x128xf32>
    %377 = arith.divf %375, %376 : vector<8x128xf32>
    %378 = vector.extract_strided_slice %337 {offsets = [0, 128], sizes = [8, 128], strides = [1, 1]} : vector<8x384xf32> to vector<8x128xf32>
    %379 = vector.extract_strided_slice %341 {offsets = [0, 128], sizes = [8, 128], strides = [1, 1]} : vector<8x384xf32> to vector<8x128xf32>
    %380 = arith.addf %378, %379 : vector<8x128xf32>
    %381 = arith.negf %380 : vector<8x128xf32>
    %382 = math.exp %381 : vector<8x128xf32>
    %cst_96 = arith.constant 1.000000e+00 : f32
    %383 = vector.broadcast %cst_96 : f32 to vector<8x128xf32>
    %384 = arith.addf %383, %382 : vector<8x128xf32>
    %385 = arith.divf %383, %384 : vector<8x128xf32>
    %386 = vector.extract_strided_slice %337 {offsets = [0, 256], sizes = [8, 128], strides = [1, 1]} : vector<8x384xf32> to vector<8x128xf32>
    %387 = vector.extract_strided_slice %341 {offsets = [0, 256], sizes = [8, 128], strides = [1, 1]} : vector<8x384xf32> to vector<8x128xf32>
    %388 = vector.broadcast %10 : vector<1x128xf32> to vector<8x128xf32>
    %389 = arith.addf %387, %388 : vector<8x128xf32>
    %390 = arith.mulf %377, %389 : vector<8x128xf32>
    %391 = arith.addf %386, %390 : vector<8x128xf32>
    %392 = math.tanh %391 : vector<8x128xf32>
    %cst_97 = arith.constant 1.000000e+00 : f32
    %393 = vector.broadcast %cst_97 : f32 to vector<8x128xf32>
    %394 = arith.subf %393, %385 : vector<8x128xf32>
    %395 = arith.mulf %394, %392 : vector<8x128xf32>
    %396 = arith.mulf %385, %319 : vector<8x128xf32>
    %397 = arith.addf %395, %396 : vector<8x128xf32>
    %398 = arith.index_cast %328 : i32 to index
    %c0_98 = arith.constant 0 : index
    %c0_99 = arith.constant 0 : index
    %399 = vector.load %arg5[%398, %c0_98, %c0_99] : memref<8x8x128xf32, #tpu.memory_space<vmem>>, vector<1x8x128xf32>
    %400 = vector.shape_cast %399 : vector<1x8x128xf32> to vector<8x128xf32>
    %401 = vector.shape_cast %369 : vector<8x128xf32> to vector<1x8x128xf32>
    tpu.vector_store %arg5[%398, %c0_98, %c0_99], %401 {strides = array<i32>} : memref<8x8x128xf32, #tpu.memory_space<vmem>>, vector<1x8x128xf32>,
    %402 = arith.index_cast %329 : i32 to index
    %c0_100 = arith.constant 0 : index
    %c0_101 = arith.constant 0 : index
    %403 = vector.load %arg6[%402, %c0_100, %c0_101] : memref<8x8x128xf32, #tpu.memory_space<vmem>>, vector<1x8x128xf32>
    %404 = vector.shape_cast %403 : vector<1x8x128xf32> to vector<8x128xf32>
    %405 = vector.shape_cast %397 : vector<8x128xf32> to vector<1x8x128xf32>
    tpu.vector_store %arg6[%402, %c0_100, %c0_101], %405 {strides = array<i32>} : memref<8x8x128xf32, #tpu.memory_space<vmem>>, vector<1x8x128xf32>,
    %c5_i32 = arith.constant 5 : i32
    %406 = arith.addi %15, %c5_i32 : i32
    %c7_i32_102 = arith.constant 7 : i32
    %407 = arith.subi %c7_i32_102, %406 : i32
    %408 = arith.index_cast %406 : i32 to index
    %c0_103 = arith.constant 0 : index
    %c0_104 = arith.constant 0 : index
    %409 = vector.load %arg1[%408, %c0_103, %c0_104] : memref<8x8x384xbf16, #tpu.memory_space<vmem>>, vector<1x8x384xbf16>
    %410 = vector.shape_cast %409 : vector<1x8x384xbf16> to vector<8x384xbf16>
    %411 = arith.extf %410 : vector<8x384xbf16> to vector<8x384xf32>
    %412 = arith.index_cast %407 : i32 to index
    %c0_105 = arith.constant 0 : index
    %c0_106 = arith.constant 0 : index
    %413 = vector.load %arg2[%412, %c0_105, %c0_106] : memref<8x8x384xbf16, #tpu.memory_space<vmem>>, vector<1x8x384xbf16>
    %414 = vector.shape_cast %413 : vector<1x8x384xbf16> to vector<8x384xbf16>
    %415 = arith.extf %414 : vector<8x384xbf16> to vector<8x384xf32>
    %416 = arith.truncf %369 : vector<8x128xf32> to vector<8x128xbf16>
    %cst_107 = arith.constant dense<0.000000e+00> : vector<8x384xf32>
    %417 = tpu.matmul %416, %4, %cst_107 {dimension_numbers = #tpu.dot_dimension_numbers<[1], [0], [0], [1], [0, 0, 1, 1], [], []>} : vector<8x128xbf16>, vector<128x384xbf16>, vector<8x384xf32> -> vector<8x384xf32>
    %418 = arith.truncf %397 : vector<8x128xf32> to vector<8x128xbf16>
    %cst_108 = arith.constant dense<0.000000e+00> : vector<8x384xf32>
    %419 = tpu.matmul %418, %6, %cst_108 {dimension_numbers = #tpu.dot_dimension_numbers<[1], [0], [0], [1], [0, 0, 1, 1], [], []>} : vector<8x128xbf16>, vector<128x384xbf16>, vector<8x384xf32> -> vector<8x384xf32>
    %420 = vector.extract_strided_slice %411 {offsets = [0, 0], sizes = [8, 128], strides = [1, 1]} : vector<8x384xf32> to vector<8x128xf32>
    %421 = vector.extract_strided_slice %417 {offsets = [0, 0], sizes = [8, 128], strides = [1, 1]} : vector<8x384xf32> to vector<8x128xf32>
    %422 = arith.addf %420, %421 : vector<8x128xf32>
    %423 = arith.negf %422 : vector<8x128xf32>
    %424 = math.exp %423 : vector<8x128xf32>
    %cst_109 = arith.constant 1.000000e+00 : f32
    %425 = vector.broadcast %cst_109 : f32 to vector<8x128xf32>
    %426 = arith.addf %425, %424 : vector<8x128xf32>
    %427 = arith.divf %425, %426 : vector<8x128xf32>
    %428 = vector.extract_strided_slice %411 {offsets = [0, 128], sizes = [8, 128], strides = [1, 1]} : vector<8x384xf32> to vector<8x128xf32>
    %429 = vector.extract_strided_slice %417 {offsets = [0, 128], sizes = [8, 128], strides = [1, 1]} : vector<8x384xf32> to vector<8x128xf32>
    %430 = arith.addf %428, %429 : vector<8x128xf32>
    %431 = arith.negf %430 : vector<8x128xf32>
    %432 = math.exp %431 : vector<8x128xf32>
    %cst_110 = arith.constant 1.000000e+00 : f32
    %433 = vector.broadcast %cst_110 : f32 to vector<8x128xf32>
    %434 = arith.addf %433, %432 : vector<8x128xf32>
    %435 = arith.divf %433, %434 : vector<8x128xf32>
    %436 = vector.extract_strided_slice %411 {offsets = [0, 256], sizes = [8, 128], strides = [1, 1]} : vector<8x384xf32> to vector<8x128xf32>
    %437 = vector.extract_strided_slice %417 {offsets = [0, 256], sizes = [8, 128], strides = [1, 1]} : vector<8x384xf32> to vector<8x128xf32>
    %438 = vector.broadcast %8 : vector<1x128xf32> to vector<8x128xf32>
    %439 = arith.addf %437, %438 : vector<8x128xf32>
    %440 = arith.mulf %427, %439 : vector<8x128xf32>
    %441 = arith.addf %436, %440 : vector<8x128xf32>
    %442 = math.tanh %441 : vector<8x128xf32>
    %cst_111 = arith.constant 1.000000e+00 : f32
    %443 = vector.broadcast %cst_111 : f32 to vector<8x128xf32>
    %444 = arith.subf %443, %435 : vector<8x128xf32>
    %445 = arith.mulf %444, %442 : vector<8x128xf32>
    %446 = arith.mulf %435, %369 : vector<8x128xf32>
    %447 = arith.addf %445, %446 : vector<8x128xf32>
    %448 = vector.extract_strided_slice %415 {offsets = [0, 0], sizes = [8, 128], strides = [1, 1]} : vector<8x384xf32> to vector<8x128xf32>
    %449 = vector.extract_strided_slice %419 {offsets = [0, 0], sizes = [8, 128], strides = [1, 1]} : vector<8x384xf32> to vector<8x128xf32>
    %450 = arith.addf %448, %449 : vector<8x128xf32>
    %451 = arith.negf %450 : vector<8x128xf32>
    %452 = math.exp %451 : vector<8x128xf32>
    %cst_112 = arith.constant 1.000000e+00 : f32
    %453 = vector.broadcast %cst_112 : f32 to vector<8x128xf32>
    %454 = arith.addf %453, %452 : vector<8x128xf32>
    %455 = arith.divf %453, %454 : vector<8x128xf32>
    %456 = vector.extract_strided_slice %415 {offsets = [0, 128], sizes = [8, 128], strides = [1, 1]} : vector<8x384xf32> to vector<8x128xf32>
    %457 = vector.extract_strided_slice %419 {offsets = [0, 128], sizes = [8, 128], strides = [1, 1]} : vector<8x384xf32> to vector<8x128xf32>
    %458 = arith.addf %456, %457 : vector<8x128xf32>
    %459 = arith.negf %458 : vector<8x128xf32>
    %460 = math.exp %459 : vector<8x128xf32>
    %cst_113 = arith.constant 1.000000e+00 : f32
    %461 = vector.broadcast %cst_113 : f32 to vector<8x128xf32>
    %462 = arith.addf %461, %460 : vector<8x128xf32>
    %463 = arith.divf %461, %462 : vector<8x128xf32>
    %464 = vector.extract_strided_slice %415 {offsets = [0, 256], sizes = [8, 128], strides = [1, 1]} : vector<8x384xf32> to vector<8x128xf32>
    %465 = vector.extract_strided_slice %419 {offsets = [0, 256], sizes = [8, 128], strides = [1, 1]} : vector<8x384xf32> to vector<8x128xf32>
    %466 = vector.broadcast %10 : vector<1x128xf32> to vector<8x128xf32>
    %467 = arith.addf %465, %466 : vector<8x128xf32>
    %468 = arith.mulf %455, %467 : vector<8x128xf32>
    %469 = arith.addf %464, %468 : vector<8x128xf32>
    %470 = math.tanh %469 : vector<8x128xf32>
    %cst_114 = arith.constant 1.000000e+00 : f32
    %471 = vector.broadcast %cst_114 : f32 to vector<8x128xf32>
    %472 = arith.subf %471, %463 : vector<8x128xf32>
    %473 = arith.mulf %472, %470 : vector<8x128xf32>
    %474 = arith.mulf %463, %397 : vector<8x128xf32>
    %475 = arith.addf %473, %474 : vector<8x128xf32>
    %476 = arith.index_cast %406 : i32 to index
    %c0_115 = arith.constant 0 : index
    %c0_116 = arith.constant 0 : index
    %477 = vector.load %arg5[%476, %c0_115, %c0_116] : memref<8x8x128xf32, #tpu.memory_space<vmem>>, vector<1x8x128xf32>
    %478 = vector.shape_cast %477 : vector<1x8x128xf32> to vector<8x128xf32>
    %479 = vector.shape_cast %447 : vector<8x128xf32> to vector<1x8x128xf32>
    tpu.vector_store %arg5[%476, %c0_115, %c0_116], %479 {strides = array<i32>} : memref<8x8x128xf32, #tpu.memory_space<vmem>>, vector<1x8x128xf32>,
    %480 = arith.index_cast %407 : i32 to index
    %c0_117 = arith.constant 0 : index
    %c0_118 = arith.constant 0 : index
    %481 = vector.load %arg6[%480, %c0_117, %c0_118] : memref<8x8x128xf32, #tpu.memory_space<vmem>>, vector<1x8x128xf32>
    %482 = vector.shape_cast %481 : vector<1x8x128xf32> to vector<8x128xf32>
    %483 = vector.shape_cast %475 : vector<8x128xf32> to vector<1x8x128xf32>
    tpu.vector_store %arg6[%480, %c0_117, %c0_118], %483 {strides = array<i32>} : memref<8x8x128xf32, #tpu.memory_space<vmem>>, vector<1x8x128xf32>,
    %c6_i32 = arith.constant 6 : i32
    %484 = arith.addi %15, %c6_i32 : i32
    %c7_i32_119 = arith.constant 7 : i32
    %485 = arith.subi %c7_i32_119, %484 : i32
    %486 = arith.index_cast %484 : i32 to index
    %c0_120 = arith.constant 0 : index
    %c0_121 = arith.constant 0 : index
    %487 = vector.load %arg1[%486, %c0_120, %c0_121] : memref<8x8x384xbf16, #tpu.memory_space<vmem>>, vector<1x8x384xbf16>
    %488 = vector.shape_cast %487 : vector<1x8x384xbf16> to vector<8x384xbf16>
    %489 = arith.extf %488 : vector<8x384xbf16> to vector<8x384xf32>
    %490 = arith.index_cast %485 : i32 to index
    %c0_122 = arith.constant 0 : index
    %c0_123 = arith.constant 0 : index
    %491 = vector.load %arg2[%490, %c0_122, %c0_123] : memref<8x8x384xbf16, #tpu.memory_space<vmem>>, vector<1x8x384xbf16>
    %492 = vector.shape_cast %491 : vector<1x8x384xbf16> to vector<8x384xbf16>
    %493 = arith.extf %492 : vector<8x384xbf16> to vector<8x384xf32>
    %494 = arith.truncf %447 : vector<8x128xf32> to vector<8x128xbf16>
    %cst_124 = arith.constant dense<0.000000e+00> : vector<8x384xf32>
    %495 = tpu.matmul %494, %4, %cst_124 {dimension_numbers = #tpu.dot_dimension_numbers<[1], [0], [0], [1], [0, 0, 1, 1], [], []>} : vector<8x128xbf16>, vector<128x384xbf16>, vector<8x384xf32> -> vector<8x384xf32>
    %496 = arith.truncf %475 : vector<8x128xf32> to vector<8x128xbf16>
    %cst_125 = arith.constant dense<0.000000e+00> : vector<8x384xf32>
    %497 = tpu.matmul %496, %6, %cst_125 {dimension_numbers = #tpu.dot_dimension_numbers<[1], [0], [0], [1], [0, 0, 1, 1], [], []>} : vector<8x128xbf16>, vector<128x384xbf16>, vector<8x384xf32> -> vector<8x384xf32>
    %498 = vector.extract_strided_slice %489 {offsets = [0, 0], sizes = [8, 128], strides = [1, 1]} : vector<8x384xf32> to vector<8x128xf32>
    %499 = vector.extract_strided_slice %495 {offsets = [0, 0], sizes = [8, 128], strides = [1, 1]} : vector<8x384xf32> to vector<8x128xf32>
    %500 = arith.addf %498, %499 : vector<8x128xf32>
    %501 = arith.negf %500 : vector<8x128xf32>
    %502 = math.exp %501 : vector<8x128xf32>
    %cst_126 = arith.constant 1.000000e+00 : f32
    %503 = vector.broadcast %cst_126 : f32 to vector<8x128xf32>
    %504 = arith.addf %503, %502 : vector<8x128xf32>
    %505 = arith.divf %503, %504 : vector<8x128xf32>
    %506 = vector.extract_strided_slice %489 {offsets = [0, 128], sizes = [8, 128], strides = [1, 1]} : vector<8x384xf32> to vector<8x128xf32>
    %507 = vector.extract_strided_slice %495 {offsets = [0, 128], sizes = [8, 128], strides = [1, 1]} : vector<8x384xf32> to vector<8x128xf32>
    %508 = arith.addf %506, %507 : vector<8x128xf32>
    %509 = arith.negf %508 : vector<8x128xf32>
    %510 = math.exp %509 : vector<8x128xf32>
    %cst_127 = arith.constant 1.000000e+00 : f32
    %511 = vector.broadcast %cst_127 : f32 to vector<8x128xf32>
    %512 = arith.addf %511, %510 : vector<8x128xf32>
    %513 = arith.divf %511, %512 : vector<8x128xf32>
    %514 = vector.extract_strided_slice %489 {offsets = [0, 256], sizes = [8, 128], strides = [1, 1]} : vector<8x384xf32> to vector<8x128xf32>
    %515 = vector.extract_strided_slice %495 {offsets = [0, 256], sizes = [8, 128], strides = [1, 1]} : vector<8x384xf32> to vector<8x128xf32>
    %516 = vector.broadcast %8 : vector<1x128xf32> to vector<8x128xf32>
    %517 = arith.addf %515, %516 : vector<8x128xf32>
    %518 = arith.mulf %505, %517 : vector<8x128xf32>
    %519 = arith.addf %514, %518 : vector<8x128xf32>
    %520 = math.tanh %519 : vector<8x128xf32>
    %cst_128 = arith.constant 1.000000e+00 : f32
    %521 = vector.broadcast %cst_128 : f32 to vector<8x128xf32>
    %522 = arith.subf %521, %513 : vector<8x128xf32>
    %523 = arith.mulf %522, %520 : vector<8x128xf32>
    %524 = arith.mulf %513, %447 : vector<8x128xf32>
    %525 = arith.addf %523, %524 : vector<8x128xf32>
    %526 = vector.extract_strided_slice %493 {offsets = [0, 0], sizes = [8, 128], strides = [1, 1]} : vector<8x384xf32> to vector<8x128xf32>
    %527 = vector.extract_strided_slice %497 {offsets = [0, 0], sizes = [8, 128], strides = [1, 1]} : vector<8x384xf32> to vector<8x128xf32>
    %528 = arith.addf %526, %527 : vector<8x128xf32>
    %529 = arith.negf %528 : vector<8x128xf32>
    %530 = math.exp %529 : vector<8x128xf32>
    %cst_129 = arith.constant 1.000000e+00 : f32
    %531 = vector.broadcast %cst_129 : f32 to vector<8x128xf32>
    %532 = arith.addf %531, %530 : vector<8x128xf32>
    %533 = arith.divf %531, %532 : vector<8x128xf32>
    %534 = vector.extract_strided_slice %493 {offsets = [0, 128], sizes = [8, 128], strides = [1, 1]} : vector<8x384xf32> to vector<8x128xf32>
    %535 = vector.extract_strided_slice %497 {offsets = [0, 128], sizes = [8, 128], strides = [1, 1]} : vector<8x384xf32> to vector<8x128xf32>
    %536 = arith.addf %534, %535 : vector<8x128xf32>
    %537 = arith.negf %536 : vector<8x128xf32>
    %538 = math.exp %537 : vector<8x128xf32>
    %cst_130 = arith.constant 1.000000e+00 : f32
    %539 = vector.broadcast %cst_130 : f32 to vector<8x128xf32>
    %540 = arith.addf %539, %538 : vector<8x128xf32>
    %541 = arith.divf %539, %540 : vector<8x128xf32>
    %542 = vector.extract_strided_slice %493 {offsets = [0, 256], sizes = [8, 128], strides = [1, 1]} : vector<8x384xf32> to vector<8x128xf32>
    %543 = vector.extract_strided_slice %497 {offsets = [0, 256], sizes = [8, 128], strides = [1, 1]} : vector<8x384xf32> to vector<8x128xf32>
    %544 = vector.broadcast %10 : vector<1x128xf32> to vector<8x128xf32>
    %545 = arith.addf %543, %544 : vector<8x128xf32>
    %546 = arith.mulf %533, %545 : vector<8x128xf32>
    %547 = arith.addf %542, %546 : vector<8x128xf32>
    %548 = math.tanh %547 : vector<8x128xf32>
    %cst_131 = arith.constant 1.000000e+00 : f32
    %549 = vector.broadcast %cst_131 : f32 to vector<8x128xf32>
    %550 = arith.subf %549, %541 : vector<8x128xf32>
    %551 = arith.mulf %550, %548 : vector<8x128xf32>
    %552 = arith.mulf %541, %475 : vector<8x128xf32>
    %553 = arith.addf %551, %552 : vector<8x128xf32>
    %554 = arith.index_cast %484 : i32 to index
    %c0_132 = arith.constant 0 : index
    %c0_133 = arith.constant 0 : index
    %555 = vector.load %arg5[%554, %c0_132, %c0_133] : memref<8x8x128xf32, #tpu.memory_space<vmem>>, vector<1x8x128xf32>
    %556 = vector.shape_cast %555 : vector<1x8x128xf32> to vector<8x128xf32>
    %557 = vector.shape_cast %525 : vector<8x128xf32> to vector<1x8x128xf32>
    tpu.vector_store %arg5[%554, %c0_132, %c0_133], %557 {strides = array<i32>} : memref<8x8x128xf32, #tpu.memory_space<vmem>>, vector<1x8x128xf32>,
    %558 = arith.index_cast %485 : i32 to index
    %c0_134 = arith.constant 0 : index
    %c0_135 = arith.constant 0 : index
    %559 = vector.load %arg6[%558, %c0_134, %c0_135] : memref<8x8x128xf32, #tpu.memory_space<vmem>>, vector<1x8x128xf32>
    %560 = vector.shape_cast %559 : vector<1x8x128xf32> to vector<8x128xf32>
    %561 = vector.shape_cast %553 : vector<8x128xf32> to vector<1x8x128xf32>
    tpu.vector_store %arg6[%558, %c0_134, %c0_135], %561 {strides = array<i32>} : memref<8x8x128xf32, #tpu.memory_space<vmem>>, vector<1x8x128xf32>,
    %c7_i32_136 = arith.constant 7 : i32
    %562 = arith.addi %15, %c7_i32_136 : i32
    %c7_i32_137 = arith.constant 7 : i32
    %563 = arith.subi %c7_i32_137, %562 : i32
    %564 = arith.index_cast %562 : i32 to index
    %c0_138 = arith.constant 0 : index
    %c0_139 = arith.constant 0 : index
    %565 = vector.load %arg1[%564, %c0_138, %c0_139] : memref<8x8x384xbf16, #tpu.memory_space<vmem>>, vector<1x8x384xbf16>
    %566 = vector.shape_cast %565 : vector<1x8x384xbf16> to vector<8x384xbf16>
    %567 = arith.extf %566 : vector<8x384xbf16> to vector<8x384xf32>
    %568 = arith.index_cast %563 : i32 to index
    %c0_140 = arith.constant 0 : index
    %c0_141 = arith.constant 0 : index
    %569 = vector.load %arg2[%568, %c0_140, %c0_141] : memref<8x8x384xbf16, #tpu.memory_space<vmem>>, vector<1x8x384xbf16>
    %570 = vector.shape_cast %569 : vector<1x8x384xbf16> to vector<8x384xbf16>
    %571 = arith.extf %570 : vector<8x384xbf16> to vector<8x384xf32>
    %572 = arith.truncf %525 : vector<8x128xf32> to vector<8x128xbf16>
    %cst_142 = arith.constant dense<0.000000e+00> : vector<8x384xf32>
    %573 = tpu.matmul %572, %4, %cst_142 {dimension_numbers = #tpu.dot_dimension_numbers<[1], [0], [0], [1], [0, 0, 1, 1], [], []>} : vector<8x128xbf16>, vector<128x384xbf16>, vector<8x384xf32> -> vector<8x384xf32>
    %574 = arith.truncf %553 : vector<8x128xf32> to vector<8x128xbf16>
    %cst_143 = arith.constant dense<0.000000e+00> : vector<8x384xf32>
    %575 = tpu.matmul %574, %6, %cst_143 {dimension_numbers = #tpu.dot_dimension_numbers<[1], [0], [0], [1], [0, 0, 1, 1], [], []>} : vector<8x128xbf16>, vector<128x384xbf16>, vector<8x384xf32> -> vector<8x384xf32>
    %576 = vector.extract_strided_slice %567 {offsets = [0, 0], sizes = [8, 128], strides = [1, 1]} : vector<8x384xf32> to vector<8x128xf32>
    %577 = vector.extract_strided_slice %573 {offsets = [0, 0], sizes = [8, 128], strides = [1, 1]} : vector<8x384xf32> to vector<8x128xf32>
    %578 = arith.addf %576, %577 : vector<8x128xf32>
    %579 = arith.negf %578 : vector<8x128xf32>
    %580 = math.exp %579 : vector<8x128xf32>
    %cst_144 = arith.constant 1.000000e+00 : f32
    %581 = vector.broadcast %cst_144 : f32 to vector<8x128xf32>
    %582 = arith.addf %581, %580 : vector<8x128xf32>
    %583 = arith.divf %581, %582 : vector<8x128xf32>
    %584 = vector.extract_strided_slice %567 {offsets = [0, 128], sizes = [8, 128], strides = [1, 1]} : vector<8x384xf32> to vector<8x128xf32>
    %585 = vector.extract_strided_slice %573 {offsets = [0, 128], sizes = [8, 128], strides = [1, 1]} : vector<8x384xf32> to vector<8x128xf32>
    %586 = arith.addf %584, %585 : vector<8x128xf32>
    %587 = arith.negf %586 : vector<8x128xf32>
    %588 = math.exp %587 : vector<8x128xf32>
    %cst_145 = arith.constant 1.000000e+00 : f32
    %589 = vector.broadcast %cst_145 : f32 to vector<8x128xf32>
    %590 = arith.addf %589, %588 : vector<8x128xf32>
    %591 = arith.divf %589, %590 : vector<8x128xf32>
    %592 = vector.extract_strided_slice %567 {offsets = [0, 256], sizes = [8, 128], strides = [1, 1]} : vector<8x384xf32> to vector<8x128xf32>
    %593 = vector.extract_strided_slice %573 {offsets = [0, 256], sizes = [8, 128], strides = [1, 1]} : vector<8x384xf32> to vector<8x128xf32>
    %594 = vector.broadcast %8 : vector<1x128xf32> to vector<8x128xf32>
    %595 = arith.addf %593, %594 : vector<8x128xf32>
    %596 = arith.mulf %583, %595 : vector<8x128xf32>
    %597 = arith.addf %592, %596 : vector<8x128xf32>
    %598 = math.tanh %597 : vector<8x128xf32>
    %cst_146 = arith.constant 1.000000e+00 : f32
    %599 = vector.broadcast %cst_146 : f32 to vector<8x128xf32>
    %600 = arith.subf %599, %591 : vector<8x128xf32>
    %601 = arith.mulf %600, %598 : vector<8x128xf32>
    %602 = arith.mulf %591, %525 : vector<8x128xf32>
    %603 = arith.addf %601, %602 : vector<8x128xf32>
    %604 = vector.extract_strided_slice %571 {offsets = [0, 0], sizes = [8, 128], strides = [1, 1]} : vector<8x384xf32> to vector<8x128xf32>
    %605 = vector.extract_strided_slice %575 {offsets = [0, 0], sizes = [8, 128], strides = [1, 1]} : vector<8x384xf32> to vector<8x128xf32>
    %606 = arith.addf %604, %605 : vector<8x128xf32>
    %607 = arith.negf %606 : vector<8x128xf32>
    %608 = math.exp %607 : vector<8x128xf32>
    %cst_147 = arith.constant 1.000000e+00 : f32
    %609 = vector.broadcast %cst_147 : f32 to vector<8x128xf32>
    %610 = arith.addf %609, %608 : vector<8x128xf32>
    %611 = arith.divf %609, %610 : vector<8x128xf32>
    %612 = vector.extract_strided_slice %571 {offsets = [0, 128], sizes = [8, 128], strides = [1, 1]} : vector<8x384xf32> to vector<8x128xf32>
    %613 = vector.extract_strided_slice %575 {offsets = [0, 128], sizes = [8, 128], strides = [1, 1]} : vector<8x384xf32> to vector<8x128xf32>
    %614 = arith.addf %612, %613 : vector<8x128xf32>
    %615 = arith.negf %614 : vector<8x128xf32>
    %616 = math.exp %615 : vector<8x128xf32>
    %cst_148 = arith.constant 1.000000e+00 : f32
    %617 = vector.broadcast %cst_148 : f32 to vector<8x128xf32>
    %618 = arith.addf %617, %616 : vector<8x128xf32>
    %619 = arith.divf %617, %618 : vector<8x128xf32>
    %620 = vector.extract_strided_slice %571 {offsets = [0, 256], sizes = [8, 128], strides = [1, 1]} : vector<8x384xf32> to vector<8x128xf32>
    %621 = vector.extract_strided_slice %575 {offsets = [0, 256], sizes = [8, 128], strides = [1, 1]} : vector<8x384xf32> to vector<8x128xf32>
    %622 = vector.broadcast %10 : vector<1x128xf32> to vector<8x128xf32>
    %623 = arith.addf %621, %622 : vector<8x128xf32>
    %624 = arith.mulf %611, %623 : vector<8x128xf32>
    %625 = arith.addf %620, %624 : vector<8x128xf32>
    %626 = math.tanh %625 : vector<8x128xf32>
    %cst_149 = arith.constant 1.000000e+00 : f32
    %627 = vector.broadcast %cst_149 : f32 to vector<8x128xf32>
    %628 = arith.subf %627, %619 : vector<8x128xf32>
    %629 = arith.mulf %628, %626 : vector<8x128xf32>
    %630 = arith.mulf %619, %553 : vector<8x128xf32>
    %631 = arith.addf %629, %630 : vector<8x128xf32>
    %632 = arith.index_cast %562 : i32 to index
    %c0_150 = arith.constant 0 : index
    %c0_151 = arith.constant 0 : index
    %633 = vector.load %arg5[%632, %c0_150, %c0_151] : memref<8x8x128xf32, #tpu.memory_space<vmem>>, vector<1x8x128xf32>
    %634 = vector.shape_cast %633 : vector<1x8x128xf32> to vector<8x128xf32>
    %635 = vector.shape_cast %603 : vector<8x128xf32> to vector<1x8x128xf32>
    tpu.vector_store %arg5[%632, %c0_150, %c0_151], %635 {strides = array<i32>} : memref<8x8x128xf32, #tpu.memory_space<vmem>>, vector<1x8x128xf32>,
    %636 = arith.index_cast %563 : i32 to index
    %c0_152 = arith.constant 0 : index
    %c0_153 = arith.constant 0 : index
    %637 = vector.load %arg6[%636, %c0_152, %c0_153] : memref<8x8x128xf32, #tpu.memory_space<vmem>>, vector<1x8x128xf32>
    %638 = vector.shape_cast %637 : vector<1x8x128xf32> to vector<8x128xf32>
    %639 = vector.shape_cast %631 : vector<8x128xf32> to vector<1x8x128xf32>
    tpu.vector_store %arg6[%636, %c0_152, %c0_153], %639 {strides = array<i32>} : memref<8x8x128xf32, #tpu.memory_space<vmem>>, vector<1x8x128xf32>,
    %c1_i32_154 = arith.constant 1 : i32
    %c0_155 = arith.constant 0 : index
    %c0_156 = arith.constant 0 : index
    %c0_157 = arith.constant 0 : index
    %640 = vector.load %arg7[%c0_155, %c0_156, %c0_157] : memref<2x8x128xf32, #tpu.memory_space<vmem>>, vector<1x8x128xf32>
    %641 = vector.shape_cast %640 : vector<1x8x128xf32> to vector<8x128xf32>
    %642 = vector.shape_cast %603 : vector<8x128xf32> to vector<1x8x128xf32>
    tpu.vector_store %arg7[%c0_155, %c0_156, %c0_157], %642 {strides = array<i32>} : memref<2x8x128xf32, #tpu.memory_space<vmem>>, vector<1x8x128xf32>,
    %c1_158 = arith.constant 1 : index
    %c0_159 = arith.constant 0 : index
    %c0_160 = arith.constant 0 : index
    %643 = vector.load %arg7[%c1_158, %c0_159, %c0_160] : memref<2x8x128xf32, #tpu.memory_space<vmem>>, vector<1x8x128xf32>
    %644 = vector.shape_cast %643 : vector<1x8x128xf32> to vector<8x128xf32>
    %645 = vector.shape_cast %631 : vector<8x128xf32> to vector<1x8x128xf32>
    tpu.vector_store %arg7[%c1_158, %c0_159, %c0_160], %645 {strides = array<i32>} : memref<2x8x128xf32, #tpu.memory_space<vmem>>, vector<1x8x128xf32>,
    return
  }
  func.func @transform_0(%arg0: i32) -> (i32, i32, i32) {
    %c0_i32 = arith.constant 0 : i32
    %c0_i32_0 = arith.constant 0 : i32
    %c0_i32_1 = arith.constant 0 : i32
    return %arg0, %c0_i32, %c0_i32_0 : i32, i32, i32
  }
  func.func @transform_1(%arg0: i32) -> (i32, i32, i32) {
    %c0_i32 = arith.constant 0 : i32
    %0 = arith.subi %c0_i32, %arg0 : i32
    %c0_i32_0 = arith.constant 0 : i32
    %c1_i32 = arith.constant 1 : i32
    %c0_i32_1 = arith.constant 0 : i32
    return %0, %c0_i32_0, %c1_i32 : i32, i32, i32
  }
  func.func @transform_2(%arg0: i32) -> (i32, i32, i32) {
    %c0_i32 = arith.constant 0 : i32
    %c0_i32_0 = arith.constant 0 : i32
    %c0_i32_1 = arith.constant 0 : i32
    %c0_i32_2 = arith.constant 0 : i32
    return %c0_i32, %c0_i32_0, %c0_i32_1 : i32, i32, i32
  }
  func.func @transform_3(%arg0: i32) -> (i32, i32, i32) {
    %c0_i32 = arith.constant 0 : i32
    %c0_i32_0 = arith.constant 0 : i32
    %c0_i32_1 = arith.constant 0 : i32
    %c0_i32_2 = arith.constant 0 : i32
    return %c0_i32, %c0_i32_0, %c0_i32_1 : i32, i32, i32
  }
  func.func @transform_4(%arg0: i32) -> (i32, i32, i32) {
    %c0_i32 = arith.constant 0 : i32
    %c0_i32_0 = arith.constant 0 : i32
    %c0_i32_1 = arith.constant 0 : i32
    return %arg0, %c0_i32, %c0_i32_0 : i32, i32, i32
  }
  func.func @transform_5(%arg0: i32) -> (i32, i32, i32) {
    %c0_i32 = arith.constant 0 : i32
    %0 = arith.subi %c0_i32, %arg0 : i32
    %c0_i32_0 = arith.constant 0 : i32
    %c0_i32_1 = arith.constant 0 : i32
    %c0_i32_2 = arith.constant 0 : i32
    return %0, %c0_i32_0, %c0_i32_1 : i32, i32, i32
  }
}

</mosaic_0001>

<bundles_post_ra>
// kernel: bigru_forward.2
= control target key start
LH: loop header
LB: loop body
LE: loop exit
PB: predicated region body
PF: predicated region fallthrough
CT: control target
= control target key end

     0   :  { %s1528_s0 = inlined_call_operand.vmem [shape: f32[64,128], index: 0, kind: input, shape index: {}]   ;;  %s1529_s3 = inlined_call_operand.vmem [shape: bf16[128,768], index: 3, kind: input, shape index: {}]   ;;  %s1530_s1 = inlined_call_operand.vmem [shape: f32[1,128], index: 1, kind: input, shape index: {}]   ;;  %s1531_s2 = inlined_call_operand.vmem [shape: f32[1,128], index: 2, kind: input, shape index: {}]   ;;  %s1532_s4 = inlined_call_operand.vmem [shape: f32[1,768], index: 4, kind: input, shape index: {}]   ;;  %s1533_s5 = inlined_call_operand.vmem [shape: bf16[64,768], index: 5, kind: output, shape index: {}]  }
   0x1   :  { %v21_v0 = vld [vmem:[%s1528_s0] sm:$0xff]  ;;  %v23_v1 = vld [vmem:[%s1528_s0 + $0x10] sm:$0xff]  ;;  %v22_v2 = vld [vmem:[%s1528_s0 + $0x8] sm:$0xff] }
   0x2   :  { %29 = vadd.xlane.f32.xlu0 %v21_v0  ;;  %33 = vadd.xlane.f32.xlu1 %v23_v1  ;;  %v24_v3 = vld [vmem:[%s1528_s0 + $0x18] sm:$0xff]  ;;  %v25_v4 = vld [vmem:[%s1528_s0 + $0x20] sm:$0xff]  ;;  %v26_v5 = vld [vmem:[%s1528_s0 + $0x28] sm:$0xff] }
   0x3   :  { %v27_v6 = vld [vmem:[%s1528_s0 + $0x30] sm:$0xff]  ;;  %v28_v7 = vld [vmem:[%s1528_s0 + $0x38] sm:$0xff]  ;;  %v1020_v41 = vld [vmem:[%s1529_s3 + $0xc] ss:$24 sps:$4 sm:$0xff]  }
   0x4   :  { %v1018_v40 = vld [vmem:[%s1529_s3 + $0x4] ss:$24 sps:$4 sm:$0xff]   ;;  %v1022_v42 = vld [vmem:[%s1529_s3] ss:$24 sps:$4 sm:$0xff]   ;;  %585 = vmatprep.subr.bf16.mxu1 %v1020_v41  ;;  %v1024_v44 = vld [vmem:[%s1529_s3 + $0x34] ss:$24 sps:$4 sm:$0xff]  }
   0x5   :  { %512 = vmatprep.subr.bf16.mxu0 %v1018_v40  ;;  %v1023_v43 = vld [vmem:[%s1529_s3 + $0x8] ss:$24 sps:$4 sm:$0xff]   ;;  %v1026_v45 = vld [vmem:[%s1529_s3 + $0x3c] ss:$24 sps:$4 sm:$0xff]   ;;  %v1029_v47 = vld [vmem:[%s1529_s3 + $0x38] ss:$24 sps:$4 sm:$0xff]  }
   0x6   :  { %31 = vadd.xlane.f32.xlu0 %v22_v2  ;;  %35 = vadd.xlane.f32.xlu1 %v24_v3  ;;  %v1028_v46 = vld [vmem:[%s1529_s3 + $0x30] ss:$24 sps:$4 sm:$0xff]   ;;  %v1030_v48 = vld [vmem:[%s1529_s3 + $0x64] ss:$24 sps:$4 sm:$0xff]   ;;  %v1034_v50 = vld [vmem:[%s1529_s3 + $0x60] ss:$24 sps:$4 sm:$0xff]  }
   0x7   :  { %513 = vmatpush1.bf16.msra.mxu0 %v1022_v42  ;;  %586 = vmatpush1.bf16.msra.mxu1 %v1023_v43  ;;  %v1032_v49 = vld [vmem:[%s1529_s3 + $0x6c] ss:$24 sps:$4 sm:$0xff]   ;;  %v1035_v51 = vld [vmem:[%s1529_s3 + $0x68] ss:$24 sps:$4 sm:$0xff]   ;;  %v1038_v53 = vld [vmem:[%s1529_s3 + $0x9c] ss:$24 sps:$4 sm:$0xff]  }
   0x8   :  { %514 = vmatprep.subr.bf16.mxu0 %v1024_v44  ;;  %587 = vmatprep.subr.bf16.mxu1 %v1026_v45  ;;  %v1036_v52 = vld [vmem:[%s1529_s3 + $0x94] ss:$24 sps:$4 sm:$0xff]   ;;  %v1040_v54 = vld [vmem:[%s1529_s3 + $0x90] ss:$24 sps:$4 sm:$0xff]   ;;  %v1042_v56 = vld [vmem:[%s1529_s3 + $0xc4] ss:$24 sps:$4 sm:$0xff]  }
   0x9   :  { %v1041_v55 = vld [vmem:[%s1529_s3 + $0x98] ss:$24 sps:$4 sm:$0xff]   ;;  %v1044_v57 = vld [vmem:[%s1529_s3 + $0xcc] ss:$24 sps:$4 sm:$0xff]   ;;  %v1047_v59 = vld [vmem:[%s1529_s3 + $0xc8] ss:$24 sps:$4 sm:$0xff]  }
   0xa   :  { %37 = vadd.xlane.f32.xlu0 %v25_v4  ;;  %39 = vadd.xlane.f32.xlu1 %v26_v5  ;;  %v1046_v58 = vld [vmem:[%s1529_s3 + $0xc0] ss:$24 sps:$4 sm:$0xff]   ;;  %v1048_v60 = vld [vmem:[%s1529_s3 + $0xf4] ss:$24 sps:$4 sm:$0xff]   ;;  %v1052_v62 = vld [vmem:[%s1529_s3 + $0xf0] ss:$24 sps:$4 sm:$0xff]  }
   0xb   :  { %515 = vmatpush1.bf16.msra.mxu0 %v1028_v46  ;;  %588 = vmatpush1.bf16.msra.mxu1 %v1029_v47  ;;  %v1050_v61 = vld [vmem:[%s1529_s3 + $0xfc] ss:$24 sps:$4 sm:$0xff]   ;;  %v1053_v63 = vld [vmem:[%s1529_s3 + $0xf8] ss:$24 sps:$4 sm:$0xff]   ;;  %v903_v40 = vld [vmem:[%s1530_s1] ss:$0 sm:$0xff] }
   0xc   :  { %516 = vmatprep.subr.bf16.mxu0 %v1030_v48  ;;  %589 = vmatprep.subr.bf16.mxu1 %v1032_v49  ;;  %v904_v44 = vld [vmem:[%s1531_s2] ss:$0 sm:$0xff] }
   0xe   :  { %41 = vadd.xlane.f32.xlu0 %v27_v6  ;;  %43 = vadd.xlane.f32.xlu1 %v28_v7 }
   0xf   :  { %517 = vmatpush1.bf16.msra.mxu0 %v1034_v50  ;;  %590 = vmatpush1.bf16.msra.mxu1 %v1035_v51 }
  0x10   :  { %518 = vmatprep.subr.bf16.mxu0 %v1036_v52  ;;  %591 = vmatprep.subr.bf16.mxu1 %v1038_v53 }
  0x13   :  { %519 = vmatpush1.bf16.msra.mxu0 %v1040_v54  ;;  %592 = vmatpush1.bf16.msra.mxu1 %v1041_v55 }
  0x14   :  { %520 = vmatprep.subr.bf16.mxu0 %v1042_v56  ;;  %593 = vmatprep.subr.bf16.mxu1 %v1044_v57 }
  0x17   :  { %521 = vmatpush1.bf16.msra.mxu0 %v1046_v58  ;;  %594 = vmatpush1.bf16.msra.mxu1 %v1047_v59 }
  0x18   :  { %522 = vmatprep.subr.bf16.mxu0 %v1048_v60  ;;  %595 = vmatprep.subr.bf16.mxu1 %v1050_v61 }
  0x1b   :  { %523 = vmatpush1.bf16.msra.mxu0 %v1052_v62  ;;  %596 = vmatpush1.bf16.msra.mxu1 %v1053_v63 }
  0x8f   :  { %v30_v8 = vpop.xlane.xlu0 %29  ;;  %v34_v9 = vpop.xlane.xlu1 %33 }
  0x90   :  { %v46_v10 = vmul.f32 0.0078125, %v30_v8  ;;  %v48_v11 = vmul.f32 0.0078125, %v34_v9  ;;  %v1065_v8 = vld [vmem:[%s1529_s3 + $0x158] ss:$24 sps:$4 sm:$0xff]   ;;  %v1068_v9 = vld [vmem:[%s1529_s3 + $0x14] ss:$24 sps:$4 sm:$0xff]  }
  0x92   :  { %v1177_v12 = vsub.f32 %v21_v0, %v46_v10  ;;  %v1179_v13 = vsub.f32 %v23_v1, %v48_v11  ;;  %v1054_v0 = vld [vmem:[%s1529_s3 + $0x124] ss:$24 sps:$4 sm:$0xff]  }
  0x93   :  { %v32_v14 = vpop.xlane.xlu0 %31  ;;  %v36_v15 = vpop.xlane.xlu1 %35  ;;  %v1056_v1 = vld [vmem:[%s1529_s3 + $0x12c] ss:$24 sps:$4 sm:$0xff]   ;;  %524 = vmatprep.subr.bf16.mxu0 %v1054_v0 }
  0x94   :  { %v47_v16 = vmul.f32 0.0078125, %v32_v14  ;;  %v62_v17 = vmul.f32 %v1177_v12, %v1177_v12  ;;  %v49_v18 = vmul.f32 0.0078125, %v36_v15  ;;  %v64_v21 = vmul.f32 %v1179_v13, %v1179_v13  ;;  %597 = vmatprep.subr.bf16.mxu1 %v1056_v1 }
  0x96   :  { %v1183_v19 = vsub.f32 %v22_v2, %v47_v16  ;;  %70 = vadd.xlane.f32.xlu0 %v62_v17  ;;  %v1185_v20 = vsub.f32 %v24_v3, %v49_v18  ;;  %v1058_v2 = vld [vmem:[%s1529_s3 + $0x120] ss:$24 sps:$4 sm:$0xff]  }
  0x97   :  { %v38_v22 = vpop.xlane.xlu0 %37  ;;  %v40_v23 = vpop.xlane.xlu1 %39  ;;  %v1059_v3 = vld [vmem:[%s1529_s3 + $0x128] ss:$24 sps:$4 sm:$0xff]   ;;  %525 = vmatpush1.bf16.msra.mxu0 %v1058_v2 }
  0x98   :  { %v50_v24 = vmul.f32 0.0078125, %v38_v22  ;;  %v63_v25 = vmul.f32 %v1183_v19, %v1183_v19  ;;  %v51_v26 = vmul.f32 0.0078125, %v40_v23  ;;  %v65_v29 = vmul.f32 %v1185_v20, %v1185_v20  ;;  %598 = vmatpush1.bf16.msra.mxu1 %v1059_v3 }
  0x9a   :  { %v1191_v27 = vsub.f32 %v25_v4, %v50_v24  ;;  %74 = vadd.xlane.f32.xlu0 %v64_v21  ;;  %72 = vadd.xlane.f32.xlu1 %v63_v25  ;;  %v1193_v28 = vsub.f32 %v26_v5, %v51_v26  ;;  %v1060_v4 = vld [vmem:[%s1529_s3 + $0x154] ss:$24 sps:$4 sm:$0xff]  }
  0x9b   :  { %v42_v30 = vpop.xlane.xlu0 %41  ;;  %v44_v31 = vpop.xlane.xlu1 %43  ;;  %v1062_v5 = vld [vmem:[%s1529_s3 + $0x15c] ss:$24 sps:$4 sm:$0xff]   ;;  %526 = vmatprep.subr.bf16.mxu0 %v1060_v4 }
  0x9c   :  { %v52_v32 = vmul.f32 0.0078125, %v42_v30  ;;  %v66_v33 = vmul.f32 %v1191_v27, %v1191_v27  ;;  %v53_v34 = vmul.f32 0.0078125, %v44_v31  ;;  %v67_v37 = vmul.f32 %v1193_v28, %v1193_v28  ;;  %599 = vmatprep.subr.bf16.mxu1 %v1062_v5 }
  0x9d   :  { %600 = vmatpush1.bf16.msra.mxu1 %v1065_v8 }
  0x9e   :  { %v1199_v35 = vsub.f32 %v27_v6, %v52_v32  ;;  %76 = vadd.xlane.f32.xlu1 %v65_v29  ;;  %78 = vadd.xlane.f32.xlu0 %v66_v33  ;;  %v1201_v36 = vsub.f32 %v28_v7, %v53_v34  ;;  %v1122_v6 = vmov 0   ;;  %v1064_v7 = vld [vmem:[%s1529_s3 + $0x150] ss:$24 sps:$4 sm:$0xff]  }
  0x9f   :  { %544 = vmatprep.mubr.bf16.mxu0 %v1122_v6  ;;  %617 = vmatprep.mubr.bf16.mxu1 %v1122_v6 }
  0xa0   :  { %v68_v38 = vmul.f32 %v1199_v35, %v1199_v35  ;;  %v69_v39 = vmul.f32 %v1201_v36, %v1201_v36  ;;  %527 = vmatpush1.bf16.msra.mxu0 %v1064_v7  ;;  %1001 = vmatprep.subr.bf16.mxu1 %v1068_v9 }
  0xa1   :  { %658 = vmatprep.subr.bf16.mxu0 %v1068_v9 }
  0xa2   :  { %80 = vadd.xlane.f32.xlu1 %v67_v37  ;;  %82 = vadd.xlane.f32.xlu0 %v68_v38 }
  0xa6   :  { %84 = vadd.xlane.f32.xlu1 %v69_v39 }
 0x123   :  { %v71_v10 = vpop.xlane.xlu0 %70 }
 0x124   :  { %v86_v11 = vmul.f32 0.0078125, %v71_v10 }
 0x126   :  { %v94_v14 = vadd.f32 1e-05, %v86_v11 }
 0x127   :  { %v73_v15 = vpop.xlane.xlu1 %72  ;;  %v75_v16 = vpop.xlane.xlu0 %74 }
 0x128   :  { %1090 = vrsqrt.f32 %v94_v14  ;;  %v87_v17 = vmul.f32 0.0078125, %v73_v15  ;;  %v88_v18 = vmul.f32 0.0078125, %v75_v16 }
 0x12a   :  { %v95_v21 = vadd.f32 1e-05, %v87_v17  ;;  %v96_v22 = vadd.f32 1e-05, %v88_v18 }
 0x12b   :  { %v77_v23 = vpop.xlane.xlu1 %76  ;;  %v79_v24 = vpop.xlane.xlu0 %78 }
 0x12c   :  { %1092 = vrsqrt.f32 %v95_v21  ;;  %v89_v25 = vmul.f32 0.0078125, %v77_v23  ;;  %v90_v26 = vmul.f32 0.0078125, %v79_v24 }
 0x12d   :  { %1094 = vrsqrt.f32 %v96_v22 }
 0x12e   :  { %v97_v29 = vadd.f32 1e-05, %v89_v25  ;;  %v98_v30 = vadd.f32 1e-05, %v90_v26  ;;  %v1066_v25 = vld [vmem:[%s1529_s3 + $0x10] ss:$24 sps:$4 sm:$0xff]  }
 0x12f   :  { %v81_v31 = vpop.xlane.xlu1 %80  ;;  %v83_v32 = vpop.xlane.xlu0 %82 }
 0x130   :  { %1096 = vrsqrt.f32 %v97_v29  ;;  %v91_v33 = vmul.f32 0.0078125, %v81_v31  ;;  %v92_v34 = vmul.f32 0.0078125, %v83_v32 }
 0x131   :  { %1098 = vrsqrt.f32 %v98_v30  ;;  %v1071_v30 = vld [vmem:[%s1529_s3 + $0x44] ss:$24 sps:$4 sm:$0xff]  }
 0x132   :  { %v1091_v37 = vpop.eup %1090  ;;  %v99_v38 = vadd.f32 1e-05, %v91_v33  ;;  %v100_v39 = vadd.f32 1e-05, %v92_v34 }
 0x133   :  { %v110_v41 = vmul.f32 %v1091_v37, %v1177_v12  ;;  %v85_v42 = vpop.xlane.xlu1 %84  ;;  %v1069_v37 = vld [vmem:[%s1529_s3 + $0x40] ss:$24 sps:$4 sm:$0xff]  }
 0x134   :  { %1100 = vrsqrt.f32 %v99_v38  ;;  %v93_v43 = vmul.f32 0.0078125, %v85_v42  ;;  %v1074_v38 = vld [vmem:[%s1529_s3 + $0x74] ss:$24 sps:$4 sm:$0xff]  }
 0x135   :  { %1102 = vrsqrt.f32 %v100_v39  ;;  %v125_v45 = vmul.f32 %v903_v40, %v110_v41 }
 0x136   :  { %v1093_v46 = vpop.eup %1092  ;;  %v101_v47 = vadd.f32 1e-05, %v93_v43 }
 0x137   :  { %v1095_v48 = vpop.eup %1094  ;;  %v111_v49 = vmul.f32 %v1093_v46, %v1183_v19  ;;  %v140_v50 = vadd.f32 %v904_v44, %v125_v45  ;;  %v1077_v46 = vld [vmem:[%s1529_s3 + $0xa4] ss:$24 sps:$4 sm:$0xff]  }
 0x138   :  { %v112_v51 = vmul.f32 %v1095_v48, %v1179_v13  ;;  %1104 = vrsqrt.f32 %v101_v47 }
 0x139   :  { %v126_v52 = vmul.f32 %v903_v40, %v111_v49  ;;  %v156_v12 = vmul.f32 0.70710677, %v140_v50  ;;  %v148_v17 = vmul.f32 0.5, %v140_v50  ;;  %v1075_v50 = vld [vmem:[%s1529_s3 + $0xa0] ss:$24 sps:$4 sm:$0xff]  }
 0x13a   :  { %v1097_v53 = vpop.eup %1096  ;;  %v127_v54 = vmul.f32 %v903_v40, %v112_v51  ;;  %v1080_v51 = vld [vmem:[%s1529_s3 + $0xd4] ss:$24 sps:$4 sm:$0xff]  }
 0x13b   :  { %v1099_v55 = vpop.eup %1098  ;;  %v113_v56 = vmul.f32 %v1097_v53, %v1185_v20  ;;  %v141_v57 = vadd.f32 %v904_v44, %v126_v52  ;;  %1106 = verf.f32 %v156_v12 }
 0x13c   :  { %v114_v58 = vmul.f32 %v1099_v55, %v1191_v27  ;;  %v142_v59 = vadd.f32 %v904_v44, %v127_v54 }
 0x13d   :  { %v157_v60 = vmul.f32 0.70710677, %v141_v57  ;;  %v128_v61 = vmul.f32 %v903_v40, %v113_v56  ;;  %v149_v18 = vmul.f32 0.5, %v141_v57  ;;  %v1078_v56 = vld [vmem:[%s1529_s3 + $0xd0] ss:$24 sps:$4 sm:$0xff]  }
 0x13e   :  { %v1101_v62 = vpop.eup %1100  ;;  %v158_v19 = vmul.f32 0.70710677, %v142_v59  ;;  %v129_v1 = vmul.f32 %v903_v40, %v114_v58  ;;  %v150_v39 = vmul.f32 0.5, %v142_v59  ;;  %v1083_v58 = vld [vmem:[%s1529_s3 + $0x104] ss:$24 sps:$4 sm:$0xff]  }
 0x13f   :  { %v1103_v63 = vpop.eup %1102  ;;  %v115_v13 = vmul.f32 %v1101_v62, %v1193_v28  ;;  %1108 = verf.f32 %v157_v60  ;;  %v143_v0 = vadd.f32 %v904_v44, %v128_v61  ;;  %v1081_v62 = vld [vmem:[%s1529_s3 + $0x100] ss:$24 sps:$4 sm:$0xff]  }
 0x140   :  { %v116_v20 = vmul.f32 %v1103_v63, %v1199_v35  ;;  %1110 = verf.f32 %v158_v19  ;;  %v144_v27 = vadd.f32 %v904_v44, %v129_v1  ;;  %v1086_v19 = vld [vmem:[%s1529_s3 + $0x134] ss:$24 sps:$4 sm:$0xff]   ;;  %v1084_v1 = vld [vmem:[%s1529_s3 + $0x130] ss:$24 sps:$4 sm:$0xff]  }
 0x141   :  { %v159_v2 = vmul.f32 0.70710677, %v143_v0  ;;  %v130_v3 = vmul.f32 %v903_v40, %v115_v13  ;;  %v151_v33 = vmul.f32 0.5, %v143_v0 }
 0x142   :  { %v1105_v4 = vpop.eup %1104  ;;  %v160_v11 = vmul.f32 0.70710677, %v144_v27  ;;  %v131_v14 = vmul.f32 %v903_v40, %v116_v20  ;;  %v152_v52 = vmul.f32 0.5, %v144_v27  ;;  %v242_v20 = vlaneseq }
 0x143   :  { %v117_v5 = vmul.f32 %v1105_v4, %v1201_v36  ;;  %1112 = verf.f32 %v159_v2  ;;  %v145_v7 = vadd.f32 %v904_v44, %v130_v3  ;;  %v1089_v3 = vld [vmem:[%s1529_s3 + $0x164] ss:$24 sps:$4 sm:$0xff]   ;;  %v1087_v4 = vld [vmem:[%s1529_s3 + $0x160] ss:$24 sps:$4 sm:$0xff]  }
 0x144   :  { %v1326_v35 = vadd.f32 %v904_v44, %v131_v14 }
 0x145   :  { %v1107_v8 = vpop.eup %1106  ;;  %v161_v9 = vmul.f32 0.70710677, %v145_v7  ;;  %v132_v10 = vmul.f32 %v903_v40, %v117_v5  ;;  %v153_v48 = vmul.f32 0.5, %v145_v7  ;;  %v1397_v5 = vshrl.u32 %v242_v20, 7 }
 0x146   :  { %v172_v28 = vadd.f32 1.0, %v1107_v8  ;;  %v162_v32 = vmul.f32 0.70710677, %v1326_v35  ;;  %v154_v63 = vmul.f32 0.5, %v1326_v35  ;;  %v1404_v8 = vld [vmem:[%s1532_s4] sm:$0x3f] }
 0x147   :  { %1114 = verf.f32 %v161_v9  ;;  %v1324_v16 = vadd.f32 %v904_v44, %v132_v10  ;;  %v1072_v44 = vld [vmem:[%s1529_s3 + $0x70] ss:$24 sps:$4 sm:$0xff]   ;;  %v244_v27 = vsub.s32 0, %v1397_v5  ;;  %v252_v7 = vsub.s32 2, %v1397_v5 }
 0x148   :  { %1116 = verf.f32 %v160_v11  ;;  %v180_v22 = vmul.f32 %v172_v28, %v148_v17  ;;  %v248_v9 = vsub.s32 1, %v1397_v5  ;;  %v256_v10 = vsub.s32 3, %v1397_v5 }
 0x149   :  { %v1109_v15 = vpop.eup %1108  ;;  %v163_v26 = vmul.f32 0.70710677, %v1324_v16  ;;  %v155_v60 = vmul.f32 0.5, %v1324_v16  ;;  %v1412_v11 = vrot.slane %v1404_v8, %v252_v7 }
 0x14a   :  { %v173_v21 = vadd.f32 1.0, %v1109_v15  ;;  %v1111_v36 = vpop.eup %1110  ;;  %v1415_v14 = vrot.slane %v1404_v8, %v248_v9  ;;  %v1418_v28 = vrot.slane %v1404_v8, %v256_v10 }
 0x14b   :  { %v174_v34 = vadd.f32 1.0, %v1111_v36  ;;  %1118 = verf.f32 %v163_v26 }
 0x14c   :  { %v181_v23 = vmul.f32 %v173_v21, %v149_v18  ;;  %1120 = verf.f32 %v162_v32 }
 0x14d   :  { %v1113_v24 = vpop.eup %1112  ;;  %v182_v42 = vmul.f32 %v174_v34, %v150_v39 }
 0x14e   :  { %v1332_v29 = vpack.c.bf16 %v181_v23, %v180_v22  ;;  %v175_v31 = vadd.f32 1.0, %v1113_v24 }
 0x150   :  { %545 = vmatmul.mubr.bf16.vlgmr.msra.gmra.mrb[0].mxu0 %v1332_v29  ;;  %618 = vmatmul.mubr.bf16.vlgmr.msra.gmra.mrb[0].mxu1 %v1332_v29  ;;  %v183_v40 = vmul.f32 %v175_v31, %v151_v33 }
 0x151   :  { %659 = vmatpush1.bf16.msra.mxu0 %v1066_v25  ;;  %1009 = vmatpush1.bf16.msra.mxu1 %v1066_v25  ;;  %v1115_v41 = vpop.eup %1114 }
 0x152   :  { %660 = vmatprep.subr.bf16.mxu0 %v1071_v30  ;;  %1002 = vmatprep.subr.bf16.mxu1 %v1071_v30  ;;  %v1117_v43 = vpop.eup %1116  ;;  %v1351_v45 = vpack.c.bf16 %v183_v40, %v182_v42  ;;  %v177_v47 = vadd.f32 1.0, %v1115_v41 }
 0x153   :  { %554 = vmatprep.mubr.bf16.mxu0 %v1122_v6  ;;  %627 = vmatprep.mubr.bf16.mxu1 %v1122_v6  ;;  %v176_v49 = vadd.f32 1.0, %v1117_v43 }
 0x154   :  { %v185_v12 = vmul.f32 %v177_v47, %v153_v48 }
 0x155   :  { %661 = vmatpush1.bf16.msra.mxu0 %v1069_v37  ;;  %1010 = vmatpush1.bf16.msra.mxu1 %v1069_v37  ;;  %v1119_v53 = vpop.eup %1118  ;;  %v184_v54 = vmul.f32 %v176_v49, %v152_v52 }
 0x156   :  { %662 = vmatprep.subr.bf16.mxu0 %v1074_v38  ;;  %1003 = vmatprep.subr.bf16.mxu1 %v1074_v38  ;;  %v1121_v55 = vpop.eup %1120  ;;  %v179_v59 = vadd.f32 1.0, %v1119_v53 }
 0x157   :  { %v190_v57 = vpack.c.bf16 %v185_v12, %v184_v54  ;;  %v178_v61 = vadd.f32 1.0, %v1121_v55 }
 0x158   :  { %555 = vmatmul.mubr.bf16.gmra.mrb[4].mxu0 %v1351_v45  ;;  %628 = vmatmul.mubr.bf16.gmra.mrb[4].mxu1 %v1351_v45  ;;  %v187_v13 = vmul.f32 %v179_v59, %v155_v60 }
 0x159   :  { %663 = vmatpush1.bf16.msra.mxu0 %v1072_v44  ;;  %1011 = vmatpush1.bf16.msra.mxu1 %v1072_v44  ;;  %v186_v0 = vmul.f32 %v178_v61, %v154_v63 }
 0x15a   :  { %664 = vmatprep.subr.bf16.mxu0 %v1077_v46  ;;  %1004 = vmatprep.subr.bf16.mxu1 %v1077_v46 }
 0x15b   :  { %564 = vmatprep.mubr.bf16.mxu0 %v1122_v6  ;;  %637 = vmatprep.mubr.bf16.mxu1 %v1122_v6  ;;  %v191_v2 = vpack.c.bf16 %v187_v13, %v186_v0 }
 0x15d   :  { %665 = vmatpush1.bf16.msra.mxu0 %v1075_v50  ;;  %1012 = vmatpush1.bf16.msra.mxu1 %v1075_v50 }
 0x15e   :  { %666 = vmatprep.subr.bf16.mxu0 %v1080_v51  ;;  %1005 = vmatprep.subr.bf16.mxu1 %v1080_v51 }
 0x160   :  { %565 = vmatmul.mubr.bf16.gmra.mrb[8].mxu0 %v190_v57  ;;  %638 = vmatmul.mubr.bf16.gmra.mrb[8].mxu1 %v190_v57 }
 0x161   :  { %667 = vmatpush1.bf16.msra.mxu0 %v1078_v56  ;;  %1013 = vmatpush1.bf16.msra.mxu1 %v1078_v56 }
 0x162   :  { %668 = vmatprep.subr.bf16.mxu0 %v1083_v58  ;;  %1006 = vmatprep.subr.bf16.mxu1 %v1083_v58 }
 0x163   :  { %574 = vmatprep.mubr.bf16.mxu0 %v1122_v6  ;;  %647 = vmatprep.mubr.bf16.mxu1 %v1122_v6 }
 0x165   :  { %669 = vmatpush1.bf16.msra.mxu0 %v1081_v62  ;;  %1014 = vmatpush1.bf16.msra.mxu1 %v1081_v62 }
 0x166   :  { %670 = vmatprep.subr.bf16.mxu0 %v1086_v19  ;;  %1007 = vmatprep.subr.bf16.mxu1 %v1086_v19 }
 0x168   :  { %575 = vmatmul.mubr.bf16.gmra.mrb[12].mxu0 %v191_v2  ;;  %648 = vmatmul.mubr.bf16.gmra.mrb[12].mxu1 %v191_v2 }
 0x169   :  { %671 = vmatpush1.bf16.msra.mxu0 %v1084_v1  ;;  %1015 = vmatpush1.bf16.msra.mxu1 %v1084_v1 }
 0x16a   :  { %672 = vmatprep.subr.bf16.mxu0 %v1089_v3  ;;  %1008 = vmatprep.subr.bf16.mxu1 %v1089_v3 }
 0x16b   :  { %690 = vmatprep.mubr.bf16.mxu0 %v1122_v6  ;;  %710 = vmatprep.mubr.bf16.mxu1 %v1122_v6 }
 0x16d   :  { %673 = vmatpush1.bf16.msra.mxu0 %v1087_v4  ;;  %1016 = vmatpush1.bf16.msra.mxu1 %v1087_v4 }
 0x170   :  { %691 = vmatmul.mubr.bf16.vlgmr.msra.gmra.mrb[16].mxu0 %v1332_v29  ;;  %711 = vmatmul.mubr.bf16.vlgmr.msra.gmra.mrb[16].mxu1 %v190_v57 }
 0x171   :  { %700 = vmatprep.mubr.bf16.mxu0 %v1122_v6  ;;  %720 = vmatprep.mubr.bf16.mxu1 %v1122_v6  ;;  %v1409_v6 = vrot.slane %v1404_v8, %v244_v27 }
 0x178   :  { %701 = vmatmul.mubr.bf16.gmra.mrb[20].mxu0 %v1351_v45  ;;  %721 = vmatmul.mubr.bf16.gmra.mrb[20].mxu1 %v191_v2 }
 0x223   :  { %v546_v15 = vpop.f32.mrb[0].mxu0  ;;  %v619_v16 = vpop.f32.mrb[0].mxu1 }
 0x224   :  { %v547_v17 = vadd.f32 %v546_v15, %v1409_v6  ;;  %v620_v18 = vadd.f32 %v619_v16, %v1412_v11  ;;  %v548_v21 = vpop.f32.mrb[1].mxu0  ;;  %v621_v35 = vpop.f32.mrb[1].mxu1 }
 0x225   :  { %v549_v36 = vadd.f32 %v548_v21, %v1415_v14  ;;  %v622_v22 = vadd.f32 %v621_v35, %v1418_v28  ;;  %v550_v23 = vpop.f32.mrb[2].mxu0  ;;  %v623_v24 = vpop.f32.mrb[2].mxu1 }
 0x226   :  { %v551_v25 = vadd.f32 %v550_v23, %v1409_v6  ;;  %v624_v26 = vadd.f32 %v623_v24, %v1412_v11  ;;  %v552_v29 = vpop.f32.mrb[3].mxu0  ;;  %v625_v30 = vpop.f32.mrb[3].mxu1  ;;  %v260_v23 = vsub.s32 4, %v1397_v5 }
 0x227   :  { %v977_v31 = vpack.c.bf16 %v549_v36, %v547_v17  ;;  %v978_v32 = vpack.c.bf16 %v622_v22, %v620_v18  ;;  %v553_v33 = vadd.f32 %v552_v29, %v1415_v14  ;;  %v626_v34 = vadd.f32 %v625_v30, %v1418_v28 }
 0x228   :  { %v264_v30 = vsub.s32 5, %v1397_v5 }
 0x229   :  { %875 = vst [vmem:[%s1533_s5] sm:$0xff] %v977_v31  ;;  %876 = vst [vmem:[%s1533_s5 + $0x8] sm:$0xff] %v978_v32  ;;  %v980_v37 = vpack.c.bf16 %v553_v33, %v551_v25  ;;  %v981_v38 = vpack.c.bf16 %v626_v34, %v624_v26 }
 0x22b   :  { %878 = vst [vmem:[%s1533_s5 + $0x18] sm:$0xff] %v980_v37  ;;  %879 = vst [vmem:[%s1533_s5 + $0x20] sm:$0xff] %v981_v38  ;;  %v556_v39 = vpop.f32.mrb[4].mxu0  ;;  %v629_v40 = vpop.f32.mrb[4].mxu1 }
 0x22c   :  { %v557_v41 = vadd.f32 %v556_v39, %v1409_v6  ;;  %v630_v42 = vadd.f32 %v629_v40, %v1412_v11  ;;  %v558_v43 = vpop.f32.mrb[5].mxu0  ;;  %v631_v44 = vpop.f32.mrb[5].mxu1 }
 0x22d   :  { %v559_v45 = vadd.f32 %v558_v43, %v1415_v14  ;;  %v632_v46 = vadd.f32 %v631_v44, %v1418_v28  ;;  %v560_v47 = vpop.f32.mrb[6].mxu0  ;;  %v633_v48 = vpop.f32.mrb[6].mxu1 }
 0x22e   :  { %v561_v49 = vadd.f32 %v560_v47, %v1409_v6  ;;  %v634_v50 = vadd.f32 %v633_v48, %v1412_v11  ;;  %v562_v51 = vpop.f32.mrb[7].mxu0  ;;  %v635_v52 = vpop.f32.mrb[7].mxu1 }
 0x22f   :  { %v983_v12 = vpack.c.bf16 %v559_v45, %v557_v41  ;;  %v984_v53 = vpack.c.bf16 %v632_v46, %v630_v42  ;;  %v563_v54 = vadd.f32 %v562_v51, %v1415_v14  ;;  %v636_v55 = vadd.f32 %v635_v52, %v1418_v28 }
 0x230   :  { %v261_v41 = vrot.slane %v1404_v8, %v260_v23 }
 0x231   :  { %881 = vst [vmem:[%s1533_s5 + $0x30] sm:$0xff] %v983_v12  ;;  %882 = vst [vmem:[%s1533_s5 + $0x38] sm:$0xff] %v984_v53  ;;  %v986_v56 = vpack.c.bf16 %v563_v54, %v561_v49  ;;  %v987_v57 = vpack.c.bf16 %v636_v55, %v634_v50 }
 0x233   :  { %884 = vst [vmem:[%s1533_s5 + $0x48] sm:$0xff] %v986_v56  ;;  %885 = vst [vmem:[%s1533_s5 + $0x50] sm:$0xff] %v987_v57  ;;  %v566_v58 = vpop.f32.mrb[8].mxu0  ;;  %v639_v59 = vpop.f32.mrb[8].mxu1 }
 0x234   :  { %v567_v60 = vadd.f32 %v566_v58, %v1409_v6  ;;  %v640_v61 = vadd.f32 %v639_v59, %v1412_v11  ;;  %v568_v62 = vpop.f32.mrb[9].mxu0  ;;  %v641_v19 = vpop.f32.mrb[9].mxu1 }
 0x235   :  { %v569_v63 = vadd.f32 %v568_v62, %v1415_v14  ;;  %v642_v13 = vadd.f32 %v641_v19, %v1418_v28  ;;  %v570_v0 = vpop.f32.mrb[10].mxu0  ;;  %v643_v1 = vpop.f32.mrb[10].mxu1 }
 0x236   :  { %v571_v2 = vadd.f32 %v570_v0, %v1409_v6  ;;  %v644_v3 = vadd.f32 %v643_v1, %v1412_v11  ;;  %v572_v4 = vpop.f32.mrb[11].mxu0  ;;  %v645_v20 = vpop.f32.mrb[11].mxu1 }
 0x237   :  { %v989_v27 = vpack.c.bf16 %v569_v63, %v567_v60  ;;  %v990_v7 = vpack.c.bf16 %v642_v13, %v640_v61  ;;  %v573_v9 = vadd.f32 %v572_v4, %v1415_v14  ;;  %v646_v10 = vadd.f32 %v645_v20, %v1418_v28 }
 0x239   :  { %887 = vst [vmem:[%s1533_s5 + $0x60] sm:$0xff] %v989_v27  ;;  %888 = vst [vmem:[%s1533_s5 + $0x68] sm:$0xff] %v990_v7  ;;  %v992_v15 = vpack.c.bf16 %v573_v9, %v571_v2  ;;  %v993_v16 = vpack.c.bf16 %v646_v10, %v644_v3 }
 0x23b   :  { %890 = vst [vmem:[%s1533_s5 + $0x78] sm:$0xff] %v992_v15  ;;  %891 = vst [vmem:[%s1533_s5 + $0x80] sm:$0xff] %v993_v16  ;;  %v576_v17 = vpop.f32.mrb[12].mxu0  ;;  %v649_v18 = vpop.f32.mrb[12].mxu1 }
 0x23c   :  { %v577_v21 = vadd.f32 %v576_v17, %v1409_v6  ;;  %v650_v35 = vadd.f32 %v649_v18, %v1412_v11  ;;  %v578_v36 = vpop.f32.mrb[13].mxu0  ;;  %v651_v22 = vpop.f32.mrb[13].mxu1 }
 0x23d   :  { %v579_v24 = vadd.f32 %v578_v36, %v1415_v14  ;;  %v652_v25 = vadd.f32 %v651_v22, %v1418_v28  ;;  %v580_v26 = vpop.f32.mrb[14].mxu0  ;;  %v653_v29 = vpop.f32.mrb[14].mxu1 }
 0x23e   :  { %v581_v31 = vadd.f32 %v580_v26, %v1409_v6  ;;  %v654_v32 = vadd.f32 %v653_v29, %v1412_v11  ;;  %v582_v33 = vpop.f32.mrb[15].mxu0  ;;  %v655_v34 = vpop.f32.mrb[15].mxu1  ;;  %v265_v11 = vrot.slane %v1404_v8, %v264_v30 }
 0x23f   :  { %v995_v37 = vpack.c.bf16 %v579_v24, %v577_v21  ;;  %v996_v38 = vpack.c.bf16 %v652_v25, %v650_v35  ;;  %v583_v39 = vadd.f32 %v582_v33, %v1415_v14  ;;  %v656_v40 = vadd.f32 %v655_v34, %v1418_v28 }
 0x241   :  { %893 = vst [vmem:[%s1533_s5 + $0x90] sm:$0xff] %v995_v37  ;;  %894 = vst [vmem:[%s1533_s5 + $0x98] sm:$0xff] %v996_v38  ;;  %v998_v5 = vpack.c.bf16 %v583_v39, %v581_v31  ;;  %v999_v6 = vpack.c.bf16 %v656_v40, %v654_v32 }
 0x243   :  { %896 = vst [vmem:[%s1533_s5 + $0xa8] sm:$0xff] %v998_v5  ;;  %897 = vst [vmem:[%s1533_s5 + $0xb0] sm:$0xff] %v999_v6  ;;  %v692_v14 = vpop.f32.mrb[16].mxu0  ;;  %v712_v28 = vpop.f32.mrb[16].mxu1 }
 0x244   :  { %v693_v42 = vadd.f32 %v692_v14, %v261_v41  ;;  %v713_v43 = vadd.f32 %v712_v28, %v261_v41  ;;  %v694_v44 = vpop.f32.mrb[17].mxu0  ;;  %v714_v45 = vpop.f32.mrb[17].mxu1 }
 0x245   :  { %v695_v46 = vadd.f32 %v694_v44, %v265_v11  ;;  %v715_v47 = vadd.f32 %v714_v45, %v265_v11  ;;  %v696_v48 = vpop.f32.mrb[18].mxu0  ;;  %v716_v49 = vpop.f32.mrb[18].mxu1 }
 0x246   :  { %v697_v50 = vadd.f32 %v696_v48, %v261_v41  ;;  %v717_v8 = vadd.f32 %v716_v49, %v261_v41  ;;  %v698_v51 = vpop.f32.mrb[19].mxu0  ;;  %v718_v52 = vpop.f32.mrb[19].mxu1 }
 0x247   :  { %v979_v12 = vpack.c.bf16 %v695_v46, %v693_v42  ;;  %v991_v53 = vpack.c.bf16 %v715_v47, %v713_v43  ;;  %v699_v54 = vadd.f32 %v698_v51, %v265_v11  ;;  %v719_v55 = vadd.f32 %v718_v52, %v265_v11 }
 0x249   :  { %877 = vst [vmem:[%s1533_s5 + $0x10] sm:$0xff] %v979_v12  ;;  %889 = vst [vmem:[%s1533_s5 + $0x70] sm:$0xff] %v991_v53  ;;  %v982_v56 = vpack.c.bf16 %v699_v54, %v697_v50  ;;  %v994_v57 = vpack.c.bf16 %v719_v55, %v717_v8 }
 0x24b   :  { %880 = vst [vmem:[%s1533_s5 + $0x28] sm:$0xff] %v982_v56  ;;  %892 = vst [vmem:[%s1533_s5 + $0x88] sm:$0xff] %v994_v57  ;;  %v702_v58 = vpop.f32.mrb[20].mxu0  ;;  %v722_v59 = vpop.f32.mrb[20].mxu1 }
 0x24c   :  { %v703_v60 = vadd.f32 %v702_v58, %v261_v41  ;;  %v723_v61 = vadd.f32 %v722_v59, %v261_v41  ;;  %v704_v62 = vpop.f32.mrb[21].mxu0  ;;  %v724_v19 = vpop.f32.mrb[21].mxu1 }
 0x24d   :  { %v705_v63 = vadd.f32 %v704_v62, %v265_v11  ;;  %v725_v13 = vadd.f32 %v724_v19, %v265_v11  ;;  %v706_v0 = vpop.f32.mrb[22].mxu0  ;;  %v726_v1 = vpop.f32.mrb[22].mxu1 }
 0x24e   :  { %v707_v2 = vadd.f32 %v706_v0, %v261_v41  ;;  %v727_v3 = vadd.f32 %v726_v1, %v261_v41  ;;  %v708_v4 = vpop.f32.mrb[23].mxu0  ;;  %v728_v20 = vpop.f32.mrb[23].mxu1 }
 0x24f   :  { %v985_v27 = vpack.c.bf16 %v705_v63, %v703_v60  ;;  %v997_v7 = vpack.c.bf16 %v725_v13, %v723_v61  ;;  %v709_v9 = vadd.f32 %v708_v4, %v265_v11  ;;  %v729_v10 = vadd.f32 %v728_v20, %v265_v11 }
 0x251   :  { %883 = vst [vmem:[%s1533_s5 + $0x40] sm:$0xff] %v985_v27  ;;  %895 = vst [vmem:[%s1533_s5 + $0xa0] sm:$0xff] %v997_v7  ;;  %v988_v15 = vpack.c.bf16 %v709_v9, %v707_v2  ;;  %v1000_v16 = vpack.c.bf16 %v729_v10, %v727_v3 }
 0x253   :  { %886 = vst [vmem:[%s1533_s5 + $0x58] sm:$0xff] %v988_v15  ;;  %898 = vst [vmem:[%s1533_s5 + $0xb8] sm:$0xff] %v1000_v16 }

// kernel: bigru_forward.3
= control target key start
LH: loop header
LB: loop body
LE: loop exit
PB: predicated region body
PF: predicated region fallthrough
CT: control target
= control target key end

     0   :  { %v4621_v2 = vmov 0.0   ;;  %v4619_v3 = vmov 0   ;;  %vm3241_vm0 = vmmov 0   ;;  %v3242_v28 = vmov 0.0|0.0   ;;  %s4613_s0 = inlined_call_operand.vmem [shape: bf16[8,8,768], index: 0, kind: input, shape index: {}, may-alias: {0,1}]   ;;  %s4614_s1 = inlined_call_operand.vmem [shape: bf16[8,8,768], index: 1, kind: input, shape index: {}, may-alias: {0,1}]   ;;  %s4615_s2 = inlined_call_operand.vmem [shape: bf16[2,128,384], index: 2, kind: input, shape index: {}]   ;;  %s4616_s3 = inlined_call_operand.vmem [shape: f32[2,1,128], index: 3, kind: input, shape index: {}]   ;;  %s4617_s4 = inlined_call_operand.vmem [shape: f32[8,8,128], index: 4, kind: output, shape index: {0}]   ;;  %s4618_s5 = inlined_call_operand.vmem [shape: f32[8,8,128], index: 5, kind: output, shape index: {1}]  }
   0x1   :  { %v3276_v0 = vld [vmem:[%s4615_s2 + $0x4] ss:$12 sps:$4 sm:$0xff]   ;;  %v3281_v1 = vld [vmem:[%s4615_s2] ss:$12 sps:$4 sm:$0xff]   ;;  %2641 = vmatprep.subr.bf16.mxu1 %v4621_v2  ;;  %407 = vmatprep.mubr.bf16.mxu0 %v4619_v3  ;;  %v3289_v4 = vld [vmem:[%s4615_s2 + $0x1c] ss:$12 sps:$4 sm:$0xff]  }
   0x2   :  { %375 = vmatprep.subr.bf16.mxu0 %v3276_v0  ;;  %2657 = vmatprep.mubr.msk.bf16.mxu1 %vm3241_vm0, %v4621_v2  ;;  %v3297_v5 = vld [vmem:[%s4615_s2 + $0x18] ss:$12 sps:$4 sm:$0xff]   ;;  %v3303_v6 = vld [vmem:[%s4615_s2 + $0x34] ss:$12 sps:$4 sm:$0xff]   ;;  %v3309_v7 = vld [vmem:[%s4615_s2 + $0x30] ss:$12 sps:$4 sm:$0xff]  }
   0x3   :  { %376 = vmatpush1.bf16.msra.mxu0 %v3281_v1  ;;  %v3315_v8 = vld [vmem:[%s4615_s2 + $0x4c] ss:$12 sps:$4 sm:$0xff]   ;;  %v3320_v9 = vld [vmem:[%s4615_s2 + $0x8] ss:$12 sps:$4 sm:$0xff]   ;;  %v3333_v11 = vld [vmem:[%s4615_s2 + $0x64] ss:$12 sps:$4 sm:$0xff]  }
   0x4   :  { %377 = vmatprep.subr.bf16.mxu0 %v3289_v4  ;;  %v3326_v10 = vld [vmem:[%s4615_s2 + $0x48] ss:$12 sps:$4 sm:$0xff]   ;;  %2642 = vmatpush3.bf16.msra.mxu1 %v3320_v9  ;;  %v3339_v12 = vld [vmem:[%s4615_s2 + $0x20] ss:$12 sps:$4 sm:$0xff]   ;;  %v3351_v14 = vld [vmem:[%s4615_s2 + $0x38] ss:$12 sps:$4 sm:$0xff]  }
   0x5   :  { %2643 = vmatprep.subr.bf16.mxu1 %v4621_v2  ;;  %v3344_v13 = vld [vmem:[%s4615_s2 + $0x60] ss:$12 sps:$4 sm:$0xff]   ;;  %v3357_v15 = vld [vmem:[%s4615_s2 + $0x7c] ss:$12 sps:$4 sm:$0xff]   ;;  %v3364_v16 = vld [vmem:[%s4615_s2 + $0x78] ss:$12 sps:$4 sm:$0xff]  }
   0x6   :  { %4669 = vst [vmem:[#allocation5_spill] sm:$0xff] %v3357_v15  ;;  %4670 = vst [vmem:[#allocation6_spill] sm:$0xff] %v3364_v16  ;;  %v3370_v17 = vld [vmem:[%s4615_s2 + $0x50] ss:$12 sps:$4 sm:$0xff]   ;;  %v3376_v18 = vld [vmem:[%s4615_s2 + $0x94] ss:$12 sps:$4 sm:$0xff]  }
   0x7   :  { %378 = vmatpush1.bf16.msra.mxu0 %v3297_v5  ;;  %4671 = vst [vmem:[#allocation7_spill] sm:$0xff] %v3376_v18  ;;  %v3382_v19 = vld [vmem:[%s4615_s2 + $0x90] ss:$12 sps:$4 sm:$0xff]   ;;  %v3389_v20 = vld [vmem:[%s4615_s2 + $0x68] ss:$12 sps:$4 sm:$0xff]   ;;  %v3460_v32 = vld [vmem:[%s4613_s0] sm:$0xff] }
   0x8   :  { %379 = vmatprep.subr.bf16.mxu0 %v3303_v6  ;;  %2644 = vmatpush3.bf16.msra.mxu1 %v3339_v12  ;;  %4672 = vst [vmem:[#allocation8_spill] sm:$0xff] %v3382_v19  ;;  %4673 = vst [vmem:[#allocation9_spill] sm:$0xff] %v3389_v20  ;;  %v3395_v21 = vld [vmem:[%s4615_s2 + $0xac] ss:$12 sps:$4 sm:$0xff]   ;;  %v3401_v22 = vld [vmem:[%s4615_s2 + $0xa8] ss:$12 sps:$4 sm:$0xff]   ;;  %v237_v56 = vunpack.c.l.bf16 %v3460_v32  ;;  %v238_v58 = vunpack.c.h.bf16 %v3460_v32 }
   0x9   :  { %2645 = vmatprep.subr.bf16.mxu1 %v4621_v2  ;;  %4674 = vst [vmem:[#allocation10_spill] sm:$0xff] %v3395_v21  ;;  %4675 = vst [vmem:[#allocation11_spill] sm:$0xff] %v3401_v22  ;;  %v3408_v23 = vld [vmem:[%s4615_s2 + $0x80] ss:$12 sps:$4 sm:$0xff]   ;;  %v3414_v24 = vld [vmem:[%s4615_s2 + $0xc4] ss:$12 sps:$4 sm:$0xff]  }
   0xa   :  { %4676 = vst [vmem:[#allocation12_spill] sm:$0xff] %v3408_v23  ;;  %4677 = vst [vmem:[#allocation13_spill] sm:$0xff] %v3414_v24  ;;  %v3420_v25 = vld [vmem:[%s4615_s2 + $0xc0] ss:$12 sps:$4 sm:$0xff]   ;;  %v3427_v26 = vld [vmem:[%s4615_s2 + $0x98] ss:$12 sps:$4 sm:$0xff]  }
   0xb   :  { %380 = vmatpush1.bf16.msra.mxu0 %v3309_v7  ;;  %4678 = vst [vmem:[#allocation14_spill] sm:$0xff] %v3427_v26  ;;  %v3433_v27 = vld [vmem:[%s4615_s2 + $0xdc] ss:$12 sps:$4 sm:$0xff]   ;;  %v3440_v29 = vld [vmem:[%s4615_s2 + $0xd8] ss:$12 sps:$4 sm:$0xff]  }
   0xc   :  { %381 = vmatprep.subr.bf16.mxu0 %v3315_v8  ;;  %2646 = vmatpush3.bf16.msra.mxu1 %v3351_v14  ;;  %v3447_v30 = vld [vmem:[%s4615_s2 + $0xb0] ss:$12 sps:$4 sm:$0xff]   ;;  %v3453_v31 = vld [vmem:[%s4615_s2 + $0xf4] ss:$12 sps:$4 sm:$0xff]   ;;  %v3478_v35 = vld [vmem:[%s4615_s2 + $0x10c] ss:$12 sps:$4 sm:$0xff]  }
   0xd   :  { %2647 = vmatprep.subr.bf16.mxu1 %v4621_v2  ;;  %4679 = vst [vmem:[#allocation15_spill] sm:$0xff] %v3447_v30  ;;  %v3466_v33 = vld [vmem:[%s4615_s2 + $0xf0] ss:$12 sps:$4 sm:$0xff]   ;;  %v3472_v34 = vld [vmem:[%s4615_s2 + $0xc8] ss:$12 sps:$4 sm:$0xff]  }
   0xe   :  { %v3486_v36 = vld [vmem:[%s4615_s2 + $0x108] ss:$12 sps:$4 sm:$0xff]   ;;  %v3492_v37 = vld [vmem:[%s4615_s2 + $0xe0] ss:$12 sps:$4 sm:$0xff]   ;;  %v3498_v38 = vld [vmem:[%s4615_s2 + $0x124] ss:$12 sps:$4 sm:$0xff]  }
   0xf   :  { %382 = vmatpush1.bf16.msra.mxu0 %v3326_v10  ;;  %v3507_v39 = vld [vmem:[%s4615_s2 + $0x120] ss:$12 sps:$4 sm:$0xff]   ;;  %v3513_v40 = vld [vmem:[%s4615_s2 + $0xf8] ss:$12 sps:$4 sm:$0xff]   ;;  %v3519_v41 = vld [vmem:[%s4615_s2 + $0x13c] ss:$12 sps:$4 sm:$0xff]  }
  0x10   :  { %383 = vmatprep.subr.bf16.mxu0 %v3333_v11  ;;  %2648 = vmatpush3.bf16.msra.mxu1 %v3370_v17  ;;  %v3526_v42 = vld [vmem:[%s4615_s2 + $0x138] ss:$12 sps:$4 sm:$0xff]   ;;  %v3532_v43 = vld [vmem:[%s4615_s2 + $0x110] ss:$12 sps:$4 sm:$0xff]   ;;  %v3538_v44 = vld [vmem:[%s4615_s2 + $0x154] ss:$12 sps:$4 sm:$0xff]  }
  0x11   :  { %2649 = vmatprep.subr.bf16.mxu1 %v4621_v2  ;;  %v3545_v45 = vld [vmem:[%s4615_s2 + $0x150] ss:$12 sps:$4 sm:$0xff]   ;;  %v3551_v46 = vld [vmem:[%s4615_s2 + $0x128] ss:$12 sps:$4 sm:$0xff]   ;;  %v3557_v47 = vld [vmem:[%s4615_s2 + $0x16c] ss:$12 sps:$4 sm:$0xff]  }
  0x12   :  { %v3564_v48 = vld [vmem:[%s4615_s2 + $0x168] ss:$12 sps:$4 sm:$0xff]   ;;  %v3570_v49 = vld [vmem:[%s4615_s2 + $0x140] ss:$12 sps:$4 sm:$0xff]   ;;  %v3579_v50 = vld [vmem:[%s4615_s2 + $0x158] ss:$12 sps:$4 sm:$0xff]  }
  0x13   :  { %384 = vmatpush1.bf16.msra.mxu0 %v3344_v13  ;;  %v3588_v51 = vld [vmem:[%s4615_s2 + $0x170] ss:$12 sps:$4 sm:$0xff]   ;;  %v2344_v52 = vld [vmem:[%s4613_s0 + $0x8] sm:$0xf]  ;;  %v2359_v53 = vld [vmem:[%s4614_s1 + $0xb4] sm:$0xff] }
  0x14   :  { %385 = vmatprep.subr.bf16.mxu0 %v3357_v15  ;;  %2650 = vmatpush3.bf16.msra.mxu1 %v3389_v20  ;;  %53 = vst [vmem:[#allocation3 + $0x8] sm:$0xf] %v2344_v52  ;;  %v2367_v54 = vld [vmem:[%s4614_s1 + $0xbc] sm:$0xf]  ;;  %v3648_v32 = vld [vmem:[%s4616_s3] ss:$0 sm:$0xff] }
  0x15   :  { %2651 = vmatprep.subr.bf16.mxu1 %v4621_v2  ;;  %131 = vst [vmem:[#allocation4 + $0x5c] sm:$0xf] %v2367_v54  ;;  %v3641_v55 = vld [vmem:[%s4613_s0 + $0x18] sm:$0xff]  ;;  %4681 = vst [vmem:[#allocation17_spill] sm:$0xff] %v3648_v32 }
  0x16   :  { %4680 = vst [vmem:[#allocation16_spill] sm:$0xff] %v3641_v55 }
  0x17   :  { %386 = vmatpush1.bf16.msra.mxu0 %v3364_v16 }
  0x18   :  { %387 = vmatprep.subr.bf16.mxu0 %v3376_v18  ;;  %2652 = vmatpush3.bf16.msra.mxu1 %v3408_v23 }
  0x19   :  { %2653 = vmatprep.subr.bf16.mxu1 %v4621_v2 }
  0x1b   :  { %388 = vmatpush1.bf16.msra.mxu0 %v3382_v19 }
  0x1c   :  { %389 = vmatprep.subr.bf16.mxu0 %v3395_v21  ;;  %2654 = vmatpush3.bf16.msra.mxu1 %v3427_v26 }
  0x1d   :  { %2655 = vmatprep.subr.bf16.mxu1 %v4621_v2 }
  0x1f   :  { %390 = vmatpush1.bf16.msra.mxu0 %v3401_v22 }
  0x20   :  { %585 = vmatprep.subr.bf16.mxu0 %v3414_v24  ;;  %2656 = vmatpush3.bf16.msra.mxu1 %v3447_v30 }
  0x21   :  { %2661 = vmatprep.subr.bf16.mxu1 %v4621_v2 }
  0x22   :  { %408 = vmatmul.mubr.bf16.vlgmr.msra.gmra.mrb[0].mxu0 %v3242_v28 }
  0x23   :  { %586 = vmatpush1.bf16.msra.mxu0 %v3420_v25  ;;  %617 = vmatprep.mubr.bf16.mxu0 %v4619_v3 }
  0x24   :  { %587 = vmatprep.subr.bf16.mxu0 %v3433_v27  ;;  %2658 = vmatmul.mubr.bf16.vlgmr.msra.gmra.mrb[0].mxu1 %v3242_v28 }
  0x25   :  { %2662 = vmatpush3.bf16.msra.mxu1 %v3472_v34  ;;  %2677 = vmatprep.mubr.msk.bf16.mxu1 %vm3241_vm0, %v4621_v2 }
  0x26   :  { %2663 = vmatprep.subr.bf16.mxu1 %v4621_v2 }
  0x27   :  { %588 = vmatpush1.bf16.msra.mxu0 %v3440_v29 }
  0x28   :  { %589 = vmatprep.subr.bf16.mxu0 %v3453_v31 }
  0x29   :  { %2664 = vmatpush3.bf16.msra.mxu1 %v3492_v37 }
  0x2a   :  { %2665 = vmatprep.subr.bf16.mxu1 %v4621_v2 }
  0x2b   :  { %590 = vmatpush1.bf16.msra.mxu0 %v3466_v33 }
  0x2c   :  { %591 = vmatprep.subr.bf16.mxu0 %v3478_v35 }
  0x2d   :  { %2666 = vmatpush3.bf16.msra.mxu1 %v3513_v40 }
  0x2e   :  { %2667 = vmatprep.subr.bf16.mxu1 %v4621_v2 }
  0x2f   :  { %592 = vmatpush1.bf16.msra.mxu0 %v3486_v36 }
  0x30   :  { %593 = vmatprep.subr.bf16.mxu0 %v3498_v38 }
  0x31   :  { %2668 = vmatpush3.bf16.msra.mxu1 %v3532_v43 }
  0x32   :  { %2669 = vmatprep.subr.bf16.mxu1 %v4621_v2 }
  0x33   :  { %594 = vmatpush1.bf16.msra.mxu0 %v3507_v39 }
  0x34   :  { %595 = vmatprep.subr.bf16.mxu0 %v3519_v41 }
  0x35   :  { %2670 = vmatpush3.bf16.msra.mxu1 %v3551_v46 }
  0x36   :  { %2671 = vmatprep.subr.bf16.mxu1 %v4621_v2 }
  0x37   :  { %596 = vmatpush1.bf16.msra.mxu0 %v3526_v42 }
  0x38   :  { %597 = vmatprep.subr.bf16.mxu0 %v3538_v44 }
  0x39   :  { %2672 = vmatpush3.bf16.msra.mxu1 %v3570_v49 }
  0x3a   :  { %2673 = vmatprep.subr.bf16.mxu1 %v4621_v2 }
  0x3b   :  { %598 = vmatpush1.bf16.msra.mxu0 %v3545_v45 }
  0x3c   :  { %599 = vmatprep.subr.bf16.mxu0 %v3557_v47 }
  0x3d   :  { %2674 = vmatpush3.bf16.msra.mxu1 %v3579_v50 }
  0x3e   :  { %2675 = vmatprep.subr.bf16.mxu1 %v4621_v2 }
  0x3f   :  { %600 = vmatpush1.bf16.msra.mxu0 %v3564_v48 }
  0x40   :  { %738 = vmatprep.subr.bf16.mxu0 %v3276_v0 }
  0x41   :  { %2676 = vmatpush3.bf16.msra.mxu1 %v3588_v51 }
  0x42   :  { %618 = vmatmul.mubr.bf16.vlgmr.msra.gmra.mrb[4].mxu0 %v3242_v28  ;;  %2681 = vmatprep.subr.bf16.mxu1 %v4621_v2 }
  0x43   :  { %739 = vmatpush1.bf16.msra.mxu0 %v3281_v1  ;;  %770 = vmatprep.mubr.bf16.mxu0 %v4619_v3 }
  0x44   :  { %740 = vmatprep.subr.bf16.mxu0 %v3289_v4  ;;  %2678 = vmatmul.mubr.bf16.vlgmr.msra.gmra.mrb[4].mxu1 %v3242_v28 }
  0x45   :  { %2682 = vmatpush3.bf16.msra.mxu1 %v3320_v9  ;;  %2697 = vmatprep.mubr.msk.bf16.mxu1 %vm3241_vm0, %v4621_v2 }
  0x46   :  { %2683 = vmatprep.subr.bf16.mxu1 %v4621_v2 }
  0x47   :  { %741 = vmatpush1.bf16.msra.mxu0 %v3297_v5 }
  0x48   :  { %742 = vmatprep.subr.bf16.mxu0 %v3303_v6 }
  0x49   :  { %2684 = vmatpush3.bf16.msra.mxu1 %v3339_v12 }
  0x4a   :  { %2685 = vmatprep.subr.bf16.mxu1 %v4621_v2 }
  0x4b   :  { %743 = vmatpush1.bf16.msra.mxu0 %v3309_v7 }
  0x4c   :  { %744 = vmatprep.subr.bf16.mxu0 %v3315_v8 }
  0x4d   :  { %2686 = vmatpush3.bf16.msra.mxu1 %v3351_v14 }
  0x4e   :  { %2687 = vmatprep.subr.bf16.mxu1 %v4621_v2 }
  0x4f   :  { %745 = vmatpush1.bf16.msra.mxu0 %v3326_v10 }
  0x50   :  { %746 = vmatprep.subr.bf16.mxu0 %v3333_v11 }
  0x51   :  { %2688 = vmatpush3.bf16.msra.mxu1 %v3370_v17 }
  0x52   :  { %2689 = vmatprep.subr.bf16.mxu1 %v4621_v2 }
  0x53   :  { %747 = vmatpush1.bf16.msra.mxu0 %v3344_v13 }
  0x54   :  { %748 = vmatprep.subr.bf16.mxu0 %v3357_v15 }
  0x55   :  { %2690 = vmatpush3.bf16.msra.mxu1 %v3389_v20 }
  0x56   :  { %2691 = vmatprep.subr.bf16.mxu1 %v4621_v2 }
  0x57   :  { %749 = vmatpush1.bf16.msra.mxu0 %v3364_v16 }
  0x58   :  { %750 = vmatprep.subr.bf16.mxu0 %v3376_v18 }
  0x59   :  { %2692 = vmatpush3.bf16.msra.mxu1 %v3408_v23 }
  0x5a   :  { %2693 = vmatprep.subr.bf16.mxu1 %v4621_v2 }
  0x5b   :  { %751 = vmatpush1.bf16.msra.mxu0 %v3382_v19 }
  0x5c   :  { %752 = vmatprep.subr.bf16.mxu0 %v3395_v21 }
  0x5d   :  { %2694 = vmatpush3.bf16.msra.mxu1 %v3427_v26 }
  0x5e   :  { %2695 = vmatprep.subr.bf16.mxu1 %v4621_v2 }
  0x5f   :  { %753 = vmatpush1.bf16.msra.mxu0 %v3401_v22 }
  0x60   :  { %820 = vmatprep.subr.bf16.mxu0 %v3414_v24 }
  0x61   :  { %2696 = vmatpush3.bf16.msra.mxu1 %v3447_v30 }
  0x62   :  { %2701 = vmatprep.subr.bf16.mxu1 %v4621_v2 }
  0xf5   :  { %v409_v57 = vpop.f32.mrb[0].mxu0 }
  0xf6   :  { %v666_v59 = vadd.f32 %v409_v57, %v237_v56  ;;  %v411_v60 = vpop.f32.mrb[1].mxu0  ;;  %v236_v56 = vld [vmem:[#allocation3 + $0x8] sm:$0xf] }
  0xf7   :  { %v413_v61 = vpop.f32.mrb[2].mxu0  ;;  %v673_v28 = vadd.f32 %v411_v60, %v238_v58  ;;  %v450_v3 = vpop.f32.mrb[0].mxu1 }
  0xf8   :  { %v2449_v62 = vmul.f32 -1.442695, %v666_v59  ;;  %v414_v63 = vpop.f32.mrb[3].mxu0  ;;  %v2659_v54 = vpop.f32.mrb[1].mxu1  ;;  %v686_v58 = vadd.f32 %v3648_v32, %v450_v3  ;;  %v239_v59 = vunpack.c.l.bf16 %v236_v56 }
  0xf9   :  { %v2450_v52 = vmul.f32 -1.442695, %v673_v28  ;;  %v453_v2 = vpop.f32.mrb[2].mxu1 }
  0xfa   :  { %3029 = vpow2.f32 %v2449_v62  ;;  %v2660_v24 = vpop.f32.mrb[3].mxu1  ;;  %v243_v2 = vunpack.c.l.bf16 %v2359_v53 }
  0xfb   :  { %3031 = vpow2.f32 %v2450_v52  ;;  %v244_v24 = vunpack.c.h.bf16 %v2359_v53 }
 0x104   :  { %v3030_v30 = vpop.eup %3029 }
 0x105   :  { %v670_v55 = vadd.f32 1.0, %v3030_v30  ;;  %v3032_v22 = vpop.eup %3031 }
 0x106   :  { %v677_v57 = vadd.f32 1.0, %v3032_v22 }
 0x107   :  { %3033 = vrcp.f32 %v670_v55 }
 0x108   :  { %3035 = vrcp.f32 %v677_v57 }
 0x111   :  { %v3034_v60 = vpop.eup %3033 }
 0x112   :  { %v687_v61 = vmul.f32 %v3034_v60, %v686_v58  ;;  %v3036_v26 = vpop.eup %3035 }
 0x113   :  { %v690_v56 = vsub.f32 1.0, %v3036_v26 }
 0x114   :  { %v688_v62 = vadd.f32 %v687_v61, %v239_v59  ;;  %v692_v59 = vmul.f32 0.0, %v3036_v26  ;;  %v4682_v26 = vmov 0.0  }
 0x115   :  { %v619_v63 = vpop.f32.mrb[4].mxu0 }
 0x116   :  { %3037 = vtanh.f32 %v688_v62  ;;  %v694_v30 = vadd.f32 %v619_v63, %v243_v2  ;;  %v621_v55 = vpop.f32.mrb[5].mxu0  ;;  %v3669_v62 = vld [vmem:[%s4616_s3 + $0x1] ss:$0 sm:$0xff]  ;;  %v242_v63 = vld [vmem:[#allocation4 + $0x5c] sm:$0xf] }
 0x117   :  { %v701_v28 = vadd.f32 %v621_v55, %v244_v24  ;;  %v623_v52 = vpop.f32.mrb[6].mxu0  ;;  %v660_v19 = vpop.f32.mrb[4].mxu1 }
 0x118   :  { %v2452_v54 = vmul.f32 -1.442695, %v694_v30  ;;  %v624_v21 = vpop.f32.mrb[7].mxu0  ;;  %v2679_v3 = vpop.f32.mrb[5].mxu1  ;;  %v714_v55 = vadd.f32 %v3669_v62, %v660_v19 }
 0x119   :  { %v2453_v22 = vmul.f32 -1.442695, %v701_v28  ;;  %v663_v32 = vpop.f32.mrb[6].mxu1  ;;  %v245_v28 = vunpack.c.l.bf16 %v242_v63  ;;  %v4688_v63 = vld [vmem:[#allocation15_spill] sm:$0xff] }
 0x11a   :  { %3039 = vpow2.f32 %v2452_v54  ;;  %v2680_v58 = vpop.f32.mrb[7].mxu1  ;;  %v4683_v32 = vmov 0  }
 0x11b   :  { %3041 = vpow2.f32 %v2453_v22 }
 0x120   :  { %v3038_v57 = vpop.eup %3037 }
 0x121   :  { %v691_v53 = vmul.f32 %v3038_v57, %v690_v56 }
 0x123   :  { %v3651_v60 = vadd.f32 %v692_v59, %v691_v53 }
 0x124   :  { %v3040_v61 = vpop.eup %3039 }
 0x125   :  { %v698_v2 = vadd.f32 1.0, %v3040_v61  ;;  %722 = vst [vmem:[%s4617_s4] sm:$0xff] %v3651_v60  ;;  %v737_v21 = vpack.c.bf16 %v3651_v60, %v3651_v60  ;;  %v3042_v24 = vpop.eup %3041  ;;  %v4684_v61 = vld [vmem:[#allocation8_spill] sm:$0xff] }
 0x126   :  { %v705_v30 = vadd.f32 1.0, %v3042_v24  ;;  %v4687_v24 = vld [vmem:[#allocation11_spill] sm:$0xff] }
 0x127   :  { %3043 = vrcp.f32 %v698_v2  ;;  %771 = vmatmul.mubr.bf16.vlgmr.msra.gmra.mrb[8].mxu0 %v737_v21  ;;  %2698 = vmatmul.mubr.bf16.vlgmr.msra.gmra.mrb[8].mxu1 %v737_v21  ;;  %v4685_v2 = vld [vmem:[#allocation14_spill] sm:$0xff] }
 0x128   :  { %821 = vmatpush1.bf16.msra.mxu0 %v3420_v25  ;;  %2702 = vmatpush3.bf16.msra.mxu1 %v3472_v34  ;;  %3045 = vrcp.f32 %v705_v30  ;;  %v4686_v21 = vld [vmem:[#allocation10_spill] sm:$0xff]  ;;  %v4689_v30 = vld [vmem:[#allocation13_spill] sm:$0xff] }
 0x129   :  { %822 = vmatprep.subr.bf16.mxu0 %v3433_v27  ;;  %2703 = vmatprep.subr.bf16.mxu1 %v4682_v26 }
 0x12a   :  { %852 = vmatprep.mubr.bf16.mxu0 %v4683_v32  ;;  %2717 = vmatprep.mubr.msk.bf16.mxu1 %vm3241_vm0, %v4682_v26 }
 0x12c   :  { %823 = vmatpush1.bf16.msra.mxu0 %v3440_v29  ;;  %2704 = vmatpush3.bf16.msra.mxu1 %v3492_v37 }
 0x12d   :  { %824 = vmatprep.subr.bf16.mxu0 %v3453_v31  ;;  %2705 = vmatprep.subr.bf16.mxu1 %v4682_v26 }
 0x130   :  { %825 = vmatpush1.bf16.msra.mxu0 %v3466_v33  ;;  %2706 = vmatpush3.bf16.msra.mxu1 %v3513_v40 }
 0x131   :  { %v3044_v52 = vpop.eup %3043  ;;  %826 = vmatprep.subr.bf16.mxu0 %v3478_v35  ;;  %2707 = vmatprep.subr.bf16.mxu1 %v4682_v26 }
 0x132   :  { %v715_v54 = vmul.f32 %v3044_v52, %v714_v55  ;;  %v3046_v19 = vpop.eup %3045  ;;  %v2345_v55 = vld [vmem:[%s4613_s0 + $0x20] sm:$0xf]  ;;  %v2366_v52 = vld [vmem:[%s4614_s1 + $0xa4] sm:$0xf] }
 0x133   :  { %v718_v3 = vsub.f32 1.0, %v3046_v19  ;;  %v720_v58 = vmul.f32 0.0, %v3046_v19  ;;  %55 = vst [vmem:[#allocation3 + $0x14] sm:$0xf] %v2345_v55  ;;  %129 = vst [vmem:[#allocation4 + $0x50] sm:$0xf] %v2366_v52 }
 0x134   :  { %v716_v22 = vadd.f32 %v715_v54, %v245_v28  ;;  %827 = vmatpush1.bf16.msra.mxu0 %v3486_v36  ;;  %2708 = vmatpush3.bf16.msra.mxu1 %v3532_v43  ;;  %v2358_v28 = vld [vmem:[%s4614_s1 + $0x9c] sm:$0xff]  ;;  %v3755_v54 = vld [vmem:[%s4613_s0 + $0x30] sm:$0xff] }
 0x135   :  { %828 = vmatprep.subr.bf16.mxu0 %v3498_v38  ;;  %2709 = vmatprep.subr.bf16.mxu1 %v4682_v26  ;;  %4690 = vst [vmem:[#allocation18_spill] sm:$0xff] %v3755_v54 }
 0x136   :  { %3047 = vtanh.f32 %v716_v22  ;;  %v4691_v22 = vld [vmem:[#allocation16_spill] sm:$0xff] }
 0x137   :  { %v728_v19 = vunpack.c.l.bf16 %v4691_v22 }
 0x138   :  { %829 = vmatpush1.bf16.msra.mxu0 %v3507_v39  ;;  %2710 = vmatpush3.bf16.msra.mxu1 %v3551_v46 }
 0x139   :  { %830 = vmatprep.subr.bf16.mxu0 %v3519_v41  ;;  %2711 = vmatprep.subr.bf16.mxu1 %v4682_v26 }
 0x13c   :  { %831 = vmatpush1.bf16.msra.mxu0 %v3526_v42  ;;  %2712 = vmatpush3.bf16.msra.mxu1 %v3570_v49 }
 0x13d   :  { %832 = vmatprep.subr.bf16.mxu0 %v3538_v44  ;;  %2713 = vmatprep.subr.bf16.mxu1 %v4682_v26 }
 0x140   :  { %v3048_v56 = vpop.eup %3047  ;;  %833 = vmatpush1.bf16.msra.mxu0 %v3545_v45  ;;  %2714 = vmatpush3.bf16.msra.mxu1 %v3579_v50 }
 0x141   :  { %834 = vmatprep.subr.bf16.mxu0 %v3557_v47  ;;  %2715 = vmatprep.subr.bf16.mxu1 %v4682_v26  ;;  %v719_v57 = vmul.f32 %v3048_v56, %v718_v3 }
 0x143   :  { %v3696_v53 = vadd.f32 %v720_v58, %v719_v57  ;;  %v729_v57 = vunpack.c.h.bf16 %v4691_v22  ;;  %v4692_v22 = vld [vmem:[#allocation17_spill] sm:$0xff] }
 0x144   :  { %835 = vmatpush1.bf16.msra.mxu0 %v3564_v48  ;;  %2716 = vmatpush3.bf16.msra.mxu1 %v3588_v51 }
 0x145   :  { %2455 = vst [vmem:[%s4618_s5 + $0x38] sm:$0xff] %v3696_v53  ;;  %v819_v59 = vpack.c.bf16 %v3696_v53, %v3696_v53  ;;  %962 = vmatprep.subr.bf16.mxu0 %v3276_v0  ;;  %2721 = vmatprep.subr.bf16.mxu1 %v4682_v26 }
 0x147   :  { %853 = vmatmul.mubr.bf16.vlgmr.msra.gmra.mrb[12].mxu0 %v819_v59  ;;  %2718 = vmatmul.mubr.bf16.vlgmr.msra.gmra.mrb[12].mxu1 %v819_v59 }
 0x148   :  { %963 = vmatpush1.bf16.msra.mxu0 %v3281_v1  ;;  %2722 = vmatpush3.bf16.msra.mxu1 %v3320_v9 }
 0x149   :  { %964 = vmatprep.subr.bf16.mxu0 %v3289_v4  ;;  %2723 = vmatprep.subr.bf16.mxu1 %v4682_v26 }
 0x14a   :  { %994 = vmatprep.mubr.bf16.mxu0 %v4683_v32  ;;  %2737 = vmatprep.mubr.msk.bf16.mxu1 %vm3241_vm0, %v4682_v26 }
 0x14c   :  { %965 = vmatpush1.bf16.msra.mxu0 %v3297_v5  ;;  %2724 = vmatpush3.bf16.msra.mxu1 %v3339_v12 }
 0x14d   :  { %966 = vmatprep.subr.bf16.mxu0 %v3303_v6  ;;  %2725 = vmatprep.subr.bf16.mxu1 %v4682_v26 }
 0x150   :  { %967 = vmatpush1.bf16.msra.mxu0 %v3309_v7  ;;  %2726 = vmatpush3.bf16.msra.mxu1 %v3351_v14 }
 0x151   :  { %968 = vmatprep.subr.bf16.mxu0 %v3315_v8  ;;  %2727 = vmatprep.subr.bf16.mxu1 %v4682_v26 }
 0x154   :  { %969 = vmatpush1.bf16.msra.mxu0 %v3326_v10  ;;  %2728 = vmatpush3.bf16.msra.mxu1 %v3370_v17 }
 0x155   :  { %970 = vmatprep.subr.bf16.mxu0 %v3333_v11  ;;  %2729 = vmatprep.subr.bf16.mxu1 %v4682_v26 }
 0x158   :  { %971 = vmatpush1.bf16.msra.mxu0 %v3344_v13  ;;  %2730 = vmatpush3.bf16.msra.mxu1 %v3389_v20 }
 0x159   :  { %972 = vmatprep.subr.bf16.mxu0 %v3357_v15  ;;  %2731 = vmatprep.subr.bf16.mxu1 %v4682_v26 }
 0x15c   :  { %973 = vmatpush1.bf16.msra.mxu0 %v3364_v16  ;;  %2732 = vmatpush3.bf16.msra.mxu1 %v3408_v23  ;;  %v727_v16 = vld [vmem:[#allocation3 + $0x14] sm:$0xf] }
 0x15d   :  { %974 = vmatprep.subr.bf16.mxu0 %v3376_v18  ;;  %2733 = vmatprep.subr.bf16.mxu1 %v4682_v26  ;;  %v730_v20 = vunpack.c.l.bf16 %v727_v16 }
 0x160   :  { %975 = vmatpush1.bf16.msra.mxu0 %v4684_v61  ;;  %2734 = vmatpush3.bf16.msra.mxu1 %v4685_v2 }
 0x161   :  { %976 = vmatprep.subr.bf16.mxu0 %v4686_v21  ;;  %2735 = vmatprep.subr.bf16.mxu1 %v4682_v26 }
 0x164   :  { %977 = vmatpush1.bf16.msra.mxu0 %v4687_v24  ;;  %2736 = vmatpush3.bf16.msra.mxu1 %v4688_v63 }
 0x165   :  { %1044 = vmatprep.subr.bf16.mxu0 %v4689_v30  ;;  %2741 = vmatprep.subr.bf16.mxu1 %v4682_v26 }
 0x1fa   :  { %v772_v3 = vpop.f32.mrb[8].mxu0  ;;  %v813_v56 = vpop.f32.mrb[8].mxu1 }
 0x1fb   :  { %v901_v58 = vadd.f32 %v772_v3, %v728_v19  ;;  %v774_v59 = vpop.f32.mrb[9].mxu0  ;;  %v2699_v55 = vpop.f32.mrb[9].mxu1  ;;  %v915_v19 = vadd.f32 %v4692_v22, %v813_v56 }
 0x1fc   :  { %v776_v30 = vpop.f32.mrb[10].mxu0  ;;  %v816_v63 = vpop.f32.mrb[10].mxu1  ;;  %v908_v52 = vadd.f32 %v774_v59, %v729_v57 }
 0x1fd   :  { %v2456_v24 = vmul.f32 -1.442695, %v901_v58  ;;  %v777_v21 = vpop.f32.mrb[11].mxu0  ;;  %v2700_v2 = vpop.f32.mrb[11].mxu1  ;;  %v734_v63 = vunpack.c.l.bf16 %v2358_v28  ;;  %v735_v30 = vunpack.c.h.bf16 %v2358_v28 }
 0x1fe   :  { %v2457_v61 = vmul.f32 -1.442695, %v908_v52 }
 0x1ff   :  { %3049 = vpow2.f32 %v2456_v24 }
 0x200   :  { %3051 = vpow2.f32 %v2457_v61 }
 0x209   :  { %v3050_v18 = vpop.eup %3049 }
 0x20a   :  { %v905_v54 = vadd.f32 1.0, %v3050_v18  ;;  %v3052_v23 = vpop.eup %3051 }
 0x20b   :  { %v912_v15 = vadd.f32 1.0, %v3052_v23 }
 0x20c   :  { %3053 = vrcp.f32 %v905_v54 }
 0x20d   :  { %3055 = vrcp.f32 %v912_v15 }
 0x216   :  { %v3054_v3 = vpop.eup %3053 }
 0x217   :  { %v916_v55 = vmul.f32 %v3054_v3, %v915_v19  ;;  %v3056_v56 = vpop.eup %3055 }
 0x218   :  { %v919_v19 = vsub.f32 1.0, %v3056_v56 }
 0x219   :  { %v917_v21 = vadd.f32 %v916_v55, %v730_v20  ;;  %v921_v20 = vmul.f32 %v3056_v56, %v3651_v60 }
 0x21a   :  { %v854_v2 = vpop.f32.mrb[12].mxu0  ;;  %v895_v57 = vpop.f32.mrb[12].mxu1 }
 0x21b   :  { %3057 = vtanh.f32 %v917_v21  ;;  %v923_v24 = vadd.f32 %v854_v2, %v734_v63  ;;  %v856_v61 = vpop.f32.mrb[13].mxu0  ;;  %v2719_v58 = vpop.f32.mrb[13].mxu1 }
 0x21c   :  { %v930_v18 = vadd.f32 %v856_v61, %v735_v30  ;;  %v858_v54 = vpop.f32.mrb[14].mxu0  ;;  %v898_v59 = vpop.f32.mrb[14].mxu1 }
 0x21d   :  { %v2458_v52 = vmul.f32 -1.442695, %v923_v24  ;;  %v859_v23 = vpop.f32.mrb[15].mxu0  ;;  %v2720_v16 = vpop.f32.mrb[15].mxu1  ;;  %v937_v24 = vadd.f32 %v3669_v62, %v895_v57 }
 0x21e   :  { %v2459_v22 = vmul.f32 -1.442695, %v930_v18 }
 0x21f   :  { %3059 = vpow2.f32 %v2458_v52 }
 0x220   :  { %3061 = vpow2.f32 %v2459_v22  ;;  %v733_v22 = vld [vmem:[#allocation4 + $0x50] sm:$0xf] }
 0x221   :  { %v736_v2 = vunpack.c.l.bf16 %v733_v22 }
 0x225   :  { %v3058_v15 = vpop.eup %3057 }
 0x226   :  { %v920_v28 = vmul.f32 %v3058_v15, %v919_v19  ;;  %v4704_v19 = vld [vmem:[#allocation18_spill] sm:$0xff] }
 0x227   :  { %v952_v15 = vunpack.c.l.bf16 %v4704_v19 }
 0x228   :  { %v3761_v3 = vadd.f32 %v921_v20, %v920_v28 }
 0x229   :  { %v3060_v55 = vpop.eup %3059 }
 0x22a   :  { %v927_v63 = vadd.f32 1.0, %v3060_v55  ;;  %2460 = vst [vmem:[%s4617_s4 + $0x8] sm:$0xff] %v3761_v3  ;;  %v961_v30 = vpack.c.bf16 %v3761_v3, %v3761_v3  ;;  %v3062_v60 = vpop.eup %3061  ;;  %v953_v55 = vunpack.c.h.bf16 %v4704_v19 }
 0x22b   :  { %v934_v21 = vadd.f32 1.0, %v3062_v60 }
 0x22c   :  { %3063 = vrcp.f32 %v927_v63  ;;  %995 = vmatmul.mubr.bf16.vlgmr.msra.gmra.mrb[16].mxu0 %v961_v30  ;;  %2738 = vmatmul.mubr.bf16.vlgmr.msra.gmra.mrb[16].mxu1 %v961_v30 }
 0x22d   :  { %1045 = vmatpush1.bf16.msra.mxu0 %v3420_v25  ;;  %2742 = vmatpush3.bf16.msra.mxu1 %v3472_v34  ;;  %3065 = vrcp.f32 %v934_v21 }
 0x22e   :  { %1046 = vmatprep.subr.bf16.mxu0 %v3433_v27  ;;  %2743 = vmatprep.subr.bf16.mxu1 %v4682_v26 }
 0x22f   :  { %1076 = vmatprep.mubr.bf16.mxu0 %v4683_v32  ;;  %2757 = vmatprep.mubr.msk.bf16.mxu1 %vm3241_vm0, %v4682_v26 }
 0x231   :  { %1047 = vmatpush1.bf16.msra.mxu0 %v3440_v29  ;;  %2744 = vmatpush3.bf16.msra.mxu1 %v3492_v37 }
 0x232   :  { %1048 = vmatprep.subr.bf16.mxu0 %v3453_v31  ;;  %2745 = vmatprep.subr.bf16.mxu1 %v4682_v26 }
 0x235   :  { %1049 = vmatpush1.bf16.msra.mxu0 %v3466_v33  ;;  %2746 = vmatpush3.bf16.msra.mxu1 %v3513_v40 }
 0x236   :  { %v3064_v61 = vpop.eup %3063  ;;  %1050 = vmatprep.subr.bf16.mxu0 %v3478_v35  ;;  %2747 = vmatprep.subr.bf16.mxu1 %v4682_v26 }
 0x237   :  { %v938_v58 = vmul.f32 %v3064_v61, %v937_v24  ;;  %v3066_v57 = vpop.eup %3065 }
 0x238   :  { %v941_v54 = vsub.f32 1.0, %v3066_v57  ;;  %v943_v23 = vmul.f32 %v3066_v57, %v3696_v53  ;;  %v3861_v53 = vld [vmem:[%s4613_s0 + $0x48] sm:$0xff] }
 0x239   :  { %v939_v18 = vadd.f32 %v938_v58, %v736_v2  ;;  %1051 = vmatpush1.bf16.msra.mxu0 %v3486_v36  ;;  %2748 = vmatpush3.bf16.msra.mxu1 %v3532_v43 }
 0x23a   :  { %1052 = vmatprep.subr.bf16.mxu0 %v3498_v38  ;;  %2749 = vmatprep.subr.bf16.mxu1 %v4682_v26 }
 0x23b   :  { %3067 = vtanh.f32 %v939_v18 }
 0x23d   :  { %1053 = vmatpush1.bf16.msra.mxu0 %v3507_v39  ;;  %2750 = vmatpush3.bf16.msra.mxu1 %v3551_v46 }
 0x23e   :  { %1054 = vmatprep.subr.bf16.mxu0 %v3519_v41  ;;  %2751 = vmatprep.subr.bf16.mxu1 %v4682_v26 }
 0x241   :  { %1055 = vmatpush1.bf16.msra.mxu0 %v3526_v42  ;;  %2752 = vmatpush3.bf16.msra.mxu1 %v3570_v49 }
 0x242   :  { %1056 = vmatprep.subr.bf16.mxu0 %v3538_v44  ;;  %2753 = vmatprep.subr.bf16.mxu1 %v4682_v26 }
 0x245   :  { %v3068_v59 = vpop.eup %3067  ;;  %1057 = vmatpush1.bf16.msra.mxu0 %v3545_v45  ;;  %2754 = vmatpush3.bf16.msra.mxu1 %v3579_v50 }
 0x246   :  { %1058 = vmatprep.subr.bf16.mxu0 %v3557_v47  ;;  %2755 = vmatprep.subr.bf16.mxu1 %v4682_v26  ;;  %v942_v52 = vmul.f32 %v3068_v59, %v941_v54 }
 0x248   :  { %v3802_v16 = vadd.f32 %v943_v23, %v942_v52 }
 0x249   :  { %1059 = vmatpush1.bf16.msra.mxu0 %v3564_v48  ;;  %2756 = vmatpush3.bf16.msra.mxu1 %v3588_v51 }
 0x24a   :  { %2461 = vst [vmem:[%s4618_s5 + $0x30] sm:$0xff] %v3802_v16  ;;  %v1043_v56 = vpack.c.bf16 %v3802_v16, %v3802_v16  ;;  %1186 = vmatprep.subr.bf16.mxu0 %v3276_v0  ;;  %2761 = vmatprep.subr.bf16.mxu1 %v4682_v26  ;;  %v4693_v0 = vld [vmem:[#allocation9_spill] sm:$0xff] }
 0x24c   :  { %1077 = vmatmul.mubr.bf16.vlgmr.msra.gmra.mrb[20].mxu0 %v1043_v56  ;;  %2758 = vmatmul.mubr.bf16.vlgmr.msra.gmra.mrb[20].mxu1 %v1043_v56 }
 0x24d   :  { %1187 = vmatpush1.bf16.msra.mxu0 %v3281_v1  ;;  %2762 = vmatpush3.bf16.msra.mxu1 %v3320_v9  ;;  %v4694_v1 = vld [vmem:[#allocation5_spill] sm:$0xff]  ;;  %v4700_v9 = vld [vmem:[#allocation10_spill] sm:$0xff] }
 0x24e   :  { %1188 = vmatprep.subr.bf16.mxu0 %v3289_v4  ;;  %2763 = vmatprep.subr.bf16.mxu1 %v4682_v26  ;;  %v4695_v4 = vld [vmem:[#allocation6_spill] sm:$0xff] }
 0x24f   :  { %1218 = vmatprep.mubr.bf16.mxu0 %v4683_v32  ;;  %2777 = vmatprep.mubr.msk.bf16.mxu1 %vm3241_vm0, %v4682_v26 }
 0x251   :  { %1189 = vmatpush1.bf16.msra.mxu0 %v3297_v5  ;;  %2764 = vmatpush3.bf16.msra.mxu1 %v3339_v12  ;;  %v4696_v5 = vld [vmem:[#allocation12_spill] sm:$0xff]  ;;  %v4703_v12 = vld [vmem:[#allocation13_spill] sm:$0xff] }
 0x252   :  { %1190 = vmatprep.subr.bf16.mxu0 %v3303_v6  ;;  %2765 = vmatprep.subr.bf16.mxu1 %v4682_v26  ;;  %v4697_v6 = vld [vmem:[#allocation7_spill] sm:$0xff] }
 0x255   :  { %1191 = vmatpush1.bf16.msra.mxu0 %v3309_v7  ;;  %2766 = vmatpush3.bf16.msra.mxu1 %v3351_v14  ;;  %v4698_v7 = vld [vmem:[#allocation8_spill] sm:$0xff]  ;;  %v2357_v14 = vld [vmem:[%s4614_s1 + $0x84] sm:$0xff] }
 0x256   :  { %1192 = vmatprep.subr.bf16.mxu0 %v3315_v8  ;;  %2767 = vmatprep.subr.bf16.mxu1 %v4682_v26  ;;  %v4699_v8 = vld [vmem:[#allocation14_spill] sm:$0xff] }
 0x259   :  { %1193 = vmatpush1.bf16.msra.mxu0 %v3326_v10  ;;  %2768 = vmatpush3.bf16.msra.mxu1 %v3370_v17  ;;  %v4701_v10 = vld [vmem:[#allocation11_spill] sm:$0xff]  ;;  %v2365_v17 = vld [vmem:[%s4614_s1 + $0x8c] sm:$0xf] }
 0x25a   :  { %1194 = vmatprep.subr.bf16.mxu0 %v3333_v11  ;;  %2769 = vmatprep.subr.bf16.mxu1 %v4682_v26  ;;  %v4702_v11 = vld [vmem:[#allocation15_spill] sm:$0xff]  ;;  %127 = vst [vmem:[#allocation4 + $0x44] sm:$0xf] %v2365_v17 }
 0x25d   :  { %1195 = vmatpush1.bf16.msra.mxu0 %v3344_v13  ;;  %2770 = vmatpush3.bf16.msra.mxu1 %v4693_v0  ;;  %v2346_v13 = vld [vmem:[%s4613_s0 + $0x38] sm:$0xf]  ;;  %v4705_v0 = vld [vmem:[#allocation17_spill] sm:$0xff] }
 0x25e   :  { %1196 = vmatprep.subr.bf16.mxu0 %v4694_v1  ;;  %2771 = vmatprep.subr.bf16.mxu1 %v4682_v26  ;;  %57 = vst [vmem:[#allocation3 + $0x20] sm:$0xf] %v2346_v13 }
 0x261   :  { %1197 = vmatpush1.bf16.msra.mxu0 %v4695_v4  ;;  %2772 = vmatpush3.bf16.msra.mxu1 %v4696_v5 }
 0x262   :  { %1198 = vmatprep.subr.bf16.mxu0 %v4697_v6  ;;  %2773 = vmatprep.subr.bf16.mxu1 %v4682_v26  ;;  %v958_v6 = vunpack.c.l.bf16 %v2357_v14 }
 0x265   :  { %1199 = vmatpush1.bf16.msra.mxu0 %v4698_v7  ;;  %2774 = vmatpush3.bf16.msra.mxu1 %v4699_v8  ;;  %v951_v52 = vld [vmem:[#allocation3 + $0x20] sm:$0xf]  ;;  %v959_v7 = vunpack.c.h.bf16 %v2357_v14 }
 0x266   :  { %1200 = vmatprep.subr.bf16.mxu0 %v4700_v9  ;;  %2775 = vmatprep.subr.bf16.mxu1 %v4682_v26  ;;  %v954_v56 = vunpack.c.l.bf16 %v951_v52  ;;  %v4013_v52 = vld [vmem:[%s4615_s2 + $0x68] ss:$12 sps:$4 sm:$0xff]  }
 0x267   :  { %4706 = vst [vmem:[#allocation16_spill] sm:$0xff] %v4013_v52 }
 0x269   :  { %1201 = vmatpush1.bf16.msra.mxu0 %v4701_v10  ;;  %2776 = vmatpush3.bf16.msra.mxu1 %v4702_v11 }
 0x26a   :  { %1268 = vmatprep.subr.bf16.mxu0 %v4703_v12  ;;  %2781 = vmatprep.subr.bf16.mxu1 %v4682_v26 }
 0x2ff   :  { %v996_v28 = vpop.f32.mrb[16].mxu0  ;;  %v1037_v20 = vpop.f32.mrb[16].mxu1 }
 0x300   :  { %v1125_v63 = vadd.f32 %v996_v28, %v952_v15  ;;  %v998_v30 = vpop.f32.mrb[17].mxu0  ;;  %v2739_v60 = vpop.f32.mrb[17].mxu1  ;;  %v1139_v1 = vadd.f32 %v4705_v0, %v1037_v20 }
 0x301   :  { %v1000_v22 = vpop.f32.mrb[18].mxu0  ;;  %v1040_v21 = vpop.f32.mrb[18].mxu1  ;;  %v1132_v58 = vadd.f32 %v998_v30, %v953_v55 }
 0x302   :  { %v2462_v2 = vmul.f32 -1.442695, %v1125_v63  ;;  %v1001_v24 = vpop.f32.mrb[19].mxu0  ;;  %v2740_v61 = vpop.f32.mrb[19].mxu1 }
 0x303   :  { %v2463_v18 = vmul.f32 -1.442695, %v1132_v58 }
 0x304   :  { %3069 = vpow2.f32 %v2462_v2 }
 0x305   :  { %3071 = vpow2.f32 %v2463_v18  ;;  %v957_v18 = vld [vmem:[#allocation4 + $0x44] sm:$0xf] }
 0x30e   :  { %v3070_v57 = vpop.eup %3069 }
 0x30f   :  { %v1129_v54 = vadd.f32 1.0, %v3070_v57  ;;  %v3072_v59 = vpop.eup %3071 }
 0x310   :  { %v1136_v23 = vadd.f32 1.0, %v3072_v59  ;;  %v4007_v59 = vld [vmem:[%s4615_s2 + $0x60] ss:$12 sps:$4 sm:$0xff]  }
 0x311   :  { %3073 = vrcp.f32 %v1129_v54  ;;  %v4000_v54 = vld [vmem:[%s4615_s2 + $0x64] ss:$12 sps:$4 sm:$0xff]  }
 0x312   :  { %3075 = vrcp.f32 %v1136_v23  ;;  %v4019_v23 = vld [vmem:[%s4615_s2 + $0x7c] ss:$12 sps:$4 sm:$0xff]  }
 0x313   :  { %4707 = vst [vmem:[#allocation9_spill] sm:$0xff] %v4019_v23 }
 0x31b   :  { %v3074_v4 = vpop.eup %3073 }
 0x31c   :  { %v1140_v5 = vmul.f32 %v3074_v4, %v1139_v1  ;;  %v3076_v20 = vpop.eup %3075  ;;  %v4032_v1 = vld [vmem:[%s4615_s2 + $0x80] ss:$12 sps:$4 sm:$0xff]  }
 0x31d   :  { %v1143_v60 = vsub.f32 1.0, %v3076_v20  ;;  %v1145_v21 = vmul.f32 %v3076_v20, %v3761_v3  ;;  %4709 = vst [vmem:[#allocation6_spill] sm:$0xff] %v4032_v1  ;;  %v4038_v4 = vld [vmem:[%s4615_s2 + $0x94] ss:$12 sps:$4 sm:$0xff]  }
 0x31e   :  { %v1141_v8 = vadd.f32 %v1140_v5, %v954_v56  ;;  %v4026_v56 = vld [vmem:[%s4615_s2 + $0x78] ss:$12 sps:$4 sm:$0xff]   ;;  %4710 = vst [vmem:[#allocation12_spill] sm:$0xff] %v4038_v4  ;;  %v4045_v5 = vld [vmem:[%s4615_s2 + $0x90] ss:$12 sps:$4 sm:$0xff]  }
 0x31f   :  { %v1078_v9 = vpop.f32.mrb[20].mxu0  ;;  %v1119_v10 = vpop.f32.mrb[20].mxu1  ;;  %4708 = vst [vmem:[#allocation5_spill] sm:$0xff] %v4026_v56  ;;  %4711 = vst [vmem:[#allocation7_spill] sm:$0xff] %v4045_v5 }
 0x320   :  { %3077 = vtanh.f32 %v1141_v8  ;;  %v1147_v11 = vadd.f32 %v1078_v9, %v958_v6  ;;  %v1080_v12 = vpop.f32.mrb[21].mxu0  ;;  %v2759_v13 = vpop.f32.mrb[21].mxu1  ;;  %v4051_v6 = vld [vmem:[%s4615_s2 + $0x98] ss:$12 sps:$4 sm:$0xff]   ;;  %v4064_v8 = vld [vmem:[%s4615_s2 + $0xa8] ss:$12 sps:$4 sm:$0xff]  }
 0x321   :  { %v1154_v17 = vadd.f32 %v1080_v12, %v959_v7  ;;  %v1082_v19 = vpop.f32.mrb[22].mxu0  ;;  %v1122_v15 = vpop.f32.mrb[22].mxu1  ;;  %4712 = vst [vmem:[#allocation8_spill] sm:$0xff] %v4051_v6  ;;  %v4057_v7 = vld [vmem:[%s4615_s2 + $0xac] ss:$12 sps:$4 sm:$0xff]   ;;  %4714 = vst [vmem:[#allocation10_spill] sm:$0xff] %v4064_v8 }
 0x322   :  { %v2464_v28 = vmul.f32 -1.442695, %v1147_v11  ;;  %v1083_v55 = vpop.f32.mrb[23].mxu0  ;;  %v2760_v63 = vpop.f32.mrb[23].mxu1  ;;  %4713 = vst [vmem:[#allocation14_spill] sm:$0xff] %v4057_v7  ;;  %v2356_v12 = vld [vmem:[%s4614_s1 + $0x6c] sm:$0xff]  ;;  %v1176_v19 = vunpack.c.l.bf16 %v3861_v53 }
 0x323   :  { %v2465_v30 = vmul.f32 -1.442695, %v1154_v17  ;;  %v4070_v9 = vld [vmem:[%s4615_s2 + $0xb0] ss:$12 sps:$4 sm:$0xff]   ;;  %v2364_v13 = vld [vmem:[%s4614_s1 + $0x74] sm:$0xf]  ;;  %v1177_v55 = vunpack.c.h.bf16 %v3861_v53 }
 0x324   :  { %3079 = vpow2.f32 %v2464_v28  ;;  %4715 = vst [vmem:[#allocation11_spill] sm:$0xff] %v4070_v9  ;;  %v2347_v11 = vld [vmem:[%s4613_s0 + $0x50] sm:$0xf]  ;;  %125 = vst [vmem:[#allocation4 + $0x38] sm:$0xf] %v2364_v13  ;;  %v4092_v17 = vld [vmem:[%s4613_s0 + $0x60] sm:$0xff] }
 0x325   :  { %3081 = vpow2.f32 %v2465_v30  ;;  %59 = vst [vmem:[#allocation3 + $0x2c] sm:$0xf] %v2347_v11 }
 0x32a   :  { %v3078_v22 = vpop.eup %3077 }
 0x32b   :  { %v1144_v14 = vmul.f32 %v3078_v22, %v1143_v60 }
 0x32d   :  { %v3867_v2 = vadd.f32 %v1145_v21, %v1144_v14 }
 0x32e   :  { %v3080_v24 = vpop.eup %3079 }
 0x32f   :  { %v1151_v61 = vadd.f32 1.0, %v3080_v24  ;;  %2466 = vst [vmem:[%s4617_s4 + $0x10] sm:$0xff] %v3867_v2  ;;  %v1185_v58 = vpack.c.bf16 %v3867_v2, %v3867_v2  ;;  %v3082_v3 = vpop.eup %3081 }
 0x331   :  { %3083 = vrcp.f32 %v1151_v61  ;;  %1219 = vmatmul.mubr.bf16.vlgmr.msra.gmra.mrb[24].mxu0 %v1185_v58  ;;  %2778 = vmatmul.mubr.bf16.vlgmr.msra.gmra.mrb[24].mxu1 %v1185_v58 }
 0x332   :  { %1269 = vmatpush1.bf16.msra.mxu0 %v3420_v25  ;;  %2782 = vmatpush3.bf16.msra.mxu1 %v3472_v34  ;;  %v1158_v25 = vadd.f32 1.0, %v3082_v3  ;;  %v960_v34 = vunpack.c.l.bf16 %v957_v18 }
 0x333   :  { %1270 = vmatprep.subr.bf16.mxu0 %v3433_v27  ;;  %2783 = vmatprep.subr.bf16.mxu1 %v4682_v26  ;;  %v1161_v27 = vadd.f32 %v3669_v62, %v1119_v10  ;;  %v4076_v10 = vld [vmem:[%s4615_s2 + $0xc4] ss:$12 sps:$4 sm:$0xff]  }
 0x334   :  { %1300 = vmatprep.mubr.bf16.mxu0 %v4683_v32  ;;  %2797 = vmatprep.mubr.msk.bf16.mxu1 %vm3241_vm0, %v4682_v26  ;;  %3085 = vrcp.f32 %v1158_v25  ;;  %4716 = vst [vmem:[#allocation15_spill] sm:$0xff] %v4076_v10 }
 0x336   :  { %1271 = vmatpush1.bf16.msra.mxu0 %v3440_v29  ;;  %2784 = vmatpush3.bf16.msra.mxu1 %v3492_v37 }
 0x337   :  { %1272 = vmatprep.subr.bf16.mxu0 %v3453_v31  ;;  %2785 = vmatprep.subr.bf16.mxu1 %v4682_v26 }
 0x33a   :  { %1273 = vmatpush1.bf16.msra.mxu0 %v3466_v33  ;;  %2786 = vmatpush3.bf16.msra.mxu1 %v3513_v40 }
 0x33b   :  { %v3084_v57 = vpop.eup %3083  ;;  %1274 = vmatprep.subr.bf16.mxu0 %v3478_v35  ;;  %2787 = vmatprep.subr.bf16.mxu1 %v4682_v26 }
 0x33c   :  { %v1162_v29 = vmul.f32 %v3084_v57, %v1161_v27 }
 0x33e   :  { %v1163_v37 = vadd.f32 %v1162_v29, %v960_v34  ;;  %1275 = vmatpush1.bf16.msra.mxu0 %v3486_v36  ;;  %2788 = vmatpush3.bf16.msra.mxu1 %v3532_v43  ;;  %v3086_v31 = vpop.eup %3085  ;;  %v3934_v43 = vld [vmem:[%s4615_s2 + $0x8] ss:$12 sps:$4 sm:$0xff]   ;;  %v1175_v34 = vld [vmem:[#allocation3 + $0x2c] sm:$0xf] }
 0x33f   :  { %1276 = vmatprep.subr.bf16.mxu0 %v3498_v38  ;;  %2789 = vmatprep.subr.bf16.mxu1 %v4682_v26  ;;  %v1165_v33 = vsub.f32 1.0, %v3086_v31  ;;  %v1167_v38 = vmul.f32 %v3086_v31, %v3802_v16  ;;  %v3994_v16 = vld [vmem:[%s4615_s2 + $0x50] ss:$12 sps:$4 sm:$0xff]   ;;  %v1178_v57 = vunpack.c.l.bf16 %v1175_v34  ;;  %v1182_v31 = vunpack.c.l.bf16 %v2356_v12  ;;  %v4131_v34 = vld [vmem:[%s4615_s2 + $0xd8] ss:$12 sps:$4 sm:$0xff]  }
 0x340   :  { %3087 = vtanh.f32 %v1163_v37 }
 0x342   :  { %1277 = vmatpush1.bf16.msra.mxu0 %v3507_v39  ;;  %2790 = vmatpush3.bf16.msra.mxu1 %v3551_v46  ;;  %v3956_v46 = vld [vmem:[%s4615_s2 + $0x20] ss:$12 sps:$4 sm:$0xff]  }
 0x343   :  { %1278 = vmatprep.subr.bf16.mxu0 %v3519_v41  ;;  %2791 = vmatprep.subr.bf16.mxu1 %v4682_v26  ;;  %v3921_v41 = vld [vmem:[%s4615_s2 + $0x4] ss:$12 sps:$4 sm:$0xff]  }
 0x346   :  { %1279 = vmatpush1.bf16.msra.mxu0 %v3526_v42  ;;  %2792 = vmatpush3.bf16.msra.mxu1 %v3570_v49  ;;  %v3928_v42 = vld [vmem:[%s4615_s2] ss:$12 sps:$4 sm:$0xff]   ;;  %v3975_v49 = vld [vmem:[%s4615_s2 + $0x38] ss:$12 sps:$4 sm:$0xff]  }
 0x347   :  { %1280 = vmatprep.subr.bf16.mxu0 %v3538_v44  ;;  %2793 = vmatprep.subr.bf16.mxu1 %v4682_v26  ;;  %v3940_v44 = vld [vmem:[%s4615_s2 + $0x1c] ss:$12 sps:$4 sm:$0xff]  }
 0x34a   :  { %v3088_v35 = vpop.eup %3087  ;;  %1281 = vmatpush1.bf16.msra.mxu0 %v3545_v45  ;;  %2794 = vmatpush3.bf16.msra.mxu1 %v3579_v50  ;;  %v3950_v45 = vld [vmem:[%s4615_s2 + $0x18] ss:$12 sps:$4 sm:$0xff]  }
 0x34b   :  { %1282 = vmatprep.subr.bf16.mxu0 %v3557_v47  ;;  %2795 = vmatprep.subr.bf16.mxu1 %v4682_v26  ;;  %v1166_v36 = vmul.f32 %v3088_v35, %v1165_v33  ;;  %v3962_v47 = vld [vmem:[%s4615_s2 + $0x34] ss:$12 sps:$4 sm:$0xff]   ;;  %v3981_v50 = vld [vmem:[%s4615_s2 + $0x4c] ss:$12 sps:$4 sm:$0xff]   ;;  %v1183_v33 = vunpack.c.h.bf16 %v2356_v12 }
 0x34d   :  { %v3908_v39 = vadd.f32 %v1167_v38, %v1166_v36 }
 0x34e   :  { %1283 = vmatpush1.bf16.msra.mxu0 %v3564_v48  ;;  %2796 = vmatpush3.bf16.msra.mxu1 %v3588_v51  ;;  %v3969_v48 = vld [vmem:[%s4615_s2 + $0x30] ss:$12 sps:$4 sm:$0xff]   ;;  %v3988_v51 = vld [vmem:[%s4615_s2 + $0x48] ss:$12 sps:$4 sm:$0xff]  }
 0x34f   :  { %2467 = vst [vmem:[%s4618_s5 + $0x28] sm:$0xff] %v3908_v39  ;;  %v1267_v40 = vpack.c.bf16 %v3908_v39, %v3908_v39  ;;  %1410 = vmatprep.subr.bf16.mxu0 %v3921_v41  ;;  %2801 = vmatprep.subr.bf16.mxu1 %v4682_v26 }
 0x351   :  { %1301 = vmatmul.mubr.bf16.vlgmr.msra.gmra.mrb[28].mxu0 %v1267_v40  ;;  %2798 = vmatmul.mubr.bf16.vlgmr.msra.gmra.mrb[28].mxu1 %v1267_v40 }
 0x352   :  { %1411 = vmatpush1.bf16.msra.mxu0 %v3928_v42  ;;  %2802 = vmatpush3.bf16.msra.mxu1 %v3934_v43 }
 0x353   :  { %1412 = vmatprep.subr.bf16.mxu0 %v3940_v44  ;;  %2803 = vmatprep.subr.bf16.mxu1 %v4682_v26 }
 0x354   :  { %1442 = vmatprep.mubr.bf16.mxu0 %v4683_v32  ;;  %2817 = vmatprep.mubr.msk.bf16.mxu1 %vm3241_vm0, %v4682_v26 }
 0x356   :  { %1413 = vmatpush1.bf16.msra.mxu0 %v3950_v45  ;;  %2804 = vmatpush3.bf16.msra.mxu1 %v3956_v46 }
 0x357   :  { %1414 = vmatprep.subr.bf16.mxu0 %v3962_v47  ;;  %2805 = vmatprep.subr.bf16.mxu1 %v4682_v26 }
 0x35a   :  { %1415 = vmatpush1.bf16.msra.mxu0 %v3969_v48  ;;  %2806 = vmatpush3.bf16.msra.mxu1 %v3975_v49 }
 0x35b   :  { %1416 = vmatprep.subr.bf16.mxu0 %v3981_v50  ;;  %2807 = vmatprep.subr.bf16.mxu1 %v4682_v26 }
 0x35e   :  { %1417 = vmatpush1.bf16.msra.mxu0 %v3988_v51  ;;  %2808 = vmatpush3.bf16.msra.mxu1 %v3994_v16 }
 0x35f   :  { %1418 = vmatprep.subr.bf16.mxu0 %v4000_v54  ;;  %2809 = vmatprep.subr.bf16.mxu1 %v4682_v26 }
 0x362   :  { %1419 = vmatpush1.bf16.msra.mxu0 %v4007_v59  ;;  %2810 = vmatpush3.bf16.msra.mxu1 %v4013_v52 }
 0x363   :  { %1420 = vmatprep.subr.bf16.mxu0 %v4019_v23  ;;  %2811 = vmatprep.subr.bf16.mxu1 %v4682_v26 }
 0x366   :  { %1421 = vmatpush1.bf16.msra.mxu0 %v4026_v56  ;;  %2812 = vmatpush3.bf16.msra.mxu1 %v4032_v1 }
 0x367   :  { %1422 = vmatprep.subr.bf16.mxu0 %v4038_v4  ;;  %2813 = vmatprep.subr.bf16.mxu1 %v4682_v26 }
 0x36a   :  { %1423 = vmatpush1.bf16.msra.mxu0 %v4045_v5  ;;  %2814 = vmatpush3.bf16.msra.mxu1 %v4051_v6 }
 0x36b   :  { %1424 = vmatprep.subr.bf16.mxu0 %v4057_v7  ;;  %2815 = vmatprep.subr.bf16.mxu1 %v4682_v26 }
 0x36e   :  { %1425 = vmatpush1.bf16.msra.mxu0 %v4064_v8  ;;  %2816 = vmatpush3.bf16.msra.mxu1 %v4070_v9 }
 0x36f   :  { %1492 = vmatprep.subr.bf16.mxu0 %v4076_v10  ;;  %2821 = vmatprep.subr.bf16.mxu1 %v4682_v26 }
 0x404   :  { %v1220_v15 = vpop.f32.mrb[24].mxu0  ;;  %v1261_v28 = vpop.f32.mrb[24].mxu1 }
 0x405   :  { %v1349_v63 = vadd.f32 %v1220_v15, %v1176_v19  ;;  %v1222_v20 = vpop.f32.mrb[25].mxu0  ;;  %v2779_v30 = vpop.f32.mrb[25].mxu1  ;;  %v1363_v53 = vadd.f32 %v4705_v0, %v1261_v28 }
 0x406   :  { %v1224_v60 = vpop.f32.mrb[26].mxu0  ;;  %v1264_v22 = vpop.f32.mrb[26].mxu1  ;;  %v1356_v61 = vadd.f32 %v1222_v20, %v1177_v55 }
 0x407   :  { %v2468_v14 = vmul.f32 -1.442695, %v1349_v63  ;;  %v1225_v21 = vpop.f32.mrb[27].mxu0  ;;  %v2780_v24 = vpop.f32.mrb[27].mxu1 }
 0x408   :  { %v2469_v58 = vmul.f32 -1.442695, %v1356_v61 }
 0x409   :  { %3089 = vpow2.f32 %v2468_v14 }
 0x40a   :  { %3091 = vpow2.f32 %v2469_v58 }
 0x413   :  { %v3090_v3 = vpop.eup %3089 }
 0x414   :  { %v1353_v18 = vadd.f32 1.0, %v3090_v3  ;;  %v3092_v25 = vpop.eup %3091  ;;  %v4109_v3 = vld [vmem:[%s4615_s2 + $0xc0] ss:$12 sps:$4 sm:$0xff]  }
 0x415   :  { %v1360_v27 = vadd.f32 1.0, %v3092_v25 }
 0x416   :  { %3093 = vrcp.f32 %v1353_v18  ;;  %v4121_v18 = vld [vmem:[%s4615_s2 + $0xdc] ss:$12 sps:$4 sm:$0xff]  }
 0x417   :  { %3095 = vrcp.f32 %v1360_v27  ;;  %v4137_v27 = vld [vmem:[%s4615_s2 + $0xe0] ss:$12 sps:$4 sm:$0xff]  }
 0x420   :  { %v3094_v29 = vpop.eup %3093 }
 0x421   :  { %v1364_v37 = vmul.f32 %v3094_v29, %v1363_v53  ;;  %v3096_v0 = vpop.eup %3095  ;;  %v4143_v53 = vld [vmem:[%s4615_s2 + $0xf4] ss:$12 sps:$4 sm:$0xff]  }
 0x422   :  { %v1367_v60 = vsub.f32 1.0, %v3096_v0  ;;  %v1369_v14 = vmul.f32 %v3096_v0, %v3867_v2  ;;  %v4115_v2 = vld [vmem:[%s4615_s2 + $0xc8] ss:$12 sps:$4 sm:$0xff]   ;;  %v4214_v0 = vld [vmem:[%s4615_s2 + $0x140] ss:$12 sps:$4 sm:$0xff]  }
 0x423   :  { %v1365_v35 = vadd.f32 %v1364_v37, %v1178_v57  ;;  %v1181_v57 = vld [vmem:[#allocation4 + $0x38] sm:$0xf] }
 0x424   :  { %v1302_v36 = vpop.f32.mrb[28].mxu0  ;;  %v1343_v38 = vpop.f32.mrb[28].mxu1  ;;  %v1184_v37 = vunpack.c.l.bf16 %v1181_v57  ;;  %v4249_v57 = vld [vmem:[%s4615_s2 + $0x168] ss:$12 sps:$4 sm:$0xff]  }
 0x425   :  { %3097 = vtanh.f32 %v1365_v35  ;;  %v1371_v40 = vadd.f32 %v1302_v36, %v1182_v31  ;;  %v1304_v11 = vpop.f32.mrb[29].mxu0  ;;  %v2799_v13 = vpop.f32.mrb[29].mxu1  ;;  %v1385_v31 = vadd.f32 %v3669_v62, %v1343_v38  ;;  %v4157_v35 = vld [vmem:[%s4615_s2 + $0xf8] ss:$12 sps:$4 sm:$0xff]  }
 0x426   :  { %v1378_v19 = vadd.f32 %v1304_v11, %v1183_v33  ;;  %v1306_v15 = vpop.f32.mrb[30].mxu0  ;;  %v1346_v55 = vpop.f32.mrb[30].mxu1  ;;  %v4151_v33 = vld [vmem:[%s4615_s2 + $0xf0] ss:$12 sps:$4 sm:$0xff]   ;;  %v4170_v11 = vld [vmem:[%s4615_s2 + $0x108] ss:$12 sps:$4 sm:$0xff]  }
 0x427   :  { %v2470_v63 = vmul.f32 -1.442695, %v1371_v40  ;;  %v1307_v20 = vpop.f32.mrb[31].mxu0  ;;  %v2800_v30 = vpop.f32.mrb[31].mxu1  ;;  %v4163_v40 = vld [vmem:[%s4615_s2 + $0x10c] ss:$12 sps:$4 sm:$0xff]  }
 0x428   :  { %v2471_v28 = vmul.f32 -1.442695, %v1378_v19  ;;  %v4176_v13 = vld [vmem:[%s4615_s2 + $0x110] ss:$12 sps:$4 sm:$0xff]   ;;  %v4189_v15 = vld [vmem:[%s4615_s2 + $0x120] ss:$12 sps:$4 sm:$0xff]  }
 0x429   :  { %3099 = vpow2.f32 %v2470_v63  ;;  %v4182_v19 = vld [vmem:[%s4615_s2 + $0x124] ss:$12 sps:$4 sm:$0xff]   ;;  %v4195_v55 = vld [vmem:[%s4615_s2 + $0x128] ss:$12 sps:$4 sm:$0xff]  }
 0x42a   :  { %3101 = vpow2.f32 %v2471_v28  ;;  %v4201_v63 = vld [vmem:[%s4615_s2 + $0x13c] ss:$12 sps:$4 sm:$0xff]   ;;  %v4208_v30 = vld [vmem:[%s4615_s2 + $0x138] ss:$12 sps:$4 sm:$0xff]   ;;  %v4220_v28 = vld [vmem:[%s4615_s2 + $0x154] ss:$12 sps:$4 sm:$0xff]  }
 0x42f   :  { %v3098_v22 = vpop.eup %3097 }
 0x430   :  { %v1368_v12 = vmul.f32 %v3098_v22, %v1367_v60 }
 0x432   :  { %v4098_v21 = vadd.f32 %v1369_v14, %v1368_v12  ;;  %v4227_v12 = vld [vmem:[%s4615_s2 + $0x150] ss:$12 sps:$4 sm:$0xff]   ;;  %v4233_v14 = vld [vmem:[%s4615_s2 + $0x158] ss:$12 sps:$4 sm:$0xff]  }
 0x433   :  { %v3100_v24 = vpop.eup %3099 }
 0x434   :  { %v1375_v61 = vadd.f32 1.0, %v3100_v24  ;;  %2472 = vst [vmem:[%s4617_s4 + $0x18] sm:$0xff] %v4098_v21  ;;  %v1409_v58 = vpack.c.bf16 %v4098_v21, %v4098_v21  ;;  %v3102_v25 = vpop.eup %3101  ;;  %v4239_v24 = vld [vmem:[%s4615_s2 + $0x16c] ss:$12 sps:$4 sm:$0xff]  }
 0x435   :  { %v1382_v29 = vadd.f32 1.0, %v3102_v25 }
 0x436   :  { %3103 = vrcp.f32 %v1375_v61  ;;  %1443 = vmatmul.mubr.bf16.vlgmr.msra.gmra.mrb[32].mxu0 %v1409_v58  ;;  %2818 = vmatmul.mubr.bf16.vlgmr.msra.gmra.mrb[32].mxu1 %v1409_v58 }
 0x437   :  { %1493 = vmatpush1.bf16.msra.mxu0 %v4109_v3  ;;  %2822 = vmatpush3.bf16.msra.mxu1 %v4115_v2  ;;  %3105 = vrcp.f32 %v1382_v29  ;;  %v4255_v29 = vld [vmem:[%s4615_s2 + $0x170] ss:$12 sps:$4 sm:$0xff]  }
 0x438   :  { %1494 = vmatprep.subr.bf16.mxu0 %v4121_v18  ;;  %2823 = vmatprep.subr.bf16.mxu1 %v4682_v26 }
 0x439   :  { %1524 = vmatprep.mubr.bf16.mxu0 %v4683_v32  ;;  %2837 = vmatprep.mubr.msk.bf16.mxu1 %vm3241_vm0, %v4682_v26 }
 0x43b   :  { %1495 = vmatpush1.bf16.msra.mxu0 %v4131_v34  ;;  %2824 = vmatpush3.bf16.msra.mxu1 %v4137_v27 }
 0x43c   :  { %1496 = vmatprep.subr.bf16.mxu0 %v4143_v53  ;;  %2825 = vmatprep.subr.bf16.mxu1 %v4682_v26 }
 0x43f   :  { %1497 = vmatpush1.bf16.msra.mxu0 %v4151_v33  ;;  %2826 = vmatpush3.bf16.msra.mxu1 %v4157_v35 }
 0x440   :  { %v3104_v36 = vpop.eup %3103  ;;  %1498 = vmatprep.subr.bf16.mxu0 %v4163_v40  ;;  %2827 = vmatprep.subr.bf16.mxu1 %v4682_v26 }
 0x441   :  { %v1386_v62 = vmul.f32 %v3104_v36, %v1385_v31  ;;  %v3106_v20 = vpop.eup %3105  ;;  %v2355_v31 = vld [vmem:[%s4614_s1 + $0x54] sm:$0xff]  ;;  %v2363_v36 = vld [vmem:[%s4614_s1 + $0x5c] sm:$0xf] }
 0x442   :  { %v1389_v60 = vsub.f32 1.0, %v3106_v20  ;;  %v1391_v58 = vmul.f32 %v3106_v20, %v3908_v39  ;;  %123 = vst [vmem:[#allocation4 + $0x2c] sm:$0xf] %v2363_v36 }
 0x443   :  { %v1387_v38 = vadd.f32 %v1386_v62, %v1184_v37  ;;  %1499 = vmatpush1.bf16.msra.mxu0 %v4170_v11  ;;  %2828 = vmatpush3.bf16.msra.mxu1 %v4176_v13  ;;  %v2348_v37 = vld [vmem:[%s4613_s0 + $0x68] sm:$0xf]  ;;  %v4313_v62 = vld [vmem:[%s4613_s0 + $0x78] sm:$0xff] }
 0x444   :  { %1500 = vmatprep.subr.bf16.mxu0 %v4182_v19  ;;  %2829 = vmatprep.subr.bf16.mxu1 %v4682_v26  ;;  %61 = vst [vmem:[#allocation3 + $0x38] sm:$0xf] %v2348_v37  ;;  %4717 = vst [vmem:[#allocation13_spill] sm:$0xff] %v4313_v62 }
 0x445   :  { %3107 = vtanh.f32 %v1387_v38  ;;  %v1400_v38 = vunpack.c.l.bf16 %v4092_v17 }
 0x447   :  { %1501 = vmatpush1.bf16.msra.mxu0 %v4189_v15  ;;  %2830 = vmatpush3.bf16.msra.mxu1 %v4195_v55 }
 0x448   :  { %1502 = vmatprep.subr.bf16.mxu0 %v4201_v63  ;;  %2831 = vmatprep.subr.bf16.mxu1 %v4682_v26 }
 0x44b   :  { %1503 = vmatpush1.bf16.msra.mxu0 %v4208_v30  ;;  %2832 = vmatpush3.bf16.msra.mxu1 %v4214_v0 }
 0x44c   :  { %1504 = vmatprep.subr.bf16.mxu0 %v4220_v28  ;;  %2833 = vmatprep.subr.bf16.mxu1 %v4682_v26 }
 0x44f   :  { %v3108_v22 = vpop.eup %3107  ;;  %1505 = vmatpush1.bf16.msra.mxu0 %v4227_v12  ;;  %2834 = vmatpush3.bf16.msra.mxu1 %v4233_v14 }
 0x450   :  { %1506 = vmatprep.subr.bf16.mxu0 %v4239_v24  ;;  %2835 = vmatprep.subr.bf16.mxu1 %v4682_v26  ;;  %v1390_v61 = vmul.f32 %v3108_v22, %v1389_v60  ;;  %v1401_v22 = vunpack.c.h.bf16 %v4092_v17  ;;  %v4320_v17 = vld [vmem:[%s4616_s3] ss:$0 sm:$0xff] }
 0x451   :  { %4718 = vst [vmem:[#allocation18_spill] sm:$0xff] %v4320_v17 }
 0x452   :  { %v4244_v25 = vadd.f32 %v1391_v58, %v1390_v61 }
 0x453   :  { %1507 = vmatpush1.bf16.msra.mxu0 %v4249_v57  ;;  %2836 = vmatpush3.bf16.msra.mxu1 %v4255_v29 }
 0x454   :  { %2473 = vst [vmem:[%s4618_s5 + $0x20] sm:$0xff] %v4244_v25  ;;  %v1491_v39 = vpack.c.bf16 %v4244_v25, %v4244_v25  ;;  %1634 = vmatprep.subr.bf16.mxu0 %v3921_v41  ;;  %2841 = vmatprep.subr.bf16.mxu1 %v4682_v26 }
 0x456   :  { %1525 = vmatmul.mubr.bf16.vlgmr.msra.gmra.mrb[36].mxu0 %v1491_v39  ;;  %2838 = vmatmul.mubr.bf16.vlgmr.msra.gmra.mrb[36].mxu1 %v1491_v39 }
 0x457   :  { %1635 = vmatpush1.bf16.msra.mxu0 %v3928_v42  ;;  %2842 = vmatpush3.bf16.msra.mxu1 %v3934_v43 }
 0x458   :  { %1636 = vmatprep.subr.bf16.mxu0 %v3940_v44  ;;  %2843 = vmatprep.subr.bf16.mxu1 %v4682_v26 }
 0x459   :  { %1666 = vmatprep.mubr.bf16.mxu0 %v4683_v32  ;;  %2857 = vmatprep.mubr.msk.bf16.mxu1 %vm3241_vm0, %v4682_v26 }
 0x45b   :  { %1637 = vmatpush1.bf16.msra.mxu0 %v3950_v45  ;;  %2844 = vmatpush3.bf16.msra.mxu1 %v3956_v46 }
 0x45c   :  { %1638 = vmatprep.subr.bf16.mxu0 %v3962_v47  ;;  %2845 = vmatprep.subr.bf16.mxu1 %v4682_v26 }
 0x45f   :  { %1639 = vmatpush1.bf16.msra.mxu0 %v3969_v48  ;;  %2846 = vmatpush3.bf16.msra.mxu1 %v3975_v49 }
 0x460   :  { %1640 = vmatprep.subr.bf16.mxu0 %v3981_v50  ;;  %2847 = vmatprep.subr.bf16.mxu1 %v4682_v26 }
 0x463   :  { %1641 = vmatpush1.bf16.msra.mxu0 %v3988_v51  ;;  %2848 = vmatpush3.bf16.msra.mxu1 %v3994_v16 }
 0x464   :  { %1642 = vmatprep.subr.bf16.mxu0 %v4000_v54  ;;  %2849 = vmatprep.subr.bf16.mxu1 %v4682_v26 }
 0x467   :  { %1643 = vmatpush1.bf16.msra.mxu0 %v4007_v59  ;;  %2850 = vmatpush3.bf16.msra.mxu1 %v4013_v52 }
 0x468   :  { %1644 = vmatprep.subr.bf16.mxu0 %v4019_v23  ;;  %2851 = vmatprep.subr.bf16.mxu1 %v4682_v26 }
 0x46b   :  { %1645 = vmatpush1.bf16.msra.mxu0 %v4026_v56  ;;  %2852 = vmatpush3.bf16.msra.mxu1 %v4032_v1  ;;  %v1399_v1 = vld [vmem:[#allocation3 + $0x38] sm:$0xf] }
 0x46c   :  { %1646 = vmatprep.subr.bf16.mxu0 %v4038_v4  ;;  %2853 = vmatprep.subr.bf16.mxu1 %v4682_v26  ;;  %v1402_v23 = vunpack.c.l.bf16 %v1399_v1 }
 0x46f   :  { %1647 = vmatpush1.bf16.msra.mxu0 %v4045_v5  ;;  %2854 = vmatpush3.bf16.msra.mxu1 %v4051_v6 }
 0x470   :  { %1648 = vmatprep.subr.bf16.mxu0 %v4057_v7  ;;  %2855 = vmatprep.subr.bf16.mxu1 %v4682_v26 }
 0x473   :  { %1649 = vmatpush1.bf16.msra.mxu0 %v4064_v8  ;;  %2856 = vmatpush3.bf16.msra.mxu1 %v4070_v9 }
 0x474   :  { %1716 = vmatprep.subr.bf16.mxu0 %v4076_v10  ;;  %2861 = vmatprep.subr.bf16.mxu1 %v4682_v26 }
 0x509   :  { %v1444_v20 = vpop.f32.mrb[32].mxu0  ;;  %v1485_v60 = vpop.f32.mrb[32].mxu1 }
 0x50a   :  { %v1573_v61 = vadd.f32 %v1444_v20, %v1400_v38  ;;  %v1446_v58 = vpop.f32.mrb[33].mxu0  ;;  %v2819_v39 = vpop.f32.mrb[33].mxu1  ;;  %v1407_v38 = vunpack.c.h.bf16 %v2355_v31 }
 0x50b   :  { %v1448_v37 = vpop.f32.mrb[34].mxu0  ;;  %v1488_v10 = vpop.f32.mrb[34].mxu1  ;;  %v1580_v36 = vadd.f32 %v1446_v58, %v1401_v22 }
 0x50c   :  { %v2474_v9 = vmul.f32 -1.442695, %v1573_v61  ;;  %v1449_v8 = vpop.f32.mrb[35].mxu0  ;;  %v2820_v7 = vpop.f32.mrb[35].mxu1  ;;  %v1587_v10 = vadd.f32 %v4320_v17, %v1485_v60 }
 0x50d   :  { %v2475_v6 = vmul.f32 -1.442695, %v1580_v36 }
 0x50e   :  { %3109 = vpow2.f32 %v2474_v9  ;;  %v1406_v9 = vunpack.c.l.bf16 %v2355_v31 }
 0x50f   :  { %3111 = vpow2.f32 %v2475_v6 }
 0x518   :  { %v3110_v5 = vpop.eup %3109 }
 0x519   :  { %v1577_v62 = vadd.f32 1.0, %v3110_v5  ;;  %v3112_v4 = vpop.eup %3111 }
 0x51a   :  { %v1584_v56 = vadd.f32 1.0, %v3112_v4 }
 0x51b   :  { %3113 = vrcp.f32 %v1577_v62 }
 0x51c   :  { %3115 = vrcp.f32 %v1584_v56 }
 0x525   :  { %v3114_v8 = vpop.eup %3113 }
 0x526   :  { %v1588_v7 = vmul.f32 %v3114_v8, %v1587_v10  ;;  %v3116_v60 = vpop.eup %3115 }
 0x527   :  { %v1591_v10 = vsub.f32 1.0, %v3116_v60 }
 0x528   :  { %v1589_v6 = vadd.f32 %v1588_v7, %v1402_v23  ;;  %v1593_v23 = vmul.f32 %v3116_v60, %v4098_v21 }
 0x529   :  { %v1526_v20 = vpop.f32.mrb[36].mxu0  ;;  %v1567_v5 = vpop.f32.mrb[36].mxu1 }
 0x52a   :  { %3117 = vtanh.f32 %v1589_v6  ;;  %v1595_v62 = vadd.f32 %v1526_v20, %v1406_v9  ;;  %v1528_v22 = vpop.f32.mrb[37].mxu0  ;;  %v2839_v4 = vpop.f32.mrb[37].mxu1 }
 0x52b   :  { %v1602_v1 = vadd.f32 %v1528_v22, %v1407_v38  ;;  %v1530_v61 = vpop.f32.mrb[38].mxu0  ;;  %v1570_v58 = vpop.f32.mrb[38].mxu1 }
 0x52c   :  { %v2476_v39 = vmul.f32 -1.442695, %v1595_v62  ;;  %v1531_v37 = vpop.f32.mrb[39].mxu0  ;;  %v2840_v36 = vpop.f32.mrb[39].mxu1  ;;  %v4346_v62 = vld [vmem:[%s4616_s3 + $0x1] ss:$0 sm:$0xff] }
 0x52d   :  { %v2477_v17 = vmul.f32 -1.442695, %v1602_v1  ;;  %v1609_v22 = vadd.f32 %v4346_v62, %v1567_v5 }
 0x52e   :  { %3119 = vpow2.f32 %v2476_v39 }
 0x52f   :  { %3121 = vpow2.f32 %v2477_v17  ;;  %v1405_v17 = vld [vmem:[#allocation4 + $0x2c] sm:$0xf] }
 0x530   :  { %v1408_v20 = vunpack.c.l.bf16 %v1405_v17  ;;  %v4727_v17 = vld [vmem:[#allocation11_spill] sm:$0xff] }
 0x534   :  { %v3118_v56 = vpop.eup %3117 }
 0x535   :  { %v1592_v31 = vmul.f32 %v3118_v56, %v1591_v10  ;;  %v4720_v56 = vld [vmem:[#allocation5_spill] sm:$0xff] }
 0x537   :  { %v4324_v8 = vadd.f32 %v1593_v23, %v1592_v31  ;;  %v4721_v31 = vld [vmem:[#allocation6_spill] sm:$0xff]  ;;  %v4722_v23 = vld [vmem:[#allocation12_spill] sm:$0xff] }
 0x538   :  { %v3120_v7 = vpop.eup %3119 }
 0x539   :  { %v1599_v9 = vadd.f32 1.0, %v3120_v7  ;;  %2478 = vst [vmem:[%s4617_s4 + $0x20] sm:$0xff] %v4324_v8  ;;  %v1633_v38 = vpack.c.bf16 %v4324_v8, %v4324_v8  ;;  %v3122_v21 = vpop.eup %3121  ;;  %v4723_v7 = vld [vmem:[#allocation7_spill] sm:$0xff] }
 0x53a   :  { %v1606_v6 = vadd.f32 1.0, %v3122_v21  ;;  %v4726_v21 = vld [vmem:[#allocation10_spill] sm:$0xff] }
 0x53b   :  { %3123 = vrcp.f32 %v1599_v9  ;;  %1667 = vmatmul.mubr.bf16.vlgmr.msra.gmra.mrb[40].mxu0 %v1633_v38  ;;  %2858 = vmatmul.mubr.bf16.vlgmr.msra.gmra.mrb[40].mxu1 %v1633_v38  ;;  %v4724_v9 = vld [vmem:[#allocation8_spill] sm:$0xff]  ;;  %v4725_v38 = vld [vmem:[#allocation14_spill] sm:$0xff] }
 0x53c   :  { %1717 = vmatpush1.bf16.msra.mxu0 %v4109_v3  ;;  %2862 = vmatpush3.bf16.msra.mxu1 %v4115_v2  ;;  %3125 = vrcp.f32 %v1606_v6  ;;  %v4728_v6 = vld [vmem:[#allocation15_spill] sm:$0xff] }
 0x53d   :  { %1718 = vmatprep.subr.bf16.mxu0 %v4121_v18  ;;  %2863 = vmatprep.subr.bf16.mxu1 %v4682_v26 }
 0x53e   :  { %1748 = vmatprep.mubr.bf16.mxu0 %v4683_v32  ;;  %2877 = vmatprep.mubr.msk.bf16.mxu1 %vm3241_vm0, %v4682_v26 }
 0x540   :  { %1719 = vmatpush1.bf16.msra.mxu0 %v4131_v34  ;;  %2864 = vmatpush3.bf16.msra.mxu1 %v4137_v27 }
 0x541   :  { %1720 = vmatprep.subr.bf16.mxu0 %v4143_v53  ;;  %2865 = vmatprep.subr.bf16.mxu1 %v4682_v26 }
 0x544   :  { %1721 = vmatpush1.bf16.msra.mxu0 %v4151_v33  ;;  %2866 = vmatpush3.bf16.msra.mxu1 %v4157_v35 }
 0x545   :  { %v3124_v4 = vpop.eup %3123  ;;  %1722 = vmatprep.subr.bf16.mxu0 %v4163_v40  ;;  %2867 = vmatprep.subr.bf16.mxu1 %v4682_v26 }
 0x546   :  { %v1610_v1 = vmul.f32 %v3124_v4, %v1609_v22  ;;  %v3126_v5 = vpop.eup %3125  ;;  %v2354_v22 = vld [vmem:[%s4614_s1 + $0x3c] sm:$0xff]  ;;  %v2362_v4 = vld [vmem:[%s4614_s1 + $0x44] sm:$0xf] }
 0x547   :  { %v1613_v58 = vsub.f32 1.0, %v3126_v5  ;;  %v1615_v36 = vmul.f32 %v3126_v5, %v4244_v25  ;;  %v4719_v25 = vld [vmem:[#allocation9_spill] sm:$0xff]  ;;  %121 = vst [vmem:[#allocation4 + $0x20] sm:$0xf] %v2362_v4 }
 0x548   :  { %v1611_v61 = vadd.f32 %v1610_v1, %v1408_v20  ;;  %1723 = vmatpush1.bf16.msra.mxu0 %v4170_v11  ;;  %2868 = vmatpush3.bf16.msra.mxu1 %v4176_v13  ;;  %v2349_v20 = vld [vmem:[%s4613_s0 + $0x80] sm:$0xf]  ;;  %v4429_v1 = vld [vmem:[%s4613_s0 + $0x90] sm:$0xff] }
 0x549   :  { %1724 = vmatprep.subr.bf16.mxu0 %v4182_v19  ;;  %2869 = vmatprep.subr.bf16.mxu1 %v4682_v26  ;;  %63 = vst [vmem:[#allocation3 + $0x44] sm:$0xf] %v2349_v20  ;;  %4729 = vst [vmem:[#allocation17_spill] sm:$0xff] %v4429_v1 }
 0x54a   :  { %3127 = vtanh.f32 %v1611_v61  ;;  %v4730_v61 = vld [vmem:[#allocation13_spill] sm:$0xff] }
 0x54b   :  { %v1624_v5 = vunpack.c.l.bf16 %v4730_v61 }
 0x54c   :  { %1725 = vmatpush1.bf16.msra.mxu0 %v4189_v15  ;;  %2870 = vmatpush3.bf16.msra.mxu1 %v4195_v55 }
 0x54d   :  { %1726 = vmatprep.subr.bf16.mxu0 %v4201_v63  ;;  %2871 = vmatprep.subr.bf16.mxu1 %v4682_v26 }
 0x550   :  { %1727 = vmatpush1.bf16.msra.mxu0 %v4208_v30  ;;  %2872 = vmatpush3.bf16.msra.mxu1 %v4214_v0 }
 0x551   :  { %1728 = vmatprep.subr.bf16.mxu0 %v4220_v28  ;;  %2873 = vmatprep.subr.bf16.mxu1 %v4682_v26 }
 0x554   :  { %v3128_v39 = vpop.eup %3127  ;;  %1729 = vmatpush1.bf16.msra.mxu0 %v4227_v12  ;;  %2874 = vmatpush3.bf16.msra.mxu1 %v4233_v14 }
 0x555   :  { %1730 = vmatprep.subr.bf16.mxu0 %v4239_v24  ;;  %2875 = vmatprep.subr.bf16.mxu1 %v4682_v26  ;;  %v1614_v37 = vmul.f32 %v3128_v39, %v1613_v58 }
 0x557   :  { %v4370_v60 = vadd.f32 %v1615_v36, %v1614_v37  ;;  %v1625_v37 = vunpack.c.h.bf16 %v4730_v61  ;;  %v4731_v61 = vld [vmem:[#allocation18_spill] sm:$0xff] }
 0x558   :  { %1731 = vmatpush1.bf16.msra.mxu0 %v4249_v57  ;;  %2876 = vmatpush3.bf16.msra.mxu1 %v4255_v29 }
 0x559   :  { %2479 = vst [vmem:[%s4618_s5 + $0x18] sm:$0xff] %v4370_v60  ;;  %v1715_v10 = vpack.c.bf16 %v4370_v60, %v4370_v60  ;;  %1858 = vmatprep.subr.bf16.mxu0 %v3921_v41  ;;  %2881 = vmatprep.subr.bf16.mxu1 %v4682_v26 }
 0x55b   :  { %1749 = vmatmul.mubr.bf16.vlgmr.msra.gmra.mrb[44].mxu0 %v1715_v10  ;;  %2878 = vmatmul.mubr.bf16.vlgmr.msra.gmra.mrb[44].mxu1 %v1715_v10 }
 0x55c   :  { %1859 = vmatpush1.bf16.msra.mxu0 %v3928_v42  ;;  %2882 = vmatpush3.bf16.msra.mxu1 %v3934_v43 }
 0x55d   :  { %1860 = vmatprep.subr.bf16.mxu0 %v3940_v44  ;;  %2883 = vmatprep.subr.bf16.mxu1 %v4682_v26 }
 0x55e   :  { %1890 = vmatprep.mubr.bf16.mxu0 %v4683_v32  ;;  %2897 = vmatprep.mubr.msk.bf16.mxu1 %vm3241_vm0, %v4682_v26 }
 0x560   :  { %1861 = vmatpush1.bf16.msra.mxu0 %v3950_v45  ;;  %2884 = vmatpush3.bf16.msra.mxu1 %v3956_v46 }
 0x561   :  { %1862 = vmatprep.subr.bf16.mxu0 %v3962_v47  ;;  %2885 = vmatprep.subr.bf16.mxu1 %v4682_v26 }
 0x564   :  { %1863 = vmatpush1.bf16.msra.mxu0 %v3969_v48  ;;  %2886 = vmatpush3.bf16.msra.mxu1 %v3975_v49 }
 0x565   :  { %1864 = vmatprep.subr.bf16.mxu0 %v3981_v50  ;;  %2887 = vmatprep.subr.bf16.mxu1 %v4682_v26 }
 0x568   :  { %1865 = vmatpush1.bf16.msra.mxu0 %v3988_v51  ;;  %2888 = vmatpush3.bf16.msra.mxu1 %v3994_v16 }
 0x569   :  { %1866 = vmatprep.subr.bf16.mxu0 %v4000_v54  ;;  %2889 = vmatprep.subr.bf16.mxu1 %v4682_v26 }
 0x56c   :  { %1867 = vmatpush1.bf16.msra.mxu0 %v4007_v59  ;;  %2890 = vmatpush3.bf16.msra.mxu1 %v4013_v52 }
 0x56d   :  { %1868 = vmatprep.subr.bf16.mxu0 %v4719_v25  ;;  %2891 = vmatprep.subr.bf16.mxu1 %v4682_v26 }
 0x570   :  { %1869 = vmatpush1.bf16.msra.mxu0 %v4720_v56  ;;  %2892 = vmatpush3.bf16.msra.mxu1 %v4721_v31  ;;  %v1623_v56 = vld [vmem:[#allocation3 + $0x44] sm:$0xf] }
 0x571   :  { %1870 = vmatprep.subr.bf16.mxu0 %v4722_v23  ;;  %2893 = vmatprep.subr.bf16.mxu1 %v4682_v26  ;;  %v1626_v52 = vunpack.c.l.bf16 %v1623_v56 }
 0x574   :  { %1871 = vmatpush1.bf16.msra.mxu0 %v4723_v7  ;;  %2894 = vmatpush3.bf16.msra.mxu1 %v4724_v9 }
 0x575   :  { %1872 = vmatprep.subr.bf16.mxu0 %v4725_v38  ;;  %2895 = vmatprep.subr.bf16.mxu1 %v4682_v26 }
 0x578   :  { %1873 = vmatpush1.bf16.msra.mxu0 %v4726_v21  ;;  %2896 = vmatpush3.bf16.msra.mxu1 %v4727_v17 }
 0x579   :  { %1940 = vmatprep.subr.bf16.mxu0 %v4728_v6  ;;  %2901 = vmatprep.subr.bf16.mxu1 %v4682_v26 }
 0x60e   :  { %v1668_v58 = vpop.f32.mrb[40].mxu0  ;;  %v1709_v39 = vpop.f32.mrb[40].mxu1 }
 0x60f   :  { %v1797_v36 = vadd.f32 %v1668_v58, %v1624_v5  ;;  %v1670_v10 = vpop.f32.mrb[41].mxu0  ;;  %v2859_v20 = vpop.f32.mrb[41].mxu1  ;;  %v1811_v5 = vadd.f32 %v4731_v61, %v1709_v39 }
 0x610   :  { %v1672_v6 = vpop.f32.mrb[42].mxu0  ;;  %v1712_v17 = vpop.f32.mrb[42].mxu1  ;;  %v1804_v4 = vadd.f32 %v1670_v10, %v1625_v37 }
 0x611   :  { %v2480_v21 = vmul.f32 -1.442695, %v1797_v36  ;;  %v1673_v38 = vpop.f32.mrb[43].mxu0  ;;  %v2860_v9 = vpop.f32.mrb[43].mxu1  ;;  %v1630_v17 = vunpack.c.l.bf16 %v2354_v22  ;;  %v1631_v6 = vunpack.c.h.bf16 %v2354_v22 }
 0x612   :  { %v2481_v7 = vmul.f32 -1.442695, %v1804_v4 }
 0x613   :  { %3129 = vpow2.f32 %v2480_v21 }
 0x614   :  { %3131 = vpow2.f32 %v2481_v7 }
 0x61d   :  { %v3130_v23 = vpop.eup %3129 }
 0x61e   :  { %v1801_v1 = vadd.f32 1.0, %v3130_v23  ;;  %v3132_v31 = vpop.eup %3131 }
 0x61f   :  { %v1808_v25 = vadd.f32 1.0, %v3132_v31 }
 0x620   :  { %3133 = vrcp.f32 %v1801_v1 }
 0x621   :  { %3135 = vrcp.f32 %v1808_v25 }
 0x62a   :  { %v3134_v58 = vpop.eup %3133 }
 0x62b   :  { %v1812_v20 = vmul.f32 %v3134_v58, %v1811_v5  ;;  %v3136_v39 = vpop.eup %3135 }
 0x62c   :  { %v1815_v5 = vsub.f32 1.0, %v3136_v39 }
 0x62d   :  { %v1813_v38 = vadd.f32 %v1812_v20, %v1626_v52  ;;  %v1817_v52 = vmul.f32 %v3136_v39, %v4324_v8 }
 0x62e   :  { %v1750_v9 = vpop.f32.mrb[44].mxu0  ;;  %v1791_v37 = vpop.f32.mrb[44].mxu1 }
 0x62f   :  { %3137 = vtanh.f32 %v1813_v38  ;;  %v1819_v21 = vadd.f32 %v1750_v9, %v1630_v17  ;;  %v1752_v7 = vpop.f32.mrb[45].mxu0  ;;  %v2879_v36 = vpop.f32.mrb[45].mxu1 }
 0x630   :  { %v1826_v23 = vadd.f32 %v1752_v7, %v1631_v6  ;;  %v1754_v1 = vpop.f32.mrb[46].mxu0  ;;  %v1794_v10 = vpop.f32.mrb[46].mxu1 }
 0x631   :  { %v2482_v4 = vmul.f32 -1.442695, %v1819_v21  ;;  %v1755_v31 = vpop.f32.mrb[47].mxu0  ;;  %v2880_v56 = vpop.f32.mrb[47].mxu1  ;;  %v1833_v21 = vadd.f32 %v4346_v62, %v1791_v37 }
 0x632   :  { %v2483_v61 = vmul.f32 -1.442695, %v1826_v23 }
 0x633   :  { %3139 = vpow2.f32 %v2482_v4 }
 0x634   :  { %3141 = vpow2.f32 %v2483_v61  ;;  %v1629_v61 = vld [vmem:[#allocation4 + $0x20] sm:$0xf] }
 0x635   :  { %v1632_v9 = vunpack.c.l.bf16 %v1629_v61 }
 0x639   :  { %v3138_v25 = vpop.eup %3137 }
 0x63a   :  { %v1816_v22 = vmul.f32 %v3138_v25, %v1815_v5  ;;  %v4743_v5 = vld [vmem:[#allocation17_spill] sm:$0xff] }
 0x63b   :  { %v1848_v25 = vunpack.c.l.bf16 %v4743_v5 }
 0x63c   :  { %v4435_v58 = vadd.f32 %v1817_v52, %v1816_v22 }
 0x63d   :  { %v3140_v20 = vpop.eup %3139 }
 0x63e   :  { %v1823_v17 = vadd.f32 1.0, %v3140_v20  ;;  %2484 = vst [vmem:[%s4617_s4 + $0x28] sm:$0xff] %v4435_v58  ;;  %v1857_v6 = vpack.c.bf16 %v4435_v58, %v4435_v58  ;;  %v3142_v8 = vpop.eup %3141  ;;  %v1849_v20 = vunpack.c.h.bf16 %v4743_v5 }
 0x63f   :  { %v1830_v38 = vadd.f32 1.0, %v3142_v8 }
 0x640   :  { %3143 = vrcp.f32 %v1823_v17  ;;  %1891 = vmatmul.mubr.bf16.vlgmr.msra.gmra.mrb[48].mxu0 %v1857_v6  ;;  %2898 = vmatmul.mubr.bf16.vlgmr.msra.gmra.mrb[48].mxu1 %v1857_v6 }
 0x641   :  { %1941 = vmatpush1.bf16.msra.mxu0 %v4109_v3  ;;  %2902 = vmatpush3.bf16.msra.mxu1 %v4115_v2  ;;  %3145 = vrcp.f32 %v1830_v38 }
 0x642   :  { %1942 = vmatprep.subr.bf16.mxu0 %v4121_v18  ;;  %2903 = vmatprep.subr.bf16.mxu1 %v4682_v26 }
 0x643   :  { %1972 = vmatprep.mubr.bf16.mxu0 %v4683_v32  ;;  %2917 = vmatprep.mubr.msk.bf16.mxu1 %vm3241_vm0, %v4682_v26 }
 0x645   :  { %1943 = vmatpush1.bf16.msra.mxu0 %v4131_v34  ;;  %2904 = vmatpush3.bf16.msra.mxu1 %v4137_v27 }
 0x646   :  { %1944 = vmatprep.subr.bf16.mxu0 %v4143_v53  ;;  %2905 = vmatprep.subr.bf16.mxu1 %v4682_v26 }
 0x649   :  { %1945 = vmatpush1.bf16.msra.mxu0 %v4151_v33  ;;  %2906 = vmatpush3.bf16.msra.mxu1 %v4157_v35 }
 0x64a   :  { %v3144_v7 = vpop.eup %3143  ;;  %1946 = vmatprep.subr.bf16.mxu0 %v4163_v40  ;;  %2907 = vmatprep.subr.bf16.mxu1 %v4682_v26 }
 0x64b   :  { %v1834_v36 = vmul.f32 %v3144_v7, %v1833_v21  ;;  %v3146_v37 = vpop.eup %3145 }
 0x64c   :  { %v1837_v1 = vsub.f32 1.0, %v3146_v37  ;;  %v1839_v31 = vmul.f32 %v3146_v37, %v4370_v60  ;;  %v4535_v60 = vld [vmem:[%s4613_s0 + $0xa8] sm:$0xff] }
 0x64d   :  { %v1835_v23 = vadd.f32 %v1834_v36, %v1632_v9  ;;  %1947 = vmatpush1.bf16.msra.mxu0 %v4170_v11  ;;  %2908 = vmatpush3.bf16.msra.mxu1 %v4176_v13 }
 0x64e   :  { %1948 = vmatprep.subr.bf16.mxu0 %v4182_v19  ;;  %2909 = vmatprep.subr.bf16.mxu1 %v4682_v26 }
 0x64f   :  { %3147 = vtanh.f32 %v1835_v23 }
 0x651   :  { %1949 = vmatpush1.bf16.msra.mxu0 %v4189_v15  ;;  %2910 = vmatpush3.bf16.msra.mxu1 %v4195_v55 }
 0x652   :  { %1950 = vmatprep.subr.bf16.mxu0 %v4201_v63  ;;  %2911 = vmatprep.subr.bf16.mxu1 %v4682_v26 }
 0x655   :  { %1951 = vmatpush1.bf16.msra.mxu0 %v4208_v30  ;;  %2912 = vmatpush3.bf16.msra.mxu1 %v4214_v0 }
 0x656   :  { %1952 = vmatprep.subr.bf16.mxu0 %v4220_v28  ;;  %2913 = vmatprep.subr.bf16.mxu1 %v4682_v26 }
 0x659   :  { %v3148_v10 = vpop.eup %3147  ;;  %1953 = vmatpush1.bf16.msra.mxu0 %v4227_v12  ;;  %2914 = vmatpush3.bf16.msra.mxu1 %v4233_v14 }
 0x65a   :  { %1954 = vmatprep.subr.bf16.mxu0 %v4239_v24  ;;  %2915 = vmatprep.subr.bf16.mxu1 %v4682_v26  ;;  %v1838_v4 = vmul.f32 %v3148_v10, %v1837_v1 }
 0x65c   :  { %v4476_v56 = vadd.f32 %v1839_v31, %v1838_v4 }
 0x65d   :  { %1955 = vmatpush1.bf16.msra.mxu0 %v4249_v57  ;;  %2916 = vmatpush3.bf16.msra.mxu1 %v4255_v29 }
 0x65e   :  { %2485 = vst [vmem:[%s4618_s5 + $0x10] sm:$0xff] %v4476_v56  ;;  %v1939_v39 = vpack.c.bf16 %v4476_v56, %v4476_v56  ;;  %2081 = vmatprep.subr.bf16.mxu0 %v3921_v41  ;;  %2921 = vmatprep.subr.bf16.mxu1 %v4682_v26  ;;  %v4732_v41 = vld [vmem:[#allocation16_spill] sm:$0xff] }
 0x660   :  { %1973 = vmatmul.mubr.bf16.vlgmr.msra.gmra.mrb[52].mxu0 %v1939_v39  ;;  %2918 = vmatmul.mubr.bf16.vlgmr.msra.gmra.mrb[52].mxu1 %v1939_v39 }
 0x661   :  { %2082 = vmatpush1.bf16.msra.mxu0 %v3928_v42  ;;  %2922 = vmatpush3.bf16.msra.mxu1 %v3934_v43  ;;  %v4733_v42 = vld [vmem:[#allocation9_spill] sm:$0xff] }
 0x662   :  { %2083 = vmatprep.subr.bf16.mxu0 %v3940_v44  ;;  %2923 = vmatprep.subr.bf16.mxu1 %v4682_v26  ;;  %v4734_v43 = vld [vmem:[#allocation5_spill] sm:$0xff]  ;;  %v4735_v44 = vld [vmem:[#allocation6_spill] sm:$0xff] }
 0x663   :  { %2113 = vmatprep.mubr.bf16.mxu0 %v4683_v32  ;;  %2937 = vmatprep.mubr.msk.bf16.mxu1 %vm3241_vm0, %v4682_v26 }
 0x665   :  { %2084 = vmatpush1.bf16.msra.mxu0 %v3950_v45  ;;  %2924 = vmatpush3.bf16.msra.mxu1 %v3956_v46  ;;  %v4736_v45 = vld [vmem:[#allocation12_spill] sm:$0xff]  ;;  %v4737_v46 = vld [vmem:[#allocation7_spill] sm:$0xff] }
 0x666   :  { %2085 = vmatprep.subr.bf16.mxu0 %v3962_v47  ;;  %2925 = vmatprep.subr.bf16.mxu1 %v4682_v26  ;;  %v4738_v47 = vld [vmem:[#allocation8_spill] sm:$0xff] }
 0x669   :  { %2086 = vmatpush1.bf16.msra.mxu0 %v3969_v48  ;;  %2926 = vmatpush3.bf16.msra.mxu1 %v3975_v49  ;;  %v4739_v48 = vld [vmem:[#allocation14_spill] sm:$0xff] }
 0x66a   :  { %2087 = vmatprep.subr.bf16.mxu0 %v3981_v50  ;;  %2927 = vmatprep.subr.bf16.mxu1 %v4682_v26  ;;  %v4740_v49 = vld [vmem:[#allocation10_spill] sm:$0xff]  ;;  %v4741_v50 = vld [vmem:[#allocation11_spill] sm:$0xff] }
 0x66d   :  { %2088 = vmatpush1.bf16.msra.mxu0 %v3988_v51  ;;  %2928 = vmatpush3.bf16.msra.mxu1 %v3994_v16  ;;  %v4742_v51 = vld [vmem:[#allocation15_spill] sm:$0xff]  ;;  %v2350_v16 = vld [vmem:[%s4613_s0 + $0x98] sm:$0xf] }
 0x66e   :  { %2089 = vmatprep.subr.bf16.mxu0 %v4000_v54  ;;  %2929 = vmatprep.subr.bf16.mxu1 %v4682_v26  ;;  %65 = vst [vmem:[#allocation3 + $0x50] sm:$0xf] %v2350_v16  ;;  %v2353_v54 = vld [vmem:[%s4614_s1 + $0x24] sm:$0xff] }
 0x671   :  { %2090 = vmatpush1.bf16.msra.mxu0 %v4007_v59  ;;  %2930 = vmatpush3.bf16.msra.mxu1 %v4732_v41  ;;  %v2361_v59 = vld [vmem:[%s4614_s1 + $0x2c] sm:$0xf] }
 0x672   :  { %2091 = vmatprep.subr.bf16.mxu0 %v4733_v42  ;;  %2931 = vmatprep.subr.bf16.mxu1 %v4682_v26  ;;  %119 = vst [vmem:[#allocation4 + $0x14] sm:$0xf] %v2361_v59  ;;  %v4744_v41 = vld [vmem:[#allocation18_spill] sm:$0xff] }
 0x675   :  { %2092 = vmatpush1.bf16.msra.mxu0 %v4734_v43  ;;  %2932 = vmatpush3.bf16.msra.mxu1 %v4735_v44  ;;  %v1847_v4 = vld [vmem:[#allocation3 + $0x50] sm:$0xf] }
 0x676   :  { %2093 = vmatprep.subr.bf16.mxu0 %v4736_v45  ;;  %2933 = vmatprep.subr.bf16.mxu1 %v4682_v26  ;;  %v1850_v39 = vunpack.c.l.bf16 %v1847_v4  ;;  %v1854_v45 = vunpack.c.l.bf16 %v2353_v54 }
 0x679   :  { %2094 = vmatpush1.bf16.msra.mxu0 %v4737_v46  ;;  %2934 = vmatpush3.bf16.msra.mxu1 %v4738_v47  ;;  %v1855_v46 = vunpack.c.h.bf16 %v2353_v54 }
 0x67a   :  { %2095 = vmatprep.subr.bf16.mxu0 %v4739_v48  ;;  %2935 = vmatprep.subr.bf16.mxu1 %v4682_v26 }
 0x67d   :  { %2096 = vmatpush1.bf16.msra.mxu0 %v4740_v49  ;;  %2936 = vmatpush3.bf16.msra.mxu1 %v4741_v50 }
 0x67e   :  { %2163 = vmatprep.subr.bf16.mxu0 %v4742_v51  ;;  %2941 = vmatprep.subr.bf16.mxu1 %v4682_v26 }
 0x713   :  { %v1892_v22 = vpop.f32.mrb[48].mxu0  ;;  %v1933_v52 = vpop.f32.mrb[48].mxu1 }
 0x714   :  { %v2021_v17 = vadd.f32 %v1892_v22, %v1848_v25  ;;  %v1894_v6 = vpop.f32.mrb[49].mxu0  ;;  %v2899_v8 = vpop.f32.mrb[49].mxu1  ;;  %v2035_v42 = vadd.f32 %v4744_v41, %v1933_v52 }
 0x715   :  { %v1896_v61 = vpop.f32.mrb[50].mxu0  ;;  %v1936_v38 = vpop.f32.mrb[50].mxu1  ;;  %v2028_v36 = vadd.f32 %v1894_v6, %v1849_v20 }
 0x716   :  { %v2486_v9 = vmul.f32 -1.442695, %v2021_v17  ;;  %v1897_v21 = vpop.f32.mrb[51].mxu0  ;;  %v2900_v7 = vpop.f32.mrb[51].mxu1 }
 0x717   :  { %v2487_v23 = vmul.f32 -1.442695, %v2028_v36 }
 0x718   :  { %3149 = vpow2.f32 %v2486_v9 }
 0x719   :  { %3151 = vpow2.f32 %v2487_v23  ;;  %v1853_v23 = vld [vmem:[#allocation4 + $0x14] sm:$0xf] }
 0x722   :  { %v3150_v37 = vpop.eup %3149 }
 0x723   :  { %v2025_v1 = vadd.f32 1.0, %v3150_v37  ;;  %v3152_v10 = vpop.eup %3151 }
 0x724   :  { %v2032_v31 = vadd.f32 1.0, %v3152_v10 }
 0x725   :  { %3153 = vrcp.f32 %v2025_v1 }
 0x726   :  { %3155 = vrcp.f32 %v2032_v31 }
 0x72f   :  { %v3154_v43 = vpop.eup %3153 }
 0x730   :  { %v2036_v44 = vmul.f32 %v3154_v43, %v2035_v42  ;;  %v3156_v52 = vpop.eup %3155 }
 0x731   :  { %v2039_v8 = vsub.f32 1.0, %v3156_v52  ;;  %v2041_v38 = vmul.f32 %v3156_v52, %v4435_v58 }
 0x732   :  { %v2037_v47 = vadd.f32 %v2036_v44, %v1850_v39 }
 0x733   :  { %v1974_v48 = vpop.f32.mrb[52].mxu0  ;;  %v2015_v49 = vpop.f32.mrb[52].mxu1 }
 0x734   :  { %3157 = vtanh.f32 %v2037_v47  ;;  %v2043_v50 = vadd.f32 %v1974_v48, %v1854_v45  ;;  %v1976_v51 = vpop.f32.mrb[53].mxu0  ;;  %v2919_v16 = vpop.f32.mrb[53].mxu1 }
 0x735   :  { %v2050_v59 = vadd.f32 %v1976_v51, %v1855_v46  ;;  %v1978_v5 = vpop.f32.mrb[54].mxu0  ;;  %v2018_v25 = vpop.f32.mrb[54].mxu1 }
 0x736   :  { %v2488_v22 = vmul.f32 -1.442695, %v2043_v50  ;;  %v1979_v20 = vpop.f32.mrb[55].mxu0  ;;  %v2920_v17 = vpop.f32.mrb[55].mxu1 }
 0x737   :  { %v2489_v6 = vmul.f32 -1.442695, %v2050_v59 }
 0x738   :  { %3159 = vpow2.f32 %v2488_v22 }
 0x739   :  { %3161 = vpow2.f32 %v2489_v6 }
 0x73e   :  { %v3158_v61 = vpop.eup %3157 }
 0x73f   :  { %v2040_v54 = vmul.f32 %v3158_v61, %v2039_v8 }
 0x741   :  { %v4541_v9 = vadd.f32 %v2041_v38, %v2040_v54 }
 0x742   :  { %v3160_v21 = vpop.eup %3159 }
 0x743   :  { %v2047_v7 = vadd.f32 1.0, %v3160_v21  ;;  %2490 = vst [vmem:[%s4617_s4 + $0x30] sm:$0xff] %v4541_v9  ;;  %v2080_v36 = vpack.c.bf16 %v4541_v9, %v4541_v9  ;;  %v3162_v58 = vpop.eup %3161 }
 0x745   :  { %3163 = vrcp.f32 %v2047_v7  ;;  %2114 = vmatmul.mubr.bf16.vlgmr.msra.gmra.mrb[56].mxu0 %v2080_v36  ;;  %2938 = vmatmul.mubr.bf16.vlgmr.msra.gmra.mrb[56].mxu1 %v2080_v36 }
 0x746   :  { %2164 = vmatpush1.bf16.msra.mxu0 %v4109_v3  ;;  %2942 = vmatpush3.bf16.msra.mxu1 %v4115_v2  ;;  %v2054_v3 = vadd.f32 1.0, %v3162_v58  ;;  %v1856_v2 = vunpack.c.l.bf16 %v1853_v23 }
 0x747   :  { %2165 = vmatprep.subr.bf16.mxu0 %v4121_v18  ;;  %2943 = vmatprep.subr.bf16.mxu1 %v4682_v26  ;;  %v2057_v18 = vadd.f32 %v4346_v62, %v2015_v49 }
 0x748   :  { %2195 = vmatprep.mubr.bf16.mxu0 %v4683_v32  ;;  %2957 = vmatprep.mubr.msk.bf16.mxu1 %vm3241_vm0, %v4682_v26  ;;  %3165 = vrcp.f32 %v2054_v3 }
 0x74a   :  { %2166 = vmatpush1.bf16.msra.mxu0 %v4131_v34  ;;  %2944 = vmatpush3.bf16.msra.mxu1 %v4137_v27 }
 0x74b   :  { %2167 = vmatprep.subr.bf16.mxu0 %v4143_v53  ;;  %2945 = vmatprep.subr.bf16.mxu1 %v4682_v26 }
 0x74e   :  { %2168 = vmatpush1.bf16.msra.mxu0 %v4151_v33  ;;  %2946 = vmatpush3.bf16.msra.mxu1 %v4157_v35 }
 0x74f   :  { %v3164_v32 = vpop.eup %3163  ;;  %2169 = vmatprep.subr.bf16.mxu0 %v4163_v40  ;;  %2947 = vmatprep.subr.bf16.mxu1 %v4682_v26 }
 0x750   :  { %v2058_v34 = vmul.f32 %v3164_v32, %v2057_v18 }
 0x752   :  { %v2059_v27 = vadd.f32 %v2058_v34, %v1856_v2  ;;  %2170 = vmatpush1.bf16.msra.mxu0 %v4170_v11  ;;  %2948 = vmatpush3.bf16.msra.mxu1 %v4176_v13  ;;  %v3166_v53 = vpop.eup %3165 }
 0x753   :  { %2171 = vmatprep.subr.bf16.mxu0 %v4182_v19  ;;  %2949 = vmatprep.subr.bf16.mxu1 %v4682_v26  ;;  %v2061_v33 = vsub.f32 1.0, %v3166_v53  ;;  %v2063_v11 = vmul.f32 %v3166_v53, %v4476_v56 }
 0x754   :  { %3167 = vtanh.f32 %v2059_v27 }
 0x756   :  { %2172 = vmatpush1.bf16.msra.mxu0 %v4189_v15  ;;  %2950 = vmatpush3.bf16.msra.mxu1 %v4195_v55  ;;  %v2352_v15 = vld [vmem:[%s4614_s1 + $0xc] sm:$0xff]  ;;  %v2360_v55 = vld [vmem:[%s4614_s1 + $0x14] sm:$0xf] }
 0x757   :  { %2173 = vmatprep.subr.bf16.mxu0 %v4201_v63  ;;  %2951 = vmatprep.subr.bf16.mxu1 %v4682_v26  ;;  %117 = vst [vmem:[#allocation4 + $0x8] sm:$0xf] %v2360_v55  ;;  %v2072_v63 = vunpack.c.l.bf16 %v4535_v60  ;;  %v2077_v48 = vunpack.c.l.bf16 %v2352_v15  ;;  %v2078_v49 = vunpack.c.h.bf16 %v2352_v15 }
 0x75a   :  { %2174 = vmatpush1.bf16.msra.mxu0 %v4208_v30  ;;  %2952 = vmatpush3.bf16.msra.mxu1 %v4214_v0 }
 0x75b   :  { %2175 = vmatprep.subr.bf16.mxu0 %v4220_v28  ;;  %2953 = vmatprep.subr.bf16.mxu1 %v4682_v26  ;;  %v2073_v28 = vunpack.c.h.bf16 %v4535_v60 }
 0x75e   :  { %v3168_v35 = vpop.eup %3167  ;;  %2176 = vmatpush1.bf16.msra.mxu0 %v4227_v12  ;;  %2954 = vmatpush3.bf16.msra.mxu1 %v4233_v14  ;;  %v2076_v2 = vld [vmem:[#allocation4 + $0x8] sm:$0xf] }
 0x75f   :  { %2177 = vmatprep.subr.bf16.mxu0 %v4239_v24  ;;  %2955 = vmatprep.subr.bf16.mxu1 %v4682_v26  ;;  %v2062_v40 = vmul.f32 %v3168_v35, %v2061_v33  ;;  %v2351_v26 = vld [vmem:[%s4613_s0 + $0xb0] sm:$0xf]  ;;  %v2079_v32 = vunpack.c.l.bf16 %v2076_v2 }
 0x760   :  { %67 = vst [vmem:[#allocation3 + $0x5c] sm:$0xf] %v2351_v26 }
 0x761   :  { %v4582_v13 = vadd.f32 %v2063_v11, %v2062_v40 }
 0x762   :  { %2178 = vmatpush1.bf16.msra.mxu0 %v4249_v57  ;;  %2956 = vmatpush3.bf16.msra.mxu1 %v4255_v29 }
 0x763   :  { %2491 = vst [vmem:[%s4618_s5 + $0x8] sm:$0xff] %v4582_v13  ;;  %v2162_v19 = vpack.c.bf16 %v4582_v13, %v4582_v13 }
 0x765   :  { %2196 = vmatmul.mubr.bf16.vlgmr.msra.gmra.mrb[60].mxu0 %v2162_v19  ;;  %2958 = vmatmul.mubr.bf16.vlgmr.msra.gmra.mrb[60].mxu1 %v2162_v19 }
 0x767   :  { %v2071_v43 = vld [vmem:[#allocation3 + $0x5c] sm:$0xf] }
 0x768   :  { %v2074_v45 = vunpack.c.l.bf16 %v2071_v43 }
 0x818   :  { %v2115_v30 = vpop.f32.mrb[56].mxu0  ;;  %v2156_v0 = vpop.f32.mrb[56].mxu1 }
 0x819   :  { %v2244_v12 = vadd.f32 %v2115_v30, %v2072_v63  ;;  %v2117_v14 = vpop.f32.mrb[57].mxu0  ;;  %v2939_v24 = vpop.f32.mrb[57].mxu1  ;;  %v2258_v60 = vadd.f32 %v4744_v41, %v2156_v0 }
 0x81a   :  { %v2119_v57 = vpop.f32.mrb[58].mxu0  ;;  %v2159_v29 = vpop.f32.mrb[58].mxu1  ;;  %v2251_v10 = vadd.f32 %v2117_v14, %v2073_v28 }
 0x81b   :  { %v2492_v56 = vmul.f32 -1.442695, %v2244_v12  ;;  %v2120_v37 = vpop.f32.mrb[59].mxu0  ;;  %v2940_v1 = vpop.f32.mrb[59].mxu1 }
 0x81c   :  { %v2493_v4 = vmul.f32 -1.442695, %v2251_v10 }
 0x81d   :  { %3169 = vpow2.f32 %v2492_v56 }
 0x81e   :  { %3171 = vpow2.f32 %v2493_v4 }
 0x827   :  { %v3170_v31 = vpop.eup %3169 }
 0x828   :  { %v2248_v39 = vadd.f32 1.0, %v3170_v31  ;;  %v3172_v42 = vpop.eup %3171 }
 0x829   :  { %v2255_v44 = vadd.f32 1.0, %v3172_v42 }
 0x82a   :  { %3173 = vrcp.f32 %v2248_v39 }
 0x82b   :  { %3175 = vrcp.f32 %v2255_v44 }
 0x834   :  { %v3174_v46 = vpop.eup %3173 }
 0x835   :  { %v2259_v47 = vmul.f32 %v3174_v46, %v2258_v60  ;;  %v3176_v41 = vpop.eup %3175 }
 0x836   :  { %v2262_v54 = vsub.f32 1.0, %v3176_v41  ;;  %v2264_v7 = vmul.f32 %v3176_v41, %v4541_v9 }
 0x837   :  { %v2260_v50 = vadd.f32 %v2259_v47, %v2074_v45 }
 0x838   :  { %v2197_v51 = vpop.f32.mrb[60].mxu0  ;;  %v2238_v16 = vpop.f32.mrb[60].mxu1 }
 0x839   :  { %3177 = vtanh.f32 %v2260_v50  ;;  %v2266_v59 = vadd.f32 %v2197_v51, %v2077_v48  ;;  %v2199_v5 = vpop.f32.mrb[61].mxu0  ;;  %v2959_v25 = vpop.f32.mrb[61].mxu1  ;;  %v2280_v34 = vadd.f32 %v4346_v62, %v2238_v16 }
 0x83a   :  { %v2273_v22 = vadd.f32 %v2199_v5, %v2078_v49  ;;  %v2201_v20 = vpop.f32.mrb[62].mxu0  ;;  %v2241_v17 = vpop.f32.mrb[62].mxu1 }
 0x83b   :  { %v2494_v52 = vmul.f32 -1.442695, %v2266_v59  ;;  %v2202_v6 = vpop.f32.mrb[63].mxu0  ;;  %v2960_v8 = vpop.f32.mrb[63].mxu1 }
 0x83c   :  { %v2495_v61 = vmul.f32 -1.442695, %v2273_v22 }
 0x83d   :  { %3179 = vpow2.f32 %v2494_v52 }
 0x83e   :  { %3181 = vpow2.f32 %v2495_v61 }
 0x843   :  { %v3178_v38 = vpop.eup %3177 }
 0x844   :  { %v2263_v21 = vmul.f32 %v3178_v38, %v2262_v54 }
 0x846   :  { %v2265_v36 = vadd.f32 %v2264_v7, %v2263_v21 }
 0x847   :  { %v3180_v58 = vpop.eup %3179 }
 0x848   :  { %2496 = vst [vmem:[%s4617_s4 + $0x38] sm:$0xff] %v2265_v36  ;;  %v2270_v23 = vadd.f32 1.0, %v3180_v58  ;;  %v3182_v3 = vpop.eup %3181 }
 0x849   :  { %v2277_v18 = vadd.f32 1.0, %v3182_v3 }
 0x84a   :  { %3183 = vrcp.f32 %v2270_v23 }
 0x84b   :  { %3185 = vrcp.f32 %v2277_v18 }
 0x854   :  { %v3184_v27 = vpop.eup %3183 }
 0x855   :  { %v2281_v53 = vmul.f32 %v3184_v27, %v2280_v34  ;;  %v3186_v9 = vpop.eup %3185 }
 0x856   :  { %v2284_v35 = vsub.f32 1.0, %v3186_v9  ;;  %v2286_v19 = vmul.f32 %v3186_v9, %v4582_v13 }
 0x857   :  { %v2282_v33 = vadd.f32 %v2281_v53, %v2079_v32 }
 0x859   :  { %3187 = vtanh.f32 %v2282_v33 }
 0x863   :  { %v3188_v40 = vpop.eup %3187 }
 0x864   :  { %v2285_v11 = vmul.f32 %v3188_v40, %v2284_v35 }
 0x866   :  { %v2287_v26 = vadd.f32 %v2286_v19, %v2285_v11 }
 0x868   :  { %2290 = vst [vmem:[%s4618_s5] sm:$0xff] %v2287_v26 }

</bundles_post_ra>
